<compile_context>
chip_gen: v5e
topology: v5e:2x2
jax: 0.10.0
libtpu: 0.0.40
codegen_flags: <defaults>
</compile_context>

<pallas_src>
import jax
import jax.numpy as jnp
from jax.experimental import pallas as pl
from jax.experimental.pallas import tpu as pltpu


def _make_fused_kernel(num_layers, H, W, Cin, C2):
    """Build a kernel computing the whole predictor stack for one batch element.

    Ref layout (inputs, outputs, scratch):
      x_ref            : (1, H, W, Cin)      f32  input feature map (NHWC)
      per layer l      : w_ref (3,3,cin_l,C2) bf16, aff_ref (3, C2) f32
                         (aff rows = [conv_bias, bn_scale, bn_shift], heads packed)
      o_ref            : (1, H, W, C2)       f32  packed output [score | loc]
      xpad             : (H+2, W+2, Cin)     f32  VMEM scratch (padded input)
      ppad             : (H+2, W+2, C2)      f32  VMEM scratch (padded intermediate)
    """
    HW = H * W

    def kernel(*refs):
        it = iter(refs)
        x_ref = next(it)
        layer_refs = [(next(it), next(it)) for _ in range(num_layers)]
        o_ref = next(it)
        xpad = next(it)
        ppad = next(it)

        def conv3x3(pad_ref, cin, w_ref):
            # 3x3 "same" conv as 9 shifted-tap matmuls accumulated in f32.
            acc = jnp.zeros((HW, C2), jnp.float32)
            for kh in range(3):
                for kw in range(3):
                    tap = pad_ref[kh:kh + H, kw:kw + W, :].reshape(HW, cin)
                    acc = acc + jnp.dot(tap.astype(jnp.bfloat16),
                                        w_ref[kh, kw],
                                        preferred_element_type=jnp.float32)
            return acc

        def bias_relu_bn(acc, aff_ref):
            aff = aff_ref[...]          # rows: [bias, scale, shift], each (C2,)
            # bias BEFORE ReLU, eval-mode BN (affine) AFTER ReLU.
            return jnp.maximum(acc + aff[0], 0.0) * aff[1] + aff[2]

        # ---- layer 0: both heads share the input; weights packed along Cout.
        xpad[...] = jnp.zeros_like(xpad)            # zero halo
        xpad[1:H + 1, 1:W + 1, :] = x_ref[0]        # pad=1 built in VMEM
        w0_ref, aff0_ref = layer_refs[0]
        y = bias_relu_bn(conv3x3(xpad, Cin, w0_ref), aff0_ref)       # (HW, C2)

        # ---- layers 1..L-1: block-diagonal packed weight (2C -> 2C).
        for w_ref, aff_ref in layer_refs[1:]:
            ppad[...] = jnp.zeros_like(ppad)
            ppad[1:H + 1, 1:W + 1, :] = y.reshape(H, W, C2)
            y = bias_relu_bn(conv3x3(ppad, C2, w_ref), aff_ref)

        # Single lane-dense store: both heads packed into 2C = 64 lanes.
        o_ref[...] = y.reshape(1, H, W, C2).astype(o_ref.dtype)

    return kernel


def _fused_predictor_source(x_nhwc, packed_layers, num_channels):
    """Run the fused predictor (all layers, both heads) for one source.

    packed_layers: list of (w_bf16, aff_f32) per layer (see class below).
    Returns (N, H, W, 2C) with [..., :C] = score head, [..., C:] = loc head.
    """
    N, H, W, Cin = x_nhwc.shape
    C2 = 2 * num_channels
    L = len(packed_layers)

    kernel = _make_fused_kernel(L, H, W, Cin, C2)

    inputs = [x_nhwc]
    in_specs = [pl.BlockSpec((1, H, W, Cin), lambda n: (n, 0, 0, 0))]
    for w, aff in packed_layers:
        inputs += [w, aff]
        in_specs += [
            pl.BlockSpec(w.shape, lambda n: (0, 0, 0, 0)),
            pl.BlockSpec(aff.shape, lambda n: (0, 0)),
        ]

    return pl.pallas_call(
        kernel,
        out_shape=jax.ShapeDtypeStruct((N, H, W, C2), x_nhwc.dtype),
        grid_spec=pltpu.PrefetchScalarGridSpec(
            num_scalar_prefetch=0,
            grid=(N,),
            in_specs=in_specs,
            out_specs=pl.BlockSpec((1, H, W, C2), lambda n: (n, 0, 0, 0)),
            scratch_shapes=[
                pltpu.VMEM((H + 2, W + 2, Cin), jnp.float32),
                pltpu.VMEM((H + 2, W + 2, C2), jnp.float32),
            ],
        ),
        compiler_params=pltpu.CompilerParams(
            dimension_semantics=("parallel",)),   # batch axis -> v7x megacore
    )(*inputs)


class SharedConvPredictorPallas:
    """JAX/Pallas re-implementation of SharedConvPredictor.forward (use_depthwise=False)."""

    def __init__(self, source_out_channels, num_boxes, num_classes,
                 use_depthwise=False, num_layers=2, num_channels=32,
                 kernel_size=3, eps=1e-5, key=jax.random.PRNGKey(0)):
        del num_boxes, num_classes          # not used by this module's forward
        assert kernel_size == 3
        assert not use_depthwise            # TODO(synk): depthwise variant not implemented
        if num_layers > 0:
            assert len(set(source_out_channels)) == 1

        self.num_layers = num_layers
        self.num_channels = num_channels
        self.num_sources = len(source_out_channels)
        self.out_channels = [num_channels] * self.num_sources

        C = num_channels

        # Raw per-head conv stacks (weights shared across sources within a head).
        convs = {}
        for head in ("score", "loc"):
            in_ch = source_out_channels[0]
            layers = []
            for _ in range(num_layers):
                key, wk = jax.random.split(key)
                # initializer: normal_(mean=0, std=0.01); bias zeros.
                w = 0.01 * jax.random.normal(wk, (3, 3, in_ch, C), jnp.float32)
                b = jnp.zeros((C,), jnp.float32)
                layers.append((w, b))
                in_ch = C
            convs[head] = layers

        # Per-(head, layer, source) BatchNorm2d, PyTorch defaults, eval-mode fold.
        def folded_bn():
            gamma = jnp.ones((C,), jnp.float32)
            beta = jnp.zeros((C,), jnp.float32)
            rmean = jnp.zeros((C,), jnp.float32)
            rvar = jnp.ones((C,), jnp.float32)
            scale = gamma * jax.lax.rsqrt(rvar + eps)
            shift = beta - rmean * scale
            return scale, shift

        norms = {head: [[folded_bn() for _ in range(self.num_sources)]
                        for _ in range(num_layers)]
                 for head in ("score", "loc")}

        # Pack per-source fused parameters:
        #   layer 0   : w = [w_score | w_loc] concatenated along Cout  -> (3,3,Cin,2C)
        #   layer >= 1: w = blockdiag(w_score, w_loc) on packed chans  -> (3,3,2C,2C)
        #   aff       : rows [bias, bn_scale, bn_shift], heads packed  -> (3, 2C)
        self.per_source_params = []
        for s in range(self.num_sources):
            packed = []
            for l in range(num_layers):
                w_s, b_s = convs["score"][l]
                w_l, b_l = convs["loc"][l]
                sc_s, sh_s = norms["score"][l][s]
                sc_l, sh_l = norms["loc"][l][s]
                if l == 0:
                    w = jnp.concatenate([w_s, w_l], axis=-1)
                else:
                    z = jnp.zeros((3, 3, C, C), jnp.float32)
                    top = jnp.concatenate([w_s, z], axis=-1)    # score-input rows
                    bot = jnp.concatenate([z, w_l], axis=-1)    # loc-input rows
                    w = jnp.concatenate([top, bot], axis=2)     # (3,3,2C,2C)
                aff = jnp.stack([jnp.concatenate([b_s, b_l]),
                                 jnp.concatenate([sc_s, sc_l]),
                                 jnp.concatenate([sh_s, sh_l])])
                packed.append((w.astype(jnp.bfloat16), aff))
            self.per_source_params.append(packed)

    def __call__(self, sources_nchw):
        if self.num_layers == 0:
            return list(sources_nchw), list(sources_nchw)
        C = self.num_channels
        score_out, loc_out = [], []
        for i, src in enumerate(sources_nchw):
            x = jnp.transpose(src, (0, 2, 3, 1))                   # NCHW -> NHWC (glue)
            packed = _fused_predictor_source(x, self.per_source_params[i], C)
            score_out.append(jnp.transpose(packed[..., :C], (0, 3, 1, 2)))  # -> NCHW
            loc_out.append(jnp.transpose(packed[..., C:], (0, 3, 1, 2)))
        return score_out, loc_out


if __name__ == "__main__":
    key = jax.random.PRNGKey(0)
    k_in0, k_in1, k_params = jax.random.split(key, 3)

    # Two feature-map sources (NCHW), batch=2, channels=4, spatial 16x16 & 8x8.
    sources = [
        jax.random.normal(k_in0, (2, 4, 16, 16), jnp.float32),
        jax.random.normal(k_in1, (2, 4, 8, 8), jnp.float32),
    ]

    predictor = SharedConvPredictorPallas(
        source_out_channels=[4, 4],
        num_boxes=[4, 4],
        num_classes=3,
        use_depthwise=False,
        num_layers=2,
        num_channels=32,
        kernel_size=3,
        key=k_params,
    )

    score_out, loc_out = predictor(sources)
    for t in score_out + loc_out:
        jax.block_until_ready(t)

    assert score_out[0].shape == (2, 32, 16, 16)
    assert score_out[1].shape == (2, 32, 8, 8)
    assert loc_out[0].shape == (2, 32, 16, 16)
    assert loc_out[1].shape == (2, 32, 8, 8)
    print("KERNEL_OK")
</pallas_src>

<mosaic_0001>
module attributes {stable_mosaic.version = 11 : i64} {
  func.func @kernel(%arg0: i32, %arg1: memref<1x16x16x4xf32, #tpu.memory_space<vmem>>, %arg2: memref<3x3x4x64xbf16, #tpu.memory_space<vmem>>, %arg3: memref<3x64xf32, #tpu.memory_space<vmem>>, %arg4: memref<3x3x64x64xbf16, #tpu.memory_space<vmem>>, %arg5: memref<3x64xf32, #tpu.memory_space<vmem>>, %arg6: memref<1x16x16x64xf32, #tpu.memory_space<vmem>>, %arg7: memref<18x18x4xf32, #tpu.memory_space<vmem>>, %arg8: memref<18x18x64xf32, #tpu.memory_space<vmem>>) attributes {dimension_semantics = [#tpu.dimension_semantics<parallel>], iteration_bounds = array<i64: 2>, scalar_prefetch = 0 : i64, scratch_operands = 2 : i64, tpu.core_type = #tpu.core_type<tc>, window_params = [{transform_indices = @transform_0, window_bounds = array<i64: 1, 16, 16, 4>}, {pipeline_mode = #tpu.pipeline_mode<synchronous>, transform_indices = @transform_1, window_bounds = array<i64: 3, 3, 4, 64>}, {pipeline_mode = #tpu.pipeline_mode<synchronous>, transform_indices = @transform_2, window_bounds = array<i64: 3, 64>}, {pipeline_mode = #tpu.pipeline_mode<synchronous>, transform_indices = @transform_3, window_bounds = array<i64: 3, 3, 64, 64>}, {pipeline_mode = #tpu.pipeline_mode<synchronous>, transform_indices = @transform_4, window_bounds = array<i64: 3, 64>}, {transform_indices = @transform_5, window_bounds = array<i64: 1, 16, 16, 64>}]} {
    %cst = arith.constant 0.000000e+00 : f32
    %0 = vector.broadcast %cst : f32 to vector<18x18x4xf32>
    %c0 = arith.constant 0 : index
    %c0_0 = arith.constant 0 : index
    %c0_1 = arith.constant 0 : index
    %1 = vector.load %arg7[%c0, %c0_0, %c0_1] : memref<18x18x4xf32, #tpu.memory_space<vmem>>, vector<18x18x4xf32>
    tpu.vector_store %arg7[%c0, %c0_0, %c0_1], %0 {strides = array<i32>} : memref<18x18x4xf32, #tpu.memory_space<vmem>>, vector<18x18x4xf32>,
    %c0_2 = arith.constant 0 : index
    %c0_3 = arith.constant 0 : index
    %c0_4 = arith.constant 0 : index
    %c0_5 = arith.constant 0 : index
    %2 = vector.load %arg1[%c0_2, %c0_3, %c0_4, %c0_5] : memref<1x16x16x4xf32, #tpu.memory_space<vmem>>, vector<1x16x16x4xf32>
    %3 = vector.shape_cast %2 : vector<1x16x16x4xf32> to vector<16x16x4xf32>
    %c1 = arith.constant 1 : index
    %c1_6 = arith.constant 1 : index
    %c0_7 = arith.constant 0 : index
    %4 = vector.load %arg7[%c1, %c1_6, %c0_7] : memref<18x18x4xf32, #tpu.memory_space<vmem>>, vector<16x16x4xf32>
    tpu.vector_store %arg7[%c1, %c1_6, %c0_7], %3 {strides = array<i32>} : memref<18x18x4xf32, #tpu.memory_space<vmem>>, vector<16x16x4xf32>,
    %cst_8 = arith.constant 0.000000e+00 : f32
    %5 = vector.broadcast %cst_8 : f32 to vector<256x64xf32>
    %c0_9 = arith.constant 0 : index
    %c0_10 = arith.constant 0 : index
    %c0_11 = arith.constant 0 : index
    %6 = vector.load %arg7[%c0_9, %c0_10, %c0_11] : memref<18x18x4xf32, #tpu.memory_space<vmem>>, vector<16x16x4xf32>
    %7 = vector.shape_cast %6 : vector<16x16x4xf32> to vector<256x4xf32>
    %8 = arith.truncf %7 : vector<256x4xf32> to vector<256x4xbf16>
    %c0_12 = arith.constant 0 : index
    %c0_13 = arith.constant 0 : index
    %c0_14 = arith.constant 0 : index
    %c0_15 = arith.constant 0 : index
    %9 = vector.load %arg2[%c0_12, %c0_13, %c0_14, %c0_15] : memref<3x3x4x64xbf16, #tpu.memory_space<vmem>>, vector<1x1x4x64xbf16>
    %10 = vector.shape_cast %9 : vector<1x1x4x64xbf16> to vector<4x64xbf16>
    %cst_16 = arith.constant dense<0.000000e+00> : vector<256x64xf32>
    %11 = tpu.matmul %8, %10, %cst_16 {dimension_numbers = #tpu.dot_dimension_numbers<[1], [0], [0], [1], [0, 0, 1, 1], [], []>} : vector<256x4xbf16>, vector<4x64xbf16>, vector<256x64xf32> -> vector<256x64xf32>
    %12 = arith.addf %5, %11 : vector<256x64xf32>
    %c0_17 = arith.constant 0 : index
    %c1_18 = arith.constant 1 : index
    %c0_19 = arith.constant 0 : index
    %13 = vector.load %arg7[%c0_17, %c1_18, %c0_19] : memref<18x18x4xf32, #tpu.memory_space<vmem>>, vector<16x16x4xf32>
    %14 = vector.shape_cast %13 : vector<16x16x4xf32> to vector<256x4xf32>
    %15 = arith.truncf %14 : vector<256x4xf32> to vector<256x4xbf16>
    %c0_20 = arith.constant 0 : index
    %c1_21 = arith.constant 1 : index
    %c0_22 = arith.constant 0 : index
    %c0_23 = arith.constant 0 : index
    %16 = vector.load %arg2[%c0_20, %c1_21, %c0_22, %c0_23] : memref<3x3x4x64xbf16, #tpu.memory_space<vmem>>, vector<1x1x4x64xbf16>
    %17 = vector.shape_cast %16 : vector<1x1x4x64xbf16> to vector<4x64xbf16>
    %cst_24 = arith.constant dense<0.000000e+00> : vector<256x64xf32>
    %18 = tpu.matmul %15, %17, %cst_24 {dimension_numbers = #tpu.dot_dimension_numbers<[1], [0], [0], [1], [0, 0, 1, 1], [], []>} : vector<256x4xbf16>, vector<4x64xbf16>, vector<256x64xf32> -> vector<256x64xf32>
    %19 = arith.addf %12, %18 : vector<256x64xf32>
    %c0_25 = arith.constant 0 : index
    %c2 = arith.constant 2 : index
    %c0_26 = arith.constant 0 : index
    %20 = vector.load %arg7[%c0_25, %c2, %c0_26] : memref<18x18x4xf32, #tpu.memory_space<vmem>>, vector<16x16x4xf32>
    %21 = vector.shape_cast %20 : vector<16x16x4xf32> to vector<256x4xf32>
    %22 = arith.truncf %21 : vector<256x4xf32> to vector<256x4xbf16>
    %c0_27 = arith.constant 0 : index
    %c2_28 = arith.constant 2 : index
    %c0_29 = arith.constant 0 : index
    %c0_30 = arith.constant 0 : index
    %23 = vector.load %arg2[%c0_27, %c2_28, %c0_29, %c0_30] : memref<3x3x4x64xbf16, #tpu.memory_space<vmem>>, vector<1x1x4x64xbf16>
    %24 = vector.shape_cast %23 : vector<1x1x4x64xbf16> to vector<4x64xbf16>
    %cst_31 = arith.constant dense<0.000000e+00> : vector<256x64xf32>
    %25 = tpu.matmul %22, %24, %cst_31 {dimension_numbers = #tpu.dot_dimension_numbers<[1], [0], [0], [1], [0, 0, 1, 1], [], []>} : vector<256x4xbf16>, vector<4x64xbf16>, vector<256x64xf32> -> vector<256x64xf32>
    %26 = arith.addf %19, %25 : vector<256x64xf32>
    %c1_32 = arith.constant 1 : index
    %c0_33 = arith.constant 0 : index
    %c0_34 = arith.constant 0 : index
    %27 = vector.load %arg7[%c1_32, %c0_33, %c0_34] : memref<18x18x4xf32, #tpu.memory_space<vmem>>, vector<16x16x4xf32>
    %28 = vector.shape_cast %27 : vector<16x16x4xf32> to vector<256x4xf32>
    %29 = arith.truncf %28 : vector<256x4xf32> to vector<256x4xbf16>
    %c1_35 = arith.constant 1 : index
    %c0_36 = arith.constant 0 : index
    %c0_37 = arith.constant 0 : index
    %c0_38 = arith.constant 0 : index
    %30 = vector.load %arg2[%c1_35, %c0_36, %c0_37, %c0_38] : memref<3x3x4x64xbf16, #tpu.memory_space<vmem>>, vector<1x1x4x64xbf16>
    %31 = vector.shape_cast %30 : vector<1x1x4x64xbf16> to vector<4x64xbf16>
    %cst_39 = arith.constant dense<0.000000e+00> : vector<256x64xf32>
    %32 = tpu.matmul %29, %31, %cst_39 {dimension_numbers = #tpu.dot_dimension_numbers<[1], [0], [0], [1], [0, 0, 1, 1], [], []>} : vector<256x4xbf16>, vector<4x64xbf16>, vector<256x64xf32> -> vector<256x64xf32>
    %33 = arith.addf %26, %32 : vector<256x64xf32>
    %c1_40 = arith.constant 1 : index
    %c1_41 = arith.constant 1 : index
    %c0_42 = arith.constant 0 : index
    %34 = vector.load %arg7[%c1_40, %c1_41, %c0_42] : memref<18x18x4xf32, #tpu.memory_space<vmem>>, vector<16x16x4xf32>
    %35 = vector.shape_cast %34 : vector<16x16x4xf32> to vector<256x4xf32>
    %36 = arith.truncf %35 : vector<256x4xf32> to vector<256x4xbf16>
    %c1_43 = arith.constant 1 : index
    %c1_44 = arith.constant 1 : index
    %c0_45 = arith.constant 0 : index
    %c0_46 = arith.constant 0 : index
    %37 = vector.load %arg2[%c1_43, %c1_44, %c0_45, %c0_46] : memref<3x3x4x64xbf16, #tpu.memory_space<vmem>>, vector<1x1x4x64xbf16>
    %38 = vector.shape_cast %37 : vector<1x1x4x64xbf16> to vector<4x64xbf16>
    %cst_47 = arith.constant dense<0.000000e+00> : vector<256x64xf32>
    %39 = tpu.matmul %36, %38, %cst_47 {dimension_numbers = #tpu.dot_dimension_numbers<[1], [0], [0], [1], [0, 0, 1, 1], [], []>} : vector<256x4xbf16>, vector<4x64xbf16>, vector<256x64xf32> -> vector<256x64xf32>
    %40 = arith.addf %33, %39 : vector<256x64xf32>
    %c1_48 = arith.constant 1 : index
    %c2_49 = arith.constant 2 : index
    %c0_50 = arith.constant 0 : index
    %41 = vector.load %arg7[%c1_48, %c2_49, %c0_50] : memref<18x18x4xf32, #tpu.memory_space<vmem>>, vector<16x16x4xf32>
    %42 = vector.shape_cast %41 : vector<16x16x4xf32> to vector<256x4xf32>
    %43 = arith.truncf %42 : vector<256x4xf32> to vector<256x4xbf16>
    %c1_51 = arith.constant 1 : index
    %c2_52 = arith.constant 2 : index
    %c0_53 = arith.constant 0 : index
    %c0_54 = arith.constant 0 : index
    %44 = vector.load %arg2[%c1_51, %c2_52, %c0_53, %c0_54] : memref<3x3x4x64xbf16, #tpu.memory_space<vmem>>, vector<1x1x4x64xbf16>
    %45 = vector.shape_cast %44 : vector<1x1x4x64xbf16> to vector<4x64xbf16>
    %cst_55 = arith.constant dense<0.000000e+00> : vector<256x64xf32>
    %46 = tpu.matmul %43, %45, %cst_55 {dimension_numbers = #tpu.dot_dimension_numbers<[1], [0], [0], [1], [0, 0, 1, 1], [], []>} : vector<256x4xbf16>, vector<4x64xbf16>, vector<256x64xf32> -> vector<256x64xf32>
    %47 = arith.addf %40, %46 : vector<256x64xf32>
    %c2_56 = arith.constant 2 : index
    %c0_57 = arith.constant 0 : index
    %c0_58 = arith.constant 0 : index
    %48 = vector.load %arg7[%c2_56, %c0_57, %c0_58] : memref<18x18x4xf32, #tpu.memory_space<vmem>>, vector<16x16x4xf32>
    %49 = vector.shape_cast %48 : vector<16x16x4xf32> to vector<256x4xf32>
    %50 = arith.truncf %49 : vector<256x4xf32> to vector<256x4xbf16>
    %c2_59 = arith.constant 2 : index
    %c0_60 = arith.constant 0 : index
    %c0_61 = arith.constant 0 : index
    %c0_62 = arith.constant 0 : index
    %51 = vector.load %arg2[%c2_59, %c0_60, %c0_61, %c0_62] : memref<3x3x4x64xbf16, #tpu.memory_space<vmem>>, vector<1x1x4x64xbf16>
    %52 = vector.shape_cast %51 : vector<1x1x4x64xbf16> to vector<4x64xbf16>
    %cst_63 = arith.constant dense<0.000000e+00> : vector<256x64xf32>
    %53 = tpu.matmul %50, %52, %cst_63 {dimension_numbers = #tpu.dot_dimension_numbers<[1], [0], [0], [1], [0, 0, 1, 1], [], []>} : vector<256x4xbf16>, vector<4x64xbf16>, vector<256x64xf32> -> vector<256x64xf32>
    %54 = arith.addf %47, %53 : vector<256x64xf32>
    %c2_64 = arith.constant 2 : index
    %c1_65 = arith.constant 1 : index
    %c0_66 = arith.constant 0 : index
    %55 = vector.load %arg7[%c2_64, %c1_65, %c0_66] : memref<18x18x4xf32, #tpu.memory_space<vmem>>, vector<16x16x4xf32>
    %56 = vector.shape_cast %55 : vector<16x16x4xf32> to vector<256x4xf32>
    %57 = arith.truncf %56 : vector<256x4xf32> to vector<256x4xbf16>
    %c2_67 = arith.constant 2 : index
    %c1_68 = arith.constant 1 : index
    %c0_69 = arith.constant 0 : index
    %c0_70 = arith.constant 0 : index
    %58 = vector.load %arg2[%c2_67, %c1_68, %c0_69, %c0_70] : memref<3x3x4x64xbf16, #tpu.memory_space<vmem>>, vector<1x1x4x64xbf16>
    %59 = vector.shape_cast %58 : vector<1x1x4x64xbf16> to vector<4x64xbf16>
    %cst_71 = arith.constant dense<0.000000e+00> : vector<256x64xf32>
    %60 = tpu.matmul %57, %59, %cst_71 {dimension_numbers = #tpu.dot_dimension_numbers<[1], [0], [0], [1], [0, 0, 1, 1], [], []>} : vector<256x4xbf16>, vector<4x64xbf16>, vector<256x64xf32> -> vector<256x64xf32>
    %61 = arith.addf %54, %60 : vector<256x64xf32>
    %c2_72 = arith.constant 2 : index
    %c2_73 = arith.constant 2 : index
    %c0_74 = arith.constant 0 : index
    %62 = vector.load %arg7[%c2_72, %c2_73, %c0_74] : memref<18x18x4xf32, #tpu.memory_space<vmem>>, vector<16x16x4xf32>
    %63 = vector.shape_cast %62 : vector<16x16x4xf32> to vector<256x4xf32>
    %64 = arith.truncf %63 : vector<256x4xf32> to vector<256x4xbf16>
    %c2_75 = arith.constant 2 : index
    %c2_76 = arith.constant 2 : index
    %c0_77 = arith.constant 0 : index
    %c0_78 = arith.constant 0 : index
    %65 = vector.load %arg2[%c2_75, %c2_76, %c0_77, %c0_78] : memref<3x3x4x64xbf16, #tpu.memory_space<vmem>>, vector<1x1x4x64xbf16>
    %66 = vector.shape_cast %65 : vector<1x1x4x64xbf16> to vector<4x64xbf16>
    %cst_79 = arith.constant dense<0.000000e+00> : vector<256x64xf32>
    %67 = tpu.matmul %64, %66, %cst_79 {dimension_numbers = #tpu.dot_dimension_numbers<[1], [0], [0], [1], [0, 0, 1, 1], [], []>} : vector<256x4xbf16>, vector<4x64xbf16>, vector<256x64xf32> -> vector<256x64xf32>
    %68 = arith.addf %61, %67 : vector<256x64xf32>
    %c0_80 = arith.constant 0 : index
    %c0_81 = arith.constant 0 : index
    %69 = vector.load %arg3[%c0_80, %c0_81] : memref<3x64xf32, #tpu.memory_space<vmem>>, vector<3x64xf32>
    %70 = vector.extract_strided_slice %69 {offsets = [0, 0], sizes = [1, 64], strides = [1, 1]} : vector<3x64xf32> to vector<1x64xf32>
    %71 = vector.shape_cast %70 : vector<1x64xf32> to vector<64xf32>
    %72 = vector.shape_cast %71 : vector<64xf32> to vector<1x64xf32>
    %73 = vector.broadcast %72 : vector<1x64xf32> to vector<256x64xf32>
    %74 = arith.addf %68, %73 : vector<256x64xf32>
    %cst_82 = arith.constant 0.000000e+00 : f32
    %75 = vector.broadcast %cst_82 : f32 to vector<256x64xf32>
    %76 = arith.maximumf %74, %75 : vector<256x64xf32>
    %77 = vector.extract_strided_slice %69 {offsets = [1, 0], sizes = [1, 64], strides = [1, 1]} : vector<3x64xf32> to vector<1x64xf32>
    %78 = vector.shape_cast %77 : vector<1x64xf32> to vector<64xf32>
    %79 = vector.shape_cast %78 : vector<64xf32> to vector<1x64xf32>
    %80 = vector.broadcast %79 : vector<1x64xf32> to vector<256x64xf32>
    %81 = arith.mulf %76, %80 : vector<256x64xf32>
    %82 = vector.extract_strided_slice %69 {offsets = [2, 0], sizes = [1, 64], strides = [1, 1]} : vector<3x64xf32> to vector<1x64xf32>
    %83 = vector.shape_cast %82 : vector<1x64xf32> to vector<64xf32>
    %84 = vector.shape_cast %83 : vector<64xf32> to vector<1x64xf32>
    %85 = vector.broadcast %84 : vector<1x64xf32> to vector<256x64xf32>
    %86 = arith.addf %81, %85 : vector<256x64xf32>
    %cst_83 = arith.constant 0.000000e+00 : f32
    %87 = vector.broadcast %cst_83 : f32 to vector<18x18x64xf32>
    %c0_84 = arith.constant 0 : index
    %c0_85 = arith.constant 0 : index
    %c0_86 = arith.constant 0 : index
    %88 = vector.load %arg8[%c0_84, %c0_85, %c0_86] : memref<18x18x64xf32, #tpu.memory_space<vmem>>, vector<18x18x64xf32>
    tpu.vector_store %arg8[%c0_84, %c0_85, %c0_86], %87 {strides = array<i32>} : memref<18x18x64xf32, #tpu.memory_space<vmem>>, vector<18x18x64xf32>,
    %89 = vector.shape_cast %86 : vector<256x64xf32> to vector<16x16x64xf32>
    %c1_87 = arith.constant 1 : index
    %c1_88 = arith.constant 1 : index
    %c0_89 = arith.constant 0 : index
    %90 = vector.load %arg8[%c1_87, %c1_88, %c0_89] : memref<18x18x64xf32, #tpu.memory_space<vmem>>, vector<16x16x64xf32>
    tpu.vector_store %arg8[%c1_87, %c1_88, %c0_89], %89 {strides = array<i32>} : memref<18x18x64xf32, #tpu.memory_space<vmem>>, vector<16x16x64xf32>,
    %cst_90 = arith.constant 0.000000e+00 : f32
    %91 = vector.broadcast %cst_90 : f32 to vector<256x64xf32>
    %c0_91 = arith.constant 0 : index
    %c0_92 = arith.constant 0 : index
    %c0_93 = arith.constant 0 : index
    %92 = vector.load %arg8[%c0_91, %c0_92, %c0_93] : memref<18x18x64xf32, #tpu.memory_space<vmem>>, vector<16x16x64xf32>
    %93 = vector.shape_cast %92 : vector<16x16x64xf32> to vector<256x64xf32>
    %94 = arith.truncf %93 : vector<256x64xf32> to vector<256x64xbf16>
    %c0_94 = arith.constant 0 : index
    %c0_95 = arith.constant 0 : index
    %c0_96 = arith.constant 0 : index
    %c0_97 = arith.constant 0 : index
    %95 = vector.load %arg4[%c0_94, %c0_95, %c0_96, %c0_97] : memref<3x3x64x64xbf16, #tpu.memory_space<vmem>>, vector<1x1x64x64xbf16>
    %96 = vector.shape_cast %95 : vector<1x1x64x64xbf16> to vector<64x64xbf16>
    %cst_98 = arith.constant dense<0.000000e+00> : vector<256x64xf32>
    %97 = tpu.matmul %94, %96, %cst_98 {dimension_numbers = #tpu.dot_dimension_numbers<[1], [0], [0], [1], [0, 0, 1, 1], [], []>} : vector<256x64xbf16>, vector<64x64xbf16>, vector<256x64xf32> -> vector<256x64xf32>
    %98 = arith.addf %91, %97 : vector<256x64xf32>
    %c0_99 = arith.constant 0 : index
    %c1_100 = arith.constant 1 : index
    %c0_101 = arith.constant 0 : index
    %99 = vector.load %arg8[%c0_99, %c1_100, %c0_101] : memref<18x18x64xf32, #tpu.memory_space<vmem>>, vector<16x16x64xf32>
    %100 = vector.shape_cast %99 : vector<16x16x64xf32> to vector<256x64xf32>
    %101 = arith.truncf %100 : vector<256x64xf32> to vector<256x64xbf16>
    %c0_102 = arith.constant 0 : index
    %c1_103 = arith.constant 1 : index
    %c0_104 = arith.constant 0 : index
    %c0_105 = arith.constant 0 : index
    %102 = vector.load %arg4[%c0_102, %c1_103, %c0_104, %c0_105] : memref<3x3x64x64xbf16, #tpu.memory_space<vmem>>, vector<1x1x64x64xbf16>
    %103 = vector.shape_cast %102 : vector<1x1x64x64xbf16> to vector<64x64xbf16>
    %cst_106 = arith.constant dense<0.000000e+00> : vector<256x64xf32>
    %104 = tpu.matmul %101, %103, %cst_106 {dimension_numbers = #tpu.dot_dimension_numbers<[1], [0], [0], [1], [0, 0, 1, 1], [], []>} : vector<256x64xbf16>, vector<64x64xbf16>, vector<256x64xf32> -> vector<256x64xf32>
    %105 = arith.addf %98, %104 : vector<256x64xf32>
    %c0_107 = arith.constant 0 : index
    %c2_108 = arith.constant 2 : index
    %c0_109 = arith.constant 0 : index
    %106 = vector.load %arg8[%c0_107, %c2_108, %c0_109] : memref<18x18x64xf32, #tpu.memory_space<vmem>>, vector<16x16x64xf32>
    %107 = vector.shape_cast %106 : vector<16x16x64xf32> to vector<256x64xf32>
    %108 = arith.truncf %107 : vector<256x64xf32> to vector<256x64xbf16>
    %c0_110 = arith.constant 0 : index
    %c2_111 = arith.constant 2 : index
    %c0_112 = arith.constant 0 : index
    %c0_113 = arith.constant 0 : index
    %109 = vector.load %arg4[%c0_110, %c2_111, %c0_112, %c0_113] : memref<3x3x64x64xbf16, #tpu.memory_space<vmem>>, vector<1x1x64x64xbf16>
    %110 = vector.shape_cast %109 : vector<1x1x64x64xbf16> to vector<64x64xbf16>
    %cst_114 = arith.constant dense<0.000000e+00> : vector<256x64xf32>
    %111 = tpu.matmul %108, %110, %cst_114 {dimension_numbers = #tpu.dot_dimension_numbers<[1], [0], [0], [1], [0, 0, 1, 1], [], []>} : vector<256x64xbf16>, vector<64x64xbf16>, vector<256x64xf32> -> vector<256x64xf32>
    %112 = arith.addf %105, %111 : vector<256x64xf32>
    %c1_115 = arith.constant 1 : index
    %c0_116 = arith.constant 0 : index
    %c0_117 = arith.constant 0 : index
    %113 = vector.load %arg8[%c1_115, %c0_116, %c0_117] : memref<18x18x64xf32, #tpu.memory_space<vmem>>, vector<16x16x64xf32>
    %114 = vector.shape_cast %113 : vector<16x16x64xf32> to vector<256x64xf32>
    %115 = arith.truncf %114 : vector<256x64xf32> to vector<256x64xbf16>
    %c1_118 = arith.constant 1 : index
    %c0_119 = arith.constant 0 : index
    %c0_120 = arith.constant 0 : index
    %c0_121 = arith.constant 0 : index
    %116 = vector.load %arg4[%c1_118, %c0_119, %c0_120, %c0_121] : memref<3x3x64x64xbf16, #tpu.memory_space<vmem>>, vector<1x1x64x64xbf16>
    %117 = vector.shape_cast %116 : vector<1x1x64x64xbf16> to vector<64x64xbf16>
    %cst_122 = arith.constant dense<0.000000e+00> : vector<256x64xf32>
    %118 = tpu.matmul %115, %117, %cst_122 {dimension_numbers = #tpu.dot_dimension_numbers<[1], [0], [0], [1], [0, 0, 1, 1], [], []>} : vector<256x64xbf16>, vector<64x64xbf16>, vector<256x64xf32> -> vector<256x64xf32>
    %119 = arith.addf %112, %118 : vector<256x64xf32>
    %c1_123 = arith.constant 1 : index
    %c1_124 = arith.constant 1 : index
    %c0_125 = arith.constant 0 : index
    %120 = vector.load %arg8[%c1_123, %c1_124, %c0_125] : memref<18x18x64xf32, #tpu.memory_space<vmem>>, vector<16x16x64xf32>
    %121 = vector.shape_cast %120 : vector<16x16x64xf32> to vector<256x64xf32>
    %122 = arith.truncf %121 : vector<256x64xf32> to vector<256x64xbf16>
    %c1_126 = arith.constant 1 : index
    %c1_127 = arith.constant 1 : index
    %c0_128 = arith.constant 0 : index
    %c0_129 = arith.constant 0 : index
    %123 = vector.load %arg4[%c1_126, %c1_127, %c0_128, %c0_129] : memref<3x3x64x64xbf16, #tpu.memory_space<vmem>>, vector<1x1x64x64xbf16>
    %124 = vector.shape_cast %123 : vector<1x1x64x64xbf16> to vector<64x64xbf16>
    %cst_130 = arith.constant dense<0.000000e+00> : vector<256x64xf32>
    %125 = tpu.matmul %122, %124, %cst_130 {dimension_numbers = #tpu.dot_dimension_numbers<[1], [0], [0], [1], [0, 0, 1, 1], [], []>} : vector<256x64xbf16>, vector<64x64xbf16>, vector<256x64xf32> -> vector<256x64xf32>
    %126 = arith.addf %119, %125 : vector<256x64xf32>
    %c1_131 = arith.constant 1 : index
    %c2_132 = arith.constant 2 : index
    %c0_133 = arith.constant 0 : index
    %127 = vector.load %arg8[%c1_131, %c2_132, %c0_133] : memref<18x18x64xf32, #tpu.memory_space<vmem>>, vector<16x16x64xf32>
    %128 = vector.shape_cast %127 : vector<16x16x64xf32> to vector<256x64xf32>
    %129 = arith.truncf %128 : vector<256x64xf32> to vector<256x64xbf16>
    %c1_134 = arith.constant 1 : index
    %c2_135 = arith.constant 2 : index
    %c0_136 = arith.constant 0 : index
    %c0_137 = arith.constant 0 : index
    %130 = vector.load %arg4[%c1_134, %c2_135, %c0_136, %c0_137] : memref<3x3x64x64xbf16, #tpu.memory_space<vmem>>, vector<1x1x64x64xbf16>
    %131 = vector.shape_cast %130 : vector<1x1x64x64xbf16> to vector<64x64xbf16>
    %cst_138 = arith.constant dense<0.000000e+00> : vector<256x64xf32>
    %132 = tpu.matmul %129, %131, %cst_138 {dimension_numbers = #tpu.dot_dimension_numbers<[1], [0], [0], [1], [0, 0, 1, 1], [], []>} : vector<256x64xbf16>, vector<64x64xbf16>, vector<256x64xf32> -> vector<256x64xf32>
    %133 = arith.addf %126, %132 : vector<256x64xf32>
    %c2_139 = arith.constant 2 : index
    %c0_140 = arith.constant 0 : index
    %c0_141 = arith.constant 0 : index
    %134 = vector.load %arg8[%c2_139, %c0_140, %c0_141] : memref<18x18x64xf32, #tpu.memory_space<vmem>>, vector<16x16x64xf32>
    %135 = vector.shape_cast %134 : vector<16x16x64xf32> to vector<256x64xf32>
    %136 = arith.truncf %135 : vector<256x64xf32> to vector<256x64xbf16>
    %c2_142 = arith.constant 2 : index
    %c0_143 = arith.constant 0 : index
    %c0_144 = arith.constant 0 : index
    %c0_145 = arith.constant 0 : index
    %137 = vector.load %arg4[%c2_142, %c0_143, %c0_144, %c0_145] : memref<3x3x64x64xbf16, #tpu.memory_space<vmem>>, vector<1x1x64x64xbf16>
    %138 = vector.shape_cast %137 : vector<1x1x64x64xbf16> to vector<64x64xbf16>
    %cst_146 = arith.constant dense<0.000000e+00> : vector<256x64xf32>
    %139 = tpu.matmul %136, %138, %cst_146 {dimension_numbers = #tpu.dot_dimension_numbers<[1], [0], [0], [1], [0, 0, 1, 1], [], []>} : vector<256x64xbf16>, vector<64x64xbf16>, vector<256x64xf32> -> vector<256x64xf32>
    %140 = arith.addf %133, %139 : vector<256x64xf32>
    %c2_147 = arith.constant 2 : index
    %c1_148 = arith.constant 1 : index
    %c0_149 = arith.constant 0 : index
    %141 = vector.load %arg8[%c2_147, %c1_148, %c0_149] : memref<18x18x64xf32, #tpu.memory_space<vmem>>, vector<16x16x64xf32>
    %142 = vector.shape_cast %141 : vector<16x16x64xf32> to vector<256x64xf32>
    %143 = arith.truncf %142 : vector<256x64xf32> to vector<256x64xbf16>
    %c2_150 = arith.constant 2 : index
    %c1_151 = arith.constant 1 : index
    %c0_152 = arith.constant 0 : index
    %c0_153 = arith.constant 0 : index
    %144 = vector.load %arg4[%c2_150, %c1_151, %c0_152, %c0_153] : memref<3x3x64x64xbf16, #tpu.memory_space<vmem>>, vector<1x1x64x64xbf16>
    %145 = vector.shape_cast %144 : vector<1x1x64x64xbf16> to vector<64x64xbf16>
    %cst_154 = arith.constant dense<0.000000e+00> : vector<256x64xf32>
    %146 = tpu.matmul %143, %145, %cst_154 {dimension_numbers = #tpu.dot_dimension_numbers<[1], [0], [0], [1], [0, 0, 1, 1], [], []>} : vector<256x64xbf16>, vector<64x64xbf16>, vector<256x64xf32> -> vector<256x64xf32>
    %147 = arith.addf %140, %146 : vector<256x64xf32>
    %c2_155 = arith.constant 2 : index
    %c2_156 = arith.constant 2 : index
    %c0_157 = arith.constant 0 : index
    %148 = vector.load %arg8[%c2_155, %c2_156, %c0_157] : memref<18x18x64xf32, #tpu.memory_space<vmem>>, vector<16x16x64xf32>
    %149 = vector.shape_cast %148 : vector<16x16x64xf32> to vector<256x64xf32>
    %150 = arith.truncf %149 : vector<256x64xf32> to vector<256x64xbf16>
    %c2_158 = arith.constant 2 : index
    %c2_159 = arith.constant 2 : index
    %c0_160 = arith.constant 0 : index
    %c0_161 = arith.constant 0 : index
    %151 = vector.load %arg4[%c2_158, %c2_159, %c0_160, %c0_161] : memref<3x3x64x64xbf16, #tpu.memory_space<vmem>>, vector<1x1x64x64xbf16>
    %152 = vector.shape_cast %151 : vector<1x1x64x64xbf16> to vector<64x64xbf16>
    %cst_162 = arith.constant dense<0.000000e+00> : vector<256x64xf32>
    %153 = tpu.matmul %150, %152, %cst_162 {dimension_numbers = #tpu.dot_dimension_numbers<[1], [0], [0], [1], [0, 0, 1, 1], [], []>} : vector<256x64xbf16>, vector<64x64xbf16>, vector<256x64xf32> -> vector<256x64xf32>
    %154 = arith.addf %147, %153 : vector<256x64xf32>
    %c0_163 = arith.constant 0 : index
    %c0_164 = arith.constant 0 : index
    %155 = vector.load %arg5[%c0_163, %c0_164] : memref<3x64xf32, #tpu.memory_space<vmem>>, vector<3x64xf32>
    %156 = vector.extract_strided_slice %155 {offsets = [0, 0], sizes = [1, 64], strides = [1, 1]} : vector<3x64xf32> to vector<1x64xf32>
    %157 = vector.shape_cast %156 : vector<1x64xf32> to vector<64xf32>
    %158 = vector.shape_cast %157 : vector<64xf32> to vector<1x64xf32>
    %159 = vector.broadcast %158 : vector<1x64xf32> to vector<256x64xf32>
    %160 = arith.addf %154, %159 : vector<256x64xf32>
    %cst_165 = arith.constant 0.000000e+00 : f32
    %161 = vector.broadcast %cst_165 : f32 to vector<256x64xf32>
    %162 = arith.maximumf %160, %161 : vector<256x64xf32>
    %163 = vector.extract_strided_slice %155 {offsets = [1, 0], sizes = [1, 64], strides = [1, 1]} : vector<3x64xf32> to vector<1x64xf32>
    %164 = vector.shape_cast %163 : vector<1x64xf32> to vector<64xf32>
    %165 = vector.shape_cast %164 : vector<64xf32> to vector<1x64xf32>
    %166 = vector.broadcast %165 : vector<1x64xf32> to vector<256x64xf32>
    %167 = arith.mulf %162, %166 : vector<256x64xf32>
    %168 = vector.extract_strided_slice %155 {offsets = [2, 0], sizes = [1, 64], strides = [1, 1]} : vector<3x64xf32> to vector<1x64xf32>
    %169 = vector.shape_cast %168 : vector<1x64xf32> to vector<64xf32>
    %170 = vector.shape_cast %169 : vector<64xf32> to vector<1x64xf32>
    %171 = vector.broadcast %170 : vector<1x64xf32> to vector<256x64xf32>
    %172 = arith.addf %167, %171 : vector<256x64xf32>
    %173 = vector.shape_cast %172 : vector<256x64xf32> to vector<1x16x16x64xf32>
    %c0_166 = arith.constant 0 : index
    %c0_167 = arith.constant 0 : index
    %c0_168 = arith.constant 0 : index
    %c0_169 = arith.constant 0 : index
    %174 = vector.load %arg6[%c0_166, %c0_167, %c0_168, %c0_169] : memref<1x16x16x64xf32, #tpu.memory_space<vmem>>, vector<1x16x16x64xf32>
    tpu.vector_store %arg6[%c0_166, %c0_167, %c0_168, %c0_169], %173 {strides = array<i32>} : memref<1x16x16x64xf32, #tpu.memory_space<vmem>>, vector<1x16x16x64xf32>,
    return
  }
  func.func @transform_0(%arg0: i32) -> (i32, i32, i32, i32) {
    %c0_i32 = arith.constant 0 : i32
    %c0_i32_0 = arith.constant 0 : i32
    %c0_i32_1 = arith.constant 0 : i32
    %c0_i32_2 = arith.constant 0 : i32
    return %arg0, %c0_i32, %c0_i32_0, %c0_i32_1 : i32, i32, i32, i32
  }
  func.func @transform_1(%arg0: i32) -> (i32, i32, i32, i32) {
    %c0_i32 = arith.constant 0 : i32
    %c0_i32_0 = arith.constant 0 : i32
    %c0_i32_1 = arith.constant 0 : i32
    %c0_i32_2 = arith.constant 0 : i32
    %c0_i32_3 = arith.constant 0 : i32
    return %c0_i32, %c0_i32_0, %c0_i32_1, %c0_i32_2 : i32, i32, i32, i32
  }
  func.func @transform_2(%arg0: i32) -> (i32, i32) {
    %c0_i32 = arith.constant 0 : i32
    %c0_i32_0 = arith.constant 0 : i32
    %c0_i32_1 = arith.constant 0 : i32
    return %c0_i32, %c0_i32_0 : i32, i32
  }
  func.func @transform_3(%arg0: i32) -> (i32, i32, i32, i32) {
    %c0_i32 = arith.constant 0 : i32
    %c0_i32_0 = arith.constant 0 : i32
    %c0_i32_1 = arith.constant 0 : i32
    %c0_i32_2 = arith.constant 0 : i32
    %c0_i32_3 = arith.constant 0 : i32
    return %c0_i32, %c0_i32_0, %c0_i32_1, %c0_i32_2 : i32, i32, i32, i32
  }
  func.func @transform_4(%arg0: i32) -> (i32, i32) {
    %c0_i32 = arith.constant 0 : i32
    %c0_i32_0 = arith.constant 0 : i32
    %c0_i32_1 = arith.constant 0 : i32
    return %c0_i32, %c0_i32_0 : i32, i32
  }
  func.func @transform_5(%arg0: i32) -> (i32, i32, i32, i32) {
    %c0_i32 = arith.constant 0 : i32
    %c0_i32_0 = arith.constant 0 : i32
    %c0_i32_1 = arith.constant 0 : i32
    %c0_i32_2 = arith.constant 0 : i32
    return %arg0, %c0_i32, %c0_i32_0, %c0_i32_1 : i32, i32, i32, i32
  }
}

</mosaic_0001>

<bundles_post_ra>
// kernel: tpu_custom_call.1
= control target key start
LH: loop header
LB: loop body
LE: loop exit
PB: predicated region body
PF: predicated region fallthrough
CT: control target
= control target key end

     0   :  { %10 = vsyncpa [#allocation5], 0  ;;  %s7724_s0 = inlined_call_operand.vmem [shape: f32[2,16,16,4], index: 0, kind: input, shape index: {}]   ;;  %s7725_s1 = inlined_call_operand.vmem [shape: bf16[3,3,4,64], index: 1, kind: input, shape index: {}]   ;;  %s7726_s2 = inlined_call_operand.vmem [shape: f32[3,64], index: 2, kind: input, shape index: {}]   ;;  %s7727_s3 = inlined_call_operand.vmem [shape: bf16[3,3,64,64], index: 3, kind: input, shape index: {}]   ;;  %s7728_s4 = inlined_call_operand.vmem [shape: f32[3,64], index: 4, kind: input, shape index: {}]   ;;  %s7729_s5 = inlined_call_operand.hbm [shape: f32[2,16,16,64], index: 5, kind: output, shape index: {}]  }
   0x1   :  { %12 = vsyncpa [#allocation5 + $0x1], 0  ;;  %s5624_s18 = smov 0   ;;  %s5626_s19 = smov 0  }
   0x2   :  { %s5628_s20 = smov 0   ;;  %s5630_s21 = smov 0  }
   0x3 LB: > { %s5645_s22 = sadd.s32 4294967295, %s5589_s21   ;;  %s4929_s23 = sadd.s32 4294967294, %s5589_s21   ;;  %s5589_s21 = sphi %s5630_s21, %s7791_s21   ;;  %s5585_s20 = sphi %s5628_s20, %s7790_s20   ;;  %s5581_s19 = sphi %s5626_s19, %s7789_s19   ;;  %s5577_s18 = sphi %s5624_s18, %s7788_s18  }
   0x4   : > { %s5649_s24 = sadd.s32 1, %s5589_s21   ;;  %s135_s25 = sadd.s32 1, %s5585_s20 }
   0x5   : > { %s132_s26 = ssub.s32 %s5589_s21, %s5649_s24  ;;  %p145_p0 = scmp.ne.s32.totalorder %s5585_s20, %s5581_s19 }
   0x6   : > { %p133_p1 = scmp.eq.s32.totalorder %s132_s26, 0  ;;  %p146_p2 = scmp.eq.s32.totalorder %s5645_s22, 1 }
   0x7   : > { %p151_p3 = scmp.ne.s32.totalorder %s5581_s19, %s5577_s18  ;;  %p152_p4 = scmp.eq.s32.totalorder %s4929_s23, 1 }
   0x8   : > { %s5660_s27 = scalar_select %p133_p1, %s5585_s20, %s135_s25  }
   0x9   : > { %p5662_p5 = por %p146_p2, %p145_p0  ;;  %p5666_p6 = por %p152_p4, %p151_p3 }
   0xa   : > { %p4932_p7 = scmp.ge.s32.totalorder %s5589_s21, 1  ;;  %p190_p8 = scmp.lt.s32.totalorder %s5589_s21, 3 }
   0xc   : > { %p191_p9 = pnand %p4932_p7, %p190_p8 }
   0xe   : > { %194 = sbr.rel (%p191_p9) target bundleno = 1517 (0x5ed), region = 40 }
  0x13   : > { %v4936_v0 = vld [vmem:[%s7725_s1 + $0x2] sm:$0x3]  ;;  %vm492_vm0 = vcmask 1041408   ;;  %vm224_vm1 = vcmask 31744   ;;  %vm227_vm2 = vcmask 25600   ;;  %v7730_v2 = vmov 0.0  }
  0x14   : > { %v494_v1 = vsel %vm492_vm0, %v4936_v0, 0  ;;  %225 = vst.msk [vmem:[#allocation2] sm:$0xff] %vm224_vm1, %v7730_v2  ;;  %v393_v3 = vld [vmem:[%s7725_s1] sm:$0x3]  ;;  %v4969_v10 = vld [vmem:[%s7725_s1 + $0x4] sm:$0x3] }
  0x15   : > { %503 = vmatpush.bf16.msra.mxu0 %v494_v1  ;;  %226 = vst.msk [vmem:[#allocation2 + $0x8] sm:$0xff] %vm224_vm1, %v7730_v2  ;;  %5483 = vmatpush.bf16.msra.mxu2 %v494_v1  ;;  %v634_v4 = vsel %vm492_vm0, %v393_v3, 0  ;;  %v4986_v12 = vld [vmem:[%s7725_s1 + $0x6] sm:$0x3]  ;;  %v824_v13 = vsel %vm492_vm0, %v4969_v10, 0  ;;  %p218_p10 = scmp.lt.s32.totalorder %s5645_s22, 1 }
  0x16   : > { %228 = vst.msk [vmem:[#allocation2 + $0x10] sm:$0x3] %vm227_vm2, %v7730_v2  ;;  %5484 = vmatpush.bf16.msra.mxu3 %v634_v4  ;;  %643 = vmatpush.bf16.msra.mxu1 %v634_v4  ;;  %v1046_v14 = vsel %vm492_vm0, %v4986_v12, 0  ;;  %v5003_v15 = vld [vmem:[%s7725_s1 + $0x8] sm:$0x3]  ;;  %vm2412_vm3 = vcmask 523264  }
  0x17   : > { %229 = vst.msk [vmem:[#allocation2 + $0x18] sm:$0xff] %vm224_vm1, %v7730_v2  ;;  %v1268_v16 = vsel %vm492_vm0, %v5003_v15, 0  ;;  %s219_s15 = scalar_select %p218_p10, %s5645_s22, 1  ;;  %vm2415_vm4 = vcmask 517120  }
  0x18   : > { %230 = vst.msk [vmem:[#allocation2 + $0x20] sm:$0xff] %vm224_vm1, %v7730_v2  ;;  %s215_s8 = sand.u32 1, %s5581_s19   ;;  %s5482_s11 = sshll.u32 %s5645_s22, 8 }
  0x19   : > { %231 = vst.msk [vmem:[#allocation2 + $0x28] sm:$0x3] %vm227_vm2, %v7730_v2  ;;  %833 = vmatpush.bf16.msrb.mxu2 %v824_v13  ;;  %1277 = vmatpush.bf16.msrb.mxu0 %v1268_v16  ;;  %s5445_s16 = sshll.u32 %s219_s15, 8  ;;  %s4933_s9 = sshll.u32 %s215_s8, 8 }
  0x1a   : > { %232 = vst.msk [vmem:[#allocation2 + $0x30] sm:$0xff] %vm224_vm1, %v7730_v2  ;;  %1055 = vmatpush.bf16.msrb.mxu3 %v1046_v14  ;;  %s5797_s25 = scalar_lea.vmem %s7724_s0, %s5445_s16  ;;  %s7438_s10 = scalar_lea.vmem [#allocation4], %s4933_s9 }
  0x1b   : > { %233 = vst.msk [vmem:[#allocation2 + $0x38] sm:$0xff] %vm224_vm1, %v7730_v2  ;;  %v345_v8 = vld [vmem:[#allocation2] sm:$0xff]  ;;  %v294_v17 = vld [vmem:[%s5797_s25 + $0x70] sm:$0xff]  ;;  %v295_v18 = vld [vmem:[%s5797_s25 + $0x78] sm:$0xff]  ;;  %s4863_s14 = scalar_lea.hbm %s7729_s5, %s5482_s11  ;;  %s4864_s15 = sshll.u32 %s7438_s10, 4  ;;  %s4865_s15 = int_to_ptr.vmem [resolvable:$true] %s4864_s15 }
  0x1c   : > { %v394_v5 = vld [vmem:[#allocation2 + $0x1] sm:$0xff]  ;;  %234 = vst.msk [vmem:[#allocation2 + $0x40] sm:$0x3] %vm227_vm2, %v7730_v2  ;;  %v282_v23 = vld [vmem:[%s5797_s25 + $0x10] sm:$0xff]  ;;  %v283_v24 = vld [vmem:[%s5797_s25 + $0x18] sm:$0xff]  ;;  %s4866_s16 = sshll.u32 %s4863_s14, 4  ;;  %s4867_s16 = int_to_ptr.hbm [resolvable:$true] %s4866_s16 }
  0x1d   : > { %v395_v6 = vld [vmem:[#allocation2 + $0x9] sm:$0xff]  ;;  %235 = vst.msk [vmem:[#allocation2 + $0x48] sm:$0xff] %vm224_vm1, %v7730_v2  ;;  %v280_v19 = vld [vmem:[%s5797_s25] sm:$0xff]  ;;  %v299_v26 = vld [vmem:[%s5797_s25 + $0x98] sm:$0xff]  ;;  %s4852_s22 = scalar_lea.sflag [#allocation5], %s215_s8  ;;  %s5541_s17 = sshra.s32 %s4867_s16, 4  ;;  %s5542_s17 = int_to_ptr.hbm [resolvable:$true] %s5541_s17 }
  0x1e   : > { %v426_v7 = vpack.c.bf16 %v395_v6, %v394_v5  ;;  %236 = vst.msk [vmem:[#allocation2 + $0x50] sm:$0xff] %vm224_vm1, %v7730_v2  ;;  %v346_v9 = vld [vmem:[#allocation2 + $0x8] sm:$0xff]  ;;  %v296_v21 = vld [vmem:[%s5797_s25 + $0x80] sm:$0xff]  ;;  %v298_v25 = vld [vmem:[%s5797_s25 + $0x90] sm:$0xff]  ;;  %s5543_s23 = scalar_lea.hbm %s5542_s17, 256  ;;  %s5547_s30 = scalar_lea.hbm %s7729_s5, 512 }
  0x1f   : > { %237 = vst.msk [vmem:[#allocation2 + $0x58] sm:$0x3] %vm227_vm2, %v7730_v2  ;;  %v377_v11 = vpack.c.bf16 %v346_v9, %v345_v8  ;;  %v281_v20 = vld [vmem:[%s5797_s25 + $0x8] sm:$0xff]  ;;  %v284_v37 = vld [vmem:[%s5797_s25 + $0x20] sm:$0xff]  ;;  %v286_v55 = vld [vmem:[%s5797_s25 + $0x30] sm:$0xff]  ;;  %p5544_p11 = scmp.ne.s32.totalorder %s5542_s17, %s5543_s23  ;;  %p5548_p0 = scmp.lt.s32.totalorder %s5542_s17, %s7729_s5 }
  0x20   : > { %4937 = vmatmul.msk.bf16.vlgmr.msra.gmra.mxu0 %vm224_vm1, %v426_v7  ;;  %238 = vst.msk [vmem:[#allocation2 + $0x60] sm:$0xff] %vm224_vm1, %v7730_v2  ;;  %v297_v22 = vld [vmem:[%s5797_s25 + $0x88] sm:$0xff]  ;;  %v300_v41 = vld [vmem:[%s5797_s25 + $0xa0] sm:$0xff]  ;;  %v287_v56 = vld [vmem:[%s5797_s25 + $0x38] sm:$0xff]  ;;  %p5549_p1 = scmp.lt.s32.totalorder %s5547_s30, %s5543_s23 }
  0x21   : > { %239 = vst.msk [vmem:[#allocation2 + $0x68] sm:$0xff] %vm224_vm1, %v7730_v2  ;;  %4953 = vmatmul.msk.bf16.vlgmr.msra.gmra.mxu1 %vm224_vm1, %v377_v11  ;;  %v285_v40 = vld [vmem:[%s5797_s25 + $0x28] sm:$0xff]  ;;  %v302_v57 = vld [vmem:[%s5797_s25 + $0xb0] sm:$0xff]  ;;  %v303_v58 = vld [vmem:[%s5797_s25 + $0xb8] sm:$0xff]  ;;  %p5545_p12 = pnand %p5544_p11, %p5662_p5 }
  0x22   : > { %240 = vst.msk [vmem:[#allocation2 + $0x70] sm:$0x3] %vm227_vm2, %v7730_v2  ;;  %v301_v42 = vld [vmem:[%s5797_s25 + $0xa8] sm:$0xff]  ;;  %v288_v8 = vld [vmem:[%s5797_s25 + $0x40] sm:$0xff]  ;;  %p5550_p2 = por %p5549_p1, %p5548_p0 }
  0x23   : > { %241 = vst.msk [vmem:[#allocation2 + $0x78] sm:$0xff] %vm224_vm1, %v7730_v2  ;;  %v289_v9 = vld [vmem:[%s5797_s25 + $0x48] sm:$0xff]  ;;  %v304_v10 = vld [vmem:[%s5797_s25 + $0xc0] sm:$0xff]  ;;  %p5546_p13 = pneg %p5545_p12 }
  0x24   : > { %242 = vst.msk [vmem:[#allocation2 + $0x80] sm:$0xff] %vm224_vm1, %v7730_v2  ;;  %v305_v11 = vld [vmem:[%s5797_s25 + $0xc8] sm:$0xff] }
  0x25   : > { %243 = vst.msk [vmem:[#allocation2 + $0x88] sm:$0x3] %vm227_vm2, %v7730_v2  ;;  %p5551_p3 = pnand %p5550_p2, %p5546_p13 }
  0x26   : > { %244 = vst.msk [vmem:[#allocation2 + $0x90] sm:$0xff] %vm224_vm1, %v7730_v2 }
  0x27   : > { %245 = vst.msk [vmem:[#allocation2 + $0x98] sm:$0xff] %vm224_vm1, %v7730_v2 }
  0x28   : > { %246 = vst.msk [vmem:[#allocation2 + $0xa0] sm:$0x3] %vm227_vm2, %v7730_v2 }
  0x29   : > { %247 = vst.msk [vmem:[#allocation2 + $0xa8] sm:$0xff] %vm224_vm1, %v7730_v2 }
  0x2a   : > { %248 = vst.msk [vmem:[#allocation2 + $0xb0] sm:$0xff] %vm224_vm1, %v7730_v2 }
  0x2b   : > { %249 = vst.msk [vmem:[#allocation2 + $0xb8] sm:$0x3] %vm227_vm2, %v7730_v2 }
  0x2c   : > { %250 = vst.msk [vmem:[#allocation2 + $0xc0] sm:$0xff] %vm224_vm1, %v7730_v2 }
  0x2d   : > { %251 = vst.msk [vmem:[#allocation2 + $0xc8] sm:$0xff] %vm224_vm1, %v7730_v2 }
  0x2e   : > { %252 = vst.msk [vmem:[#allocation2 + $0xd0] sm:$0x3] %vm227_vm2, %v7730_v2 }
  0x2f   : > { %253 = vst.msk [vmem:[#allocation2 + $0xd8] sm:$0xff] %vm224_vm1, %v7730_v2 }
  0x30   : > { %254 = vst.msk [vmem:[#allocation2 + $0xe0] sm:$0xff] %vm224_vm1, %v7730_v2 }
  0x31   : > { %255 = vst.msk [vmem:[#allocation2 + $0xe8] sm:$0x3] %vm227_vm2, %v7730_v2 }
  0x32   : > { %256 = vst.msk [vmem:[#allocation2 + $0xf0] sm:$0xff] %vm224_vm1, %v7730_v2 }
  0x33   : > { %257 = vst.msk [vmem:[#allocation2 + $0xf8] sm:$0xff] %vm224_vm1, %v7730_v2 }
  0x34   : > { %258 = vst.msk [vmem:[#allocation2 + $0x100] sm:$0x3] %vm227_vm2, %v7730_v2 }
  0x35   : > { %259 = vst.msk [vmem:[#allocation2 + $0x108] sm:$0xff] %vm224_vm1, %v7730_v2 }
  0x36   : > { %260 = vst.msk [vmem:[#allocation2 + $0x110] sm:$0xff] %vm224_vm1, %v7730_v2 }
  0x37   : > { %261 = vst.msk [vmem:[#allocation2 + $0x118] sm:$0x3] %vm227_vm2, %v7730_v2 }
  0x38   : > { %262 = vst.msk [vmem:[#allocation2 + $0x120] sm:$0xff] %vm224_vm1, %v7730_v2 }
  0x39   : > { %263 = vst.msk [vmem:[#allocation2 + $0x128] sm:$0xff] %vm224_vm1, %v7730_v2 }
  0x3a   : > { %264 = vst.msk [vmem:[#allocation2 + $0x130] sm:$0x3] %vm227_vm2, %v7730_v2 }
  0x3b   : > { %265 = vst.msk [vmem:[#allocation2 + $0x138] sm:$0xff] %vm224_vm1, %v7730_v2 }
  0x3c   : > { %266 = vst.msk [vmem:[#allocation2 + $0x140] sm:$0xff] %vm224_vm1, %v7730_v2 }
  0x3d   : > { %267 = vst.msk [vmem:[#allocation2 + $0x148] sm:$0x3] %vm227_vm2, %v7730_v2 }
  0x3e   : > { %268 = vst.msk [vmem:[#allocation2 + $0x150] sm:$0xff] %vm224_vm1, %v7730_v2 }
  0x3f   : > { %269 = vst.msk [vmem:[#allocation2 + $0x158] sm:$0xff] %vm224_vm1, %v7730_v2 }
  0x40   : > { %270 = vst.msk [vmem:[#allocation2 + $0x160] sm:$0x3] %vm227_vm2, %v7730_v2 }
  0x41   : > { %271 = vst.msk [vmem:[#allocation2 + $0x168] sm:$0xff] %vm224_vm1, %v7730_v2 }
  0x42   : > { %272 = vst.msk [vmem:[#allocation2 + $0x170] sm:$0xff] %vm224_vm1, %v7730_v2 }
  0x43   : > { %273 = vst.msk [vmem:[#allocation2 + $0x178] sm:$0x3] %vm227_vm2, %v7730_v2 }
  0x44   : > { %274 = vst.msk [vmem:[#allocation2 + $0x180] sm:$0xff] %vm224_vm1, %v7730_v2 }
  0x45   : > { %275 = vst.msk [vmem:[#allocation2 + $0x188] sm:$0xff] %vm224_vm1, %v7730_v2 }
  0x46   : > { %276 = vst.msk [vmem:[#allocation2 + $0x190] sm:$0x3] %vm227_vm2, %v7730_v2 }
  0x47   : > { %277 = vst.msk [vmem:[#allocation2 + $0x198] sm:$0xff] %vm224_vm1, %v7730_v2 }
  0x48   : > { %278 = vst.msk [vmem:[#allocation2 + $0x1a0] sm:$0xff] %vm224_vm1, %v7730_v2 }
  0x49   : > { %279 = vst.msk [vmem:[#allocation2 + $0x1a8] sm:$0x3] %vm227_vm2, %v7730_v2 }
  0x4a   : > { %327 = vst.msk [vmem:[#allocation2 + $0xc1] sm:$0xff] %vm224_vm1, %v294_v17 }
  0x4b   : > { %328 = vst.msk [vmem:[#allocation2 + $0xc9] sm:$0xff] %vm224_vm1, %v295_v18 }
  0x4c   : > { %313 = vst.msk [vmem:[#allocation2 + $0x19] sm:$0xff] %vm224_vm1, %v280_v19 }
  0x4d   : > { %314 = vst.msk [vmem:[#allocation2 + $0x21] sm:$0xff] %vm224_vm1, %v281_v20 }
  0x4e   : > { %329 = vst.msk [vmem:[#allocation2 + $0xd9] sm:$0xff] %vm224_vm1, %v296_v21 }
  0x4f   : > { %330 = vst.msk [vmem:[#allocation2 + $0xe1] sm:$0xff] %vm224_vm1, %v297_v22 }
  0x50   : > { %315 = vst.msk [vmem:[#allocation2 + $0x31] sm:$0xff] %vm224_vm1, %v282_v23 }
  0x51   : > { %v410_v27 = vld [vmem:[#allocation2 + $0xc1] sm:$0xff]  ;;  %316 = vst.msk [vmem:[#allocation2 + $0x39] sm:$0xff] %vm224_vm1, %v283_v24  ;;  %v290_v24 = vld [vmem:[%s5797_s25 + $0x50] sm:$0xff] }
  0x52   : > { %v361_v28 = vld [vmem:[#allocation2 + $0xc0] sm:$0xff]  ;;  %v411_v29 = vld [vmem:[#allocation2 + $0xc9] sm:$0xff]  ;;  %331 = vst.msk [vmem:[#allocation2 + $0xf1] sm:$0xff] %vm224_vm1, %v298_v25  ;;  %v291_v25 = vld [vmem:[%s5797_s25 + $0x58] sm:$0xff] }
  0x53   : > { %v362_v30 = vld [vmem:[#allocation2 + $0xc8] sm:$0xff]  ;;  %v5828_v31 = vpack.c.bf16 %v411_v29, %v410_v27  ;;  %v396_v33 = vld [vmem:[#allocation2 + $0x19] sm:$0xff]  ;;  %332 = vst.msk [vmem:[#allocation2 + $0xf9] sm:$0xff] %vm224_vm1, %v299_v26  ;;  %v306_v26 = vld [vmem:[%s5797_s25 + $0xd0] sm:$0xff] }
  0x54   : > { %v5830_v32 = vpack.c.bf16 %v362_v30, %v361_v28  ;;  %v347_v34 = vld [vmem:[#allocation2 + $0x18] sm:$0xff]  ;;  %v397_v35 = vld [vmem:[#allocation2 + $0x21] sm:$0xff]  ;;  %317 = vst.msk [vmem:[#allocation2 + $0x49] sm:$0xff] %vm224_vm1, %v284_v37 }
  0x55   : > { %v348_v36 = vld [vmem:[#allocation2 + $0x20] sm:$0xff]  ;;  %4945 = vmatmul.msk.bf16.vlgmr.msra.gmra.mxu2 %vm224_vm1, %v5828_v31  ;;  %v5838_v38 = vpack.c.bf16 %v397_v35, %v396_v33  ;;  %318 = vst.msk [vmem:[#allocation2 + $0x51] sm:$0xff] %vm224_vm1, %v285_v40  ;;  %v363_v45 = vld [vmem:[#allocation2 + $0xd8] sm:$0xff] }
  0x56   : > { %4961 = vmatmul.msk.bf16.vlgmr.msra.gmra.mxu3 %vm224_vm1, %v5830_v32  ;;  %v5840_v39 = vpack.c.bf16 %v348_v36, %v347_v34  ;;  %333 = vst.msk [vmem:[#allocation2 + $0x109] sm:$0xff] %vm224_vm1, %v300_v41  ;;  %v412_v43 = vld [vmem:[#allocation2 + $0xd9] sm:$0xff]  ;;  %v413_v44 = vld [vmem:[#allocation2 + $0xe1] sm:$0xff] }
  0x57   : > { %4938 = vmatmul.msk.bf16.gmra.mxu0 %vm224_vm1, %v5838_v38  ;;  %334 = vst.msk [vmem:[#allocation2 + $0x111] sm:$0xff] %vm224_vm1, %v301_v42  ;;  %v364_v46 = vld [vmem:[#allocation2 + $0xe0] sm:$0xff]  ;;  %v398_v47 = vld [vmem:[#allocation2 + $0x31] sm:$0xff]  ;;  %v5853_v51 = vpack.c.bf16 %v413_v44, %v412_v43 }
  0x58   : > { %4954 = vmatmul.msk.bf16.gmra.mxu1 %vm224_vm1, %v5840_v39  ;;  %v399_v48 = vld [vmem:[#allocation2 + $0x39] sm:$0xff]  ;;  %v349_v49 = vld [vmem:[#allocation2 + $0x30] sm:$0xff]  ;;  %v5855_v52 = vpack.c.bf16 %v364_v46, %v363_v45  ;;  %319 = vst.msk [vmem:[#allocation2 + $0x61] sm:$0xff] %vm224_vm1, %v286_v55  ;;  %v293_v45 = vld [vmem:[%s5797_s25 + $0x68] sm:$0xff] }
  0x59   : > { %v350_v50 = vld [vmem:[#allocation2 + $0x38] sm:$0xff]  ;;  %v5857_v53 = vpack.c.bf16 %v399_v48, %v398_v47  ;;  %320 = vst.msk [vmem:[#allocation2 + $0x69] sm:$0xff] %vm224_vm1, %v287_v56  ;;  %v365_v61 = vld [vmem:[#allocation2 + $0xf0] sm:$0xff]  ;;  %v292_v44 = vld [vmem:[%s5797_s25 + $0x60] sm:$0xff] }
  0x5a   : > { %v5859_v54 = vpack.c.bf16 %v350_v50, %v349_v49  ;;  %335 = vst.msk [vmem:[#allocation2 + $0x121] sm:$0xff] %vm224_vm1, %v302_v57  ;;  %v414_v59 = vld [vmem:[#allocation2 + $0xf1] sm:$0xff]  ;;  %v415_v60 = vld [vmem:[#allocation2 + $0xf9] sm:$0xff]  ;;  %v309_v47 = vld [vmem:[%s5797_s25 + $0xe8] sm:$0xff] }
  0x5b   : > { %336 = vst.msk [vmem:[#allocation2 + $0x129] sm:$0xff] %vm224_vm1, %v303_v58  ;;  %v366_v62 = vld [vmem:[#allocation2 + $0xf8] sm:$0xff]  ;;  %v400_v63 = vld [vmem:[#allocation2 + $0x49] sm:$0xff]  ;;  %v5877_v4 = vpack.c.bf16 %v415_v60, %v414_v59  ;;  %v308_v46 = vld [vmem:[%s5797_s25 + $0xe0] sm:$0xff] }
  0x5c   : > { %v401_v0 = vld [vmem:[#allocation2 + $0x51] sm:$0xff]  ;;  %v351_v1 = vld [vmem:[#allocation2 + $0x48] sm:$0xff]  ;;  %v5879_v5 = vpack.c.bf16 %v366_v62, %v365_v61  ;;  %321 = vst.msk [vmem:[#allocation2 + $0x79] sm:$0xff] %vm224_vm1, %v288_v8 }
  0x5d   : > { %v352_v3 = vld [vmem:[#allocation2 + $0x50] sm:$0xff]  ;;  %v5881_v6 = vpack.c.bf16 %v401_v0, %v400_v63  ;;  %322 = vst.msk [vmem:[#allocation2 + $0x81] sm:$0xff] %vm224_vm1, %v289_v9  ;;  %v367_v14 = vld [vmem:[#allocation2 + $0x108] sm:$0xff]  ;;  %v307_v27 = vld [vmem:[%s5797_s25 + $0xd8] sm:$0xff] }
  0x5e   : > { %v5883_v7 = vpack.c.bf16 %v352_v3, %v351_v1  ;;  %337 = vst.msk [vmem:[#allocation2 + $0x139] sm:$0xff] %vm224_vm1, %v304_v10  ;;  %v416_v12 = vld [vmem:[#allocation2 + $0x109] sm:$0xff]  ;;  %v417_v13 = vld [vmem:[#allocation2 + $0x111] sm:$0xff] }
  0x5f   : > { %338 = vst.msk [vmem:[#allocation2 + $0x141] sm:$0xff] %vm224_vm1, %v305_v11  ;;  %v368_v15 = vld [vmem:[#allocation2 + $0x110] sm:$0xff]  ;;  %v402_v16 = vld [vmem:[#allocation2 + $0x61] sm:$0xff]  ;;  %v5901_v20 = vpack.c.bf16 %v417_v13, %v416_v12 }
  0x60   : > { %v403_v17 = vld [vmem:[#allocation2 + $0x69] sm:$0xff]  ;;  %v353_v18 = vld [vmem:[#allocation2 + $0x60] sm:$0xff]  ;;  %v5903_v21 = vpack.c.bf16 %v368_v15, %v367_v14  ;;  %323 = vst.msk [vmem:[#allocation2 + $0x91] sm:$0xff] %vm224_vm1, %v290_v24 }
  0x61   : > { %v354_v19 = vld [vmem:[#allocation2 + $0x68] sm:$0xff]  ;;  %v5905_v22 = vpack.c.bf16 %v403_v17, %v402_v16  ;;  %324 = vst.msk [vmem:[#allocation2 + $0x99] sm:$0xff] %vm224_vm1, %v291_v25  ;;  %v369_v30 = vld [vmem:[#allocation2 + $0x120] sm:$0xff] }
  0x62   : > { %v5907_v23 = vpack.c.bf16 %v354_v19, %v353_v18  ;;  %339 = vst.msk [vmem:[#allocation2 + $0x151] sm:$0xff] %vm224_vm1, %v306_v26  ;;  %v418_v28 = vld [vmem:[#allocation2 + $0x121] sm:$0xff]  ;;  %v419_v29 = vld [vmem:[#allocation2 + $0x129] sm:$0xff] }
  0x63   : > { %340 = vst.msk [vmem:[#allocation2 + $0x159] sm:$0xff] %vm224_vm1, %v307_v27  ;;  %v370_v33 = vld [vmem:[#allocation2 + $0x128] sm:$0xff]  ;;  %v404_v34 = vld [vmem:[#allocation2 + $0x79] sm:$0xff]  ;;  %v5925_v40 = vpack.c.bf16 %v419_v29, %v418_v28  ;;  %v5071_v29 = vld [vmem:[%s7725_s1 + $0x10] sm:$0x3] }
  0x64   : > { %v405_v35 = vld [vmem:[#allocation2 + $0x81] sm:$0xff]  ;;  %v355_v36 = vld [vmem:[#allocation2 + $0x78] sm:$0xff]  ;;  %v5927_v41 = vpack.c.bf16 %v370_v33, %v369_v30  ;;  %325 = vst.msk [vmem:[#allocation2 + $0xa9] sm:$0xff] %vm224_vm1, %v292_v44  ;;  %v5037_v24 = vld [vmem:[%s7725_s1 + $0xc] sm:$0x3]  ;;  %v2157_v33 = vsel %vm492_vm0, %v5071_v29, 0 }
  0x65   : > { %4946 = vmatmul.msk.bf16.gmra.mxu2 %vm224_vm1, %v5853_v51  ;;  %v356_v37 = vld [vmem:[#allocation2 + $0x80] sm:$0xff]  ;;  %v5929_v42 = vpack.c.bf16 %v405_v35, %v404_v34  ;;  %326 = vst.msk [vmem:[#allocation2 + $0xb1] sm:$0xff] %vm224_vm1, %v293_v45  ;;  %v371_v50 = vld [vmem:[#allocation2 + $0x138] sm:$0xff]  ;;  %v5054_v25 = vld [vmem:[%s7725_s1 + $0xe] sm:$0x3]  ;;  %v1713_v26 = vsel %vm492_vm0, %v5037_v24, 0  ;;  %2166 = vmatpush.bf16.msra.mxu0 %v2157_v33 }
  0x66   : > { %4962 = vmatmul.msk.bf16.gmra.mxu3 %vm224_vm1, %v5855_v52  ;;  %v5931_v43 = vpack.c.bf16 %v356_v37, %v355_v36  ;;  %341 = vst.msk [vmem:[#allocation2 + $0x169] sm:$0xff] %vm224_vm1, %v308_v46  ;;  %v420_v48 = vld [vmem:[#allocation2 + $0x139] sm:$0xff]  ;;  %v421_v49 = vld [vmem:[#allocation2 + $0x141] sm:$0xff]  ;;  %v1935_v27 = vsel %vm492_vm0, %v5054_v25, 0  ;;  %1722 = vmatpush.bf16.msra.mxu2 %v1713_v26  ;;  %v5020_v28 = vld [vmem:[%s7725_s1 + $0xa] sm:$0x3] }
  0x67   : > { %4939 = vmatmul.msk.bf16.gmra.mxu0 %vm224_vm1, %v5857_v53  ;;  %342 = vst.msk [vmem:[#allocation2 + $0x171] sm:$0xff] %vm224_vm1, %v309_v47  ;;  %v372_v55 = vld [vmem:[#allocation2 + $0x140] sm:$0xff]  ;;  %v406_v56 = vld [vmem:[#allocation2 + $0x91] sm:$0xff]  ;;  %v5949_v60 = vpack.c.bf16 %v421_v49, %v420_v48  ;;  %1944 = vmatpush.bf16.msra.mxu3 %v1935_v27  ;;  %v1490_v30 = vsel %vm492_vm0, %v5020_v28, 0 }
  0x68   : > { %4955 = vmatmul.msk.bf16.gmra.mxu1 %vm224_vm1, %v5859_v54  ;;  %v407_v57 = vld [vmem:[#allocation2 + $0x99] sm:$0xff]  ;;  %v357_v58 = vld [vmem:[#allocation2 + $0x90] sm:$0xff]  ;;  %v5951_v61 = vpack.c.bf16 %v372_v55, %v371_v50  ;;  %v1392_v45 = vld [vmem:[#allocation2 + $0x22] sm:$0xff] }
  0x69   : > { %v358_v59 = vld [vmem:[#allocation2 + $0x98] sm:$0xff]  ;;  %v5953_v62 = vpack.c.bf16 %v407_v57, %v406_v56  ;;  %v373_v3 = vld [vmem:[#allocation2 + $0x150] sm:$0xff]  ;;  %1499 = vmatpush.bf16.msrb.mxu1 %v1490_v30  ;;  %v725_v55 = vld [vmem:[#allocation2 + $0x2] sm:$0xff] }
  0x6a   : > { %v5955_v63 = vpack.c.bf16 %v358_v59, %v357_v58  ;;  %v422_v0 = vld [vmem:[#allocation2 + $0x151] sm:$0xff]  ;;  %v423_v1 = vld [vmem:[#allocation2 + $0x159] sm:$0xff] }
  0x6b   : > { %v374_v8 = vld [vmem:[#allocation2 + $0x158] sm:$0xff]  ;;  %v408_v9 = vld [vmem:[#allocation2 + $0xa9] sm:$0xff]  ;;  %v5965_v13 = vpack.c.bf16 %v423_v1, %v422_v0 }
  0x6c   : > { %v409_v10 = vld [vmem:[#allocation2 + $0xb1] sm:$0xff]  ;;  %v359_v11 = vld [vmem:[#allocation2 + $0xa8] sm:$0xff]  ;;  %v5967_v14 = vpack.c.bf16 %v374_v8, %v373_v3  ;;  %v1391_v44 = vld [vmem:[#allocation2 + $0x1a] sm:$0xff] }
  0x6d   : > { %v360_v12 = vld [vmem:[#allocation2 + $0xb0] sm:$0xff]  ;;  %v5969_v15 = vpack.c.bf16 %v409_v10, %v408_v9  ;;  %v375_v36 = vld [vmem:[#allocation2 + $0x168] sm:$0xff]  ;;  %v1423_v48 = vpack.c.bf16 %v1392_v45, %v1391_v44  ;;  %v1394_v58 = vld [vmem:[#allocation2 + $0x3a] sm:$0xff] }
  0x6e   : > { %v5971_v16 = vpack.c.bf16 %v360_v12, %v359_v11  ;;  %v424_v34 = vld [vmem:[#allocation2 + $0x169] sm:$0xff]  ;;  %v425_v35 = vld [vmem:[#allocation2 + $0x171] sm:$0xff] }
  0x6f   : > { %v376_v37 = vld [vmem:[#allocation2 + $0x170] sm:$0xff]  ;;  %v5999_v46 = vpack.c.bf16 %v425_v35, %v424_v34 }
  0x70   : > { %v6001_v47 = vpack.c.bf16 %v376_v37, %v375_v36  ;;  %v726_v56 = vld [vmem:[#allocation2 + $0xa] sm:$0xff]  ;;  %v1393_v57 = vld [vmem:[#allocation2 + $0x32] sm:$0xff] }
  0x71   : > { %v757_v59 = vpack.c.bf16 %v726_v56, %v725_v55  ;;  %v6014_v0 = vpack.c.bf16 %v1394_v58, %v1393_v57  ;;  %v1395_v25 = vld [vmem:[#allocation2 + $0x4a] sm:$0xff] }
  0x75   : > { %4947 = vmatmul.msk.bf16.gmra.mxu2 %vm224_vm1, %v5877_v4 }
  0x76   : > { %4963 = vmatmul.msk.bf16.gmra.mxu3 %vm224_vm1, %v5879_v5 }
  0x77   : > { %4940 = vmatmul.msk.bf16.gmra.mxu0 %vm224_vm1, %v5881_v6 }
  0x78   : > { %4956 = vmatmul.msk.bf16.gmra.mxu1 %vm224_vm1, %v5883_v7 }
  0x85   : > { %4948 = vmatmul.msk.bf16.gmra.mxu2 %vm224_vm1, %v5901_v20 }
  0x86   : > { %4964 = vmatmul.msk.bf16.gmra.mxu3 %vm224_vm1, %v5903_v21 }
  0x87   : > { %4941 = vmatmul.msk.bf16.gmra.mxu0 %vm224_vm1, %v5905_v22 }
  0x88   : > { %4957 = vmatmul.msk.bf16.gmra.mxu1 %vm224_vm1, %v5907_v23 }
  0x95   : > { %4949 = vmatmul.msk.bf16.gmra.mxu2 %vm224_vm1, %v5925_v40 }
  0x96   : > { %4965 = vmatmul.msk.bf16.gmra.mxu3 %vm224_vm1, %v5927_v41 }
  0x97   : > { %4942 = vmatmul.msk.bf16.gmra.mxu0 %vm224_vm1, %v5929_v42 }
  0x98   : > { %4958 = vmatmul.msk.bf16.gmra.mxu1 %vm224_vm1, %v5931_v43 }
  0x9d   : > { %v505_v17 = vpop.f32.mrf.mxu0 }
  0x9e   : > { %v645_v18 = vpop.f32.mrf.mxu1 }
  0x9f   : > { %v5977_v19 = vadd.f32 %v645_v18, %v505_v17 }
  0xa5   : > { %4950 = vmatmul.msk.bf16.gmra.mxu2 %vm224_vm1, %v5949_v60  ;;  %v6010_v49 = vpop.f32.mrf.mxu0 }
  0xa6   : > { %4966 = vmatmul.msk.bf16.gmra.mxu3 %vm224_vm1, %v5951_v61  ;;  %v6012_v50 = vpop.f32.mrf.mxu1 }
  0xa7   : > { %4943 = vmatmul.msk.bf16.gmra.mxu0 %vm224_vm1, %v5953_v62 }
  0xa8   : > { %4959 = vmatmul.msk.bf16.gmra.mxu1 %vm224_vm1, %v5955_v63 }
  0xb5   : > { %4951 = vmatmul.msk.bf16.gmra.mxu2 %vm224_vm1, %v5965_v13 }
  0xb6   : > { %4967 = vmatmul.msk.bf16.gmra.mxu3 %vm224_vm1, %v5967_v14 }
  0xb7   : > { %4944 = vmatmul.msk.bf16.gmra.mxu0 %vm224_vm1, %v5969_v15 }
  0xb8   : > { %4960 = vmatmul.msk.bf16.gmra.mxu1 %vm224_vm1, %v5971_v16 }
  0xc5   : > { %4952 = vmatmul.msk.bf16.gmra.mxu2 %vm224_vm1, %v5999_v46 }
  0xc6   : > { %4968 = vmatmul.msk.bf16.gmra.mxu3 %vm224_vm1, %v6001_v47 }
  0xc7   : > { %5004 = vmatmul.msk.bf16.vlgmr.msrb.gmra.mxu0 %vm224_vm1, %v5838_v38 }
  0xc8   : > { %5021 = vmatmul.msk.bf16.vlgmr.msrb.gmra.mxu1 %vm224_vm1, %v1423_v48 }
  0xd4   : > { %v510_v1 = vpop.f32.mrf.mxu0 }
  0xd5   : > { %v650_v3 = vpop.f32.mrf.mxu1  ;;  %4970 = vmatmul.msk.bf16.vlgmr.msrb.gmra.mxu2 %vm224_vm1, %v757_v59 }
  0xd6   : > { %4987 = vmatmul.msk.bf16.vlgmr.msrb.gmra.mxu3 %vm224_vm1, %v5840_v39  ;;  %v6019_v38 = vadd.f32 %v650_v3, %v510_v1  ;;  %v1396_v39 = vld [vmem:[#allocation2 + $0x52] sm:$0xff] }
  0xd7   : > { %5005 = vmatmul.msk.bf16.gmra.mxu0 %vm224_vm1, %v5857_v53  ;;  %v6031_v27 = vpack.c.bf16 %v1396_v39, %v1395_v25 }
  0xd8   : > { %5022 = vmatmul.msk.bf16.gmra.mxu1 %vm224_vm1, %v6014_v0  ;;  %v545_v8 = vpop.f32.mrf.mxu2 }
  0xd9   : > { %v685_v9 = vpop.f32.mrf.mxu3 }
  0xda   : > { %v6025_v10 = vadd.f32 %v685_v9, %v545_v8 }
  0xdc   : > { %v512_v11 = vpop.f32.mrf.mxu0 }
  0xdd   : > { %v652_v12 = vpop.f32.mrf.mxu1 }
  0xde   : > { %v6027_v17 = vadd.f32 %v652_v12, %v512_v11 }
  0xe0   : > { %v547_v18 = vpop.f32.mrf.mxu2 }
  0xe1   : > { %v687_v24 = vpop.f32.mrf.mxu3 }
  0xe2   : > { %v6029_v26 = vadd.f32 %v687_v24, %v547_v18  ;;  %v1399_v24 = vld [vmem:[#allocation2 + $0x7a] sm:$0xff] }
  0xe4   : > { %v515_v53 = vpop.f32.mrf.mxu0 }
  0xe5   : > { %v655_v28 = vpop.f32.mrf.mxu1  ;;  %4971 = vmatmul.msk.bf16.gmra.mxu2 %vm224_vm1, %v1423_v48  ;;  %v1397_v48 = vld [vmem:[#allocation2 + $0x62] sm:$0xff] }
  0xe6   : > { %4988 = vmatmul.msk.bf16.gmra.mxu3 %vm224_vm1, %v5859_v54  ;;  %v6036_v29 = vadd.f32 %v655_v28, %v515_v53  ;;  %v1398_v54 = vld [vmem:[#allocation2 + $0x6a] sm:$0xff] }
  0xe7   : > { %5006 = vmatmul.msk.bf16.gmra.mxu0 %vm224_vm1, %v5881_v6  ;;  %v6048_v56 = vpack.c.bf16 %v1398_v54, %v1397_v48 }
  0xe8   : > { %5023 = vmatmul.msk.bf16.gmra.mxu1 %vm224_vm1, %v6031_v27  ;;  %v550_v30 = vpop.f32.mrf.mxu2 }
  0xe9   : > { %v690_v33 = vpop.f32.mrf.mxu3 }
  0xea   : > { %v6042_v34 = vadd.f32 %v690_v33, %v550_v30 }
  0xec   : > { %v517_v35 = vpop.f32.mrf.mxu0 }
  0xed   : > { %v657_v36 = vpop.f32.mrf.mxu1 }
  0xee   : > { %v6044_v37 = vadd.f32 %v657_v36, %v517_v35 }
  0xf0   : > { %v552_v44 = vpop.f32.mrf.mxu2 }
  0xf1   : > { %v692_v45 = vpop.f32.mrf.mxu3 }
  0xf2   : > { %v6046_v55 = vadd.f32 %v692_v45, %v552_v44 }
  0xf4   : > { %v520_v6 = vpop.f32.mrf.mxu0 }
  0xf5   : > { %v660_v57 = vpop.f32.mrf.mxu1  ;;  %4972 = vmatmul.msk.bf16.gmra.mxu2 %vm224_vm1, %v6014_v0 }
  0xf6   : > { %4989 = vmatmul.msk.bf16.gmra.mxu3 %vm224_vm1, %v5883_v7  ;;  %v6054_v58 = vadd.f32 %v660_v57, %v520_v6  ;;  %v1400_v7 = vld [vmem:[#allocation2 + $0x82] sm:$0xff]  ;;  %v1401_v6 = vld [vmem:[#allocation2 + $0x92] sm:$0xff] }
  0xf7   : > { %5007 = vmatmul.msk.bf16.gmra.mxu0 %vm224_vm1, %v5905_v22  ;;  %v6066_v39 = vpack.c.bf16 %v1400_v7, %v1399_v24 }
  0xf8   : > { %5024 = vmatmul.msk.bf16.gmra.mxu1 %vm224_vm1, %v6048_v56  ;;  %v555_v59 = vpop.f32.mrf.mxu2 }
  0xf9   : > { %v695_v1 = vpop.f32.mrf.mxu3 }
  0xfa   : > { %v6060_v3 = vadd.f32 %v695_v1, %v555_v59 }
  0xfc   : > { %v522_v8 = vpop.f32.mrf.mxu0 }
  0xfd   : > { %v662_v9 = vpop.f32.mrf.mxu1 }
  0xfe   : > { %v6062_v11 = vadd.f32 %v662_v9, %v522_v8 }
 0x100   : > { %v557_v12 = vpop.f32.mrf.mxu2 }
 0x101   : > { %v697_v18 = vpop.f32.mrf.mxu3 }
 0x102   : > { %v6064_v25 = vadd.f32 %v697_v18, %v557_v12 }
 0x104   : > { %v525_v22 = vpop.f32.mrf.mxu0 }
 0x105   : > { %v665_v53 = vpop.f32.mrf.mxu1  ;;  %4973 = vmatmul.msk.bf16.gmra.mxu2 %vm224_vm1, %v6031_v27 }
 0x106   : > { %4990 = vmatmul.msk.bf16.gmra.mxu3 %vm224_vm1, %v5907_v23  ;;  %v6072_v28 = vadd.f32 %v665_v53, %v525_v22  ;;  %v1402_v23 = vld [vmem:[#allocation2 + $0x9a] sm:$0xff] }
 0x107   : > { %5008 = vmatmul.msk.bf16.gmra.mxu0 %vm224_vm1, %v5929_v42  ;;  %v6084_v59 = vpack.c.bf16 %v1402_v23, %v1401_v6 }
 0x108   : > { %5025 = vmatmul.msk.bf16.gmra.mxu1 %vm224_vm1, %v6066_v39  ;;  %v560_v30 = vpop.f32.mrf.mxu2 }
 0x109   : > { %v700_v33 = vpop.f32.mrf.mxu3  ;;  %7743 = vst [vmem:[#allocation9_spill] sm:$0xff] %v6084_v59 }
 0x10a   : > { %v6078_v35 = vadd.f32 %v700_v33, %v560_v30  ;;  %v1403_v33 = vld [vmem:[#allocation2 + $0xaa] sm:$0xff] }
 0x10c   : > { %7741 = vst [vmem:[#allocation7_spill] sm:$0xff] %v6078_v35  ;;  %v527_v36 = vpop.f32.mrf.mxu0 }
 0x10d   : > { %v667_v44 = vpop.f32.mrf.mxu1 }
 0x10e   : > { %v6080_v45 = vadd.f32 %v667_v44, %v527_v36 }
 0x110   : > { %v562_v48 = vpop.f32.mrf.mxu2 }
 0x111   : > { %v702_v54 = vpop.f32.mrf.mxu3 }
 0x112   : > { %v6082_v57 = vadd.f32 %v702_v54, %v562_v48 }
 0x114   : > { %7742 = vst [vmem:[#allocation8_spill] sm:$0xff] %v6082_v57  ;;  %v530_v42 = vpop.f32.mrf.mxu0 }
 0x115   : > { %v670_v1 = vpop.f32.mrf.mxu1  ;;  %4974 = vmatmul.msk.bf16.gmra.mxu2 %vm224_vm1, %v6048_v56 }
 0x116   : > { %4991 = vmatmul.msk.bf16.gmra.mxu3 %vm224_vm1, %v5931_v43  ;;  %v6090_v8 = vadd.f32 %v670_v1, %v530_v42  ;;  %v1404_v43 = vld [vmem:[#allocation2 + $0xb2] sm:$0xff] }
 0x117   : > { %5009 = vmatmul.msk.bf16.gmra.mxu0 %vm224_vm1, %v5953_v62  ;;  %v6102_v44 = vpack.c.bf16 %v1404_v43, %v1403_v33 }
 0x118   : > { %5026 = vmatmul.msk.bf16.gmra.mxu1 %vm224_vm1, %v6084_v59  ;;  %v565_v9 = vpop.f32.mrf.mxu2 }
 0x119   : > { %v705_v12 = vpop.f32.mrf.mxu3  ;;  %7746 = vst [vmem:[#allocation12_spill] sm:$0xff] %v6102_v44 }
 0x11a   : > { %v6096_v18 = vadd.f32 %v705_v12, %v565_v9 }
 0x11c   : > { %7744 = vst [vmem:[#allocation10_spill] sm:$0xff] %v6096_v18  ;;  %v532_v24 = vpop.f32.mrf.mxu0 }
 0x11d   : > { %v672_v7 = vpop.f32.mrf.mxu1 }
 0x11e   : > { %v6098_v22 = vadd.f32 %v672_v7, %v532_v24 }
 0x120   : > { %v567_v53 = vpop.f32.mrf.mxu2 }
 0x121   : > { %v707_v30 = vpop.f32.mrf.mxu3 }
 0x122   : > { %v6100_v36 = vadd.f32 %v707_v30, %v567_v53  ;;  %v1405_v53 = vld [vmem:[#allocation2 + $0xc2] sm:$0xff] }
 0x124   : > { %7745 = vst [vmem:[#allocation11_spill] sm:$0xff] %v6100_v36  ;;  %v535_v62 = vpop.f32.mrf.mxu0  ;;  %v1411_v36 = vld [vmem:[#allocation2 + $0x10a] sm:$0xff] }
 0x125   : > { %v675_v48 = vpop.f32.mrf.mxu1  ;;  %4975 = vmatmul.msk.bf16.gmra.mxu2 %vm224_vm1, %v6066_v39 }
 0x126   : > { %4992 = vmatmul.msk.bf16.gmra.mxu3 %vm224_vm1, %v5955_v63  ;;  %v6108_v54 = vadd.f32 %v675_v48, %v535_v62  ;;  %v1406_v63 = vld [vmem:[#allocation2 + $0xca] sm:$0xff] }
 0x127   : > { %5010 = vmatmul.msk.bf16.gmra.mxu0 %vm224_vm1, %v5969_v15  ;;  %v6120_v33 = vpack.c.bf16 %v1406_v63, %v1405_v53  ;;  %v1407_v63 = vld [vmem:[#allocation2 + $0xda] sm:$0xff] }
 0x128   : > { %5027 = vmatmul.msk.bf16.gmra.mxu1 %vm224_vm1, %v6102_v44  ;;  %v570_v6 = vpop.f32.mrf.mxu2 }
 0x129   : > { %v710_v23 = vpop.f32.mrf.mxu3  ;;  %7749 = vst [vmem:[#allocation15_spill] sm:$0xff] %v6120_v33 }
 0x12a   : > { %v6114_v42 = vadd.f32 %v710_v23, %v570_v6 }
 0x12c   : > { %7747 = vst [vmem:[#allocation13_spill] sm:$0xff] %v6114_v42  ;;  %v537_v1 = vpop.f32.mrf.mxu0 }
 0x12d   : > { %v677_v9 = vpop.f32.mrf.mxu1 }
 0x12e   : > { %v6116_v12 = vadd.f32 %v677_v9, %v537_v1 }
 0x130   : > { %v572_v24 = vpop.f32.mrf.mxu2 }
 0x131   : > { %v712_v7 = vpop.f32.mrf.mxu3 }
 0x132   : > { %v6118_v30 = vadd.f32 %v712_v7, %v572_v24 }
 0x134   : > { %7748 = vst [vmem:[#allocation14_spill] sm:$0xff] %v6118_v30  ;;  %v540_v15 = vpop.f32.mrf.mxu0 }
 0x135   : > { %v680_v43 = vpop.f32.mrf.mxu1  ;;  %4976 = vmatmul.msk.bf16.gmra.mxu2 %vm224_vm1, %v6084_v59 }
 0x136   : > { %4993 = vmatmul.msk.bf16.gmra.mxu3 %vm224_vm1, %v5971_v16  ;;  %v6126_v62 = vadd.f32 %v680_v43, %v540_v15  ;;  %v1408_v16 = vld [vmem:[#allocation2 + $0xe2] sm:$0xff] }
 0x137   : > { %5011 = vmatmul.msk.bf16.gmra.mxu0 %vm224_vm1, %v5828_v31  ;;  %v6138_v43 = vpack.c.bf16 %v1408_v16, %v1407_v63 }
 0x138   : > { %5028 = vmatmul.msk.bf16.gmra.mxu1 %vm224_vm1, %v6120_v33  ;;  %v575_v48 = vpop.f32.mrf.mxu2 }
 0x139   : > { %v715_v6 = vpop.f32.mrf.mxu3 }
 0x13a   : > { %v6132_v23 = vadd.f32 %v715_v6, %v575_v48 }
 0x13c   : > { %7750 = vst [vmem:[#allocation16_spill] sm:$0xff] %v6132_v23  ;;  %v542_v1 = vpop.f32.mrf.mxu0 }
 0x13d   : > { %v682_v9 = vpop.f32.mrf.mxu1 }
 0x13e   : > { %v6134_v24 = vadd.f32 %v682_v9, %v542_v1  ;;  %v5453_v9 = vld [vmem:[%s7727_s3 + $0x38] sm:$0xff] }
 0x13f   : > { %2690 = vmatpush.bf16.msra.mxu1 %v5453_v9 }
 0x140   : > { %v577_v7 = vpop.f32.mrf.mxu2 }
 0x141   : > { %v717_v53 = vpop.f32.mrf.mxu3 }
 0x142   : > { %v6136_v15 = vadd.f32 %v717_v53, %v577_v7 }
 0x144   : > { %7751 = vst [vmem:[#allocation17_spill] sm:$0xff] %v6136_v15  ;;  %v1279_v31 = vpop.f32.mrf.mxu0  ;;  %v1410_v15 = vld [vmem:[#allocation2 + $0xfa] sm:$0xff] }
 0x145   : > { %v1501_v2 = vpop.f32.mrf.mxu1  ;;  %4977 = vmatmul.msk.bf16.gmra.mxu2 %vm224_vm1, %v6102_v44 }
 0x146   : > { %4994 = vmatmul.msk.bf16.gmra.mxu3 %vm224_vm1, %v5830_v32  ;;  %v1409_v32 = vld [vmem:[#allocation2 + $0xf2] sm:$0xff] }
 0x147   : > { %5012 = vmatmul.msk.bf16.gmra.mxu0 %vm224_vm1, %v5853_v51  ;;  %v6155_v51 = vpack.c.bf16 %v1410_v15, %v1409_v32 }
 0x148   : > { %5029 = vmatmul.msk.bf16.gmra.mxu1 %vm224_vm1, %v6138_v43  ;;  %v580_v48 = vpop.f32.mrf.mxu2 }
 0x149   : > { %v720_v6 = vpop.f32.mrf.mxu3 }
 0x14a   : > { %v6148_v1 = vadd.f32 %v720_v6, %v580_v48 }
 0x14c   : > { %7752 = vst [vmem:[#allocation18_spill] sm:$0xff] %v6148_v1  ;;  %v1281_v7 = vpop.f32.mrf.mxu0 }
 0x14d   : > { %v1503_v53 = vpop.f32.mrf.mxu1 }
 0x150   : > { %v582_v63 = vpop.f32.mrf.mxu2 }
 0x151   : > { %v722_v16 = vpop.f32.mrf.mxu3 }
 0x152   : > { %v6153_v23 = vadd.f32 %v722_v16, %v582_v63 }
 0x154   : > { %7753 = vst [vmem:[#allocation19_spill] sm:$0xff] %v6153_v23  ;;  %v1284_v30 = vpop.f32.mrf.mxu0  ;;  %v648_v23 = vadd.f32 %v6012_v50, %v6010_v49 }
 0x155   : > { %v1506_v42 = vpop.f32.mrf.mxu1  ;;  %4978 = vmatmul.msk.bf16.gmra.mxu2 %vm224_vm1, %v6120_v33 }
 0x156   : > { %4995 = vmatmul.msk.bf16.gmra.mxu3 %vm224_vm1, %v5855_v52 }
 0x157   : > { %5013 = vmatmul.msk.bf16.gmra.mxu0 %vm224_vm1, %v5877_v4  ;;  %v1412_v4 = vld [vmem:[#allocation2 + $0x112] sm:$0xff] }
 0x158   : > { %5030 = vmatmul.msk.bf16.gmra.mxu1 %vm224_vm1, %v6155_v51  ;;  %v835_v48 = vpop.f32.mrf.mxu2  ;;  %v6170_v57 = vpack.c.bf16 %v1412_v4, %v1411_v36 }
 0x159   : > { %v1057_v6 = vpop.f32.mrf.mxu3  ;;  %v915_v9 = vadd.f32 %v835_v48, %v5977_v19 }
 0x15b   : > { %v1137_v15 = vadd.f32 %v1057_v6, %v915_v9 }
 0x15c   : > { %v1286_v63 = vpop.f32.mrf.mxu0 }
 0x15d   : > { %v1508_v16 = vpop.f32.mrf.mxu1  ;;  %v1359_v32 = vadd.f32 %v1279_v31, %v1137_v15 }
 0x15f   : > { %v6168_v1 = vadd.f32 %v1501_v2, %v1359_v32 }
 0x160   : > { %v837_v52 = vpop.f32.mrf.mxu2 }
 0x161   : > { %v1059_v33 = vpop.f32.mrf.mxu3  ;;  %v916_v18 = vadd.f32 %v837_v52, %v648_v23 }
 0x163   : > { %v1138_v44 = vadd.f32 %v1059_v33, %v916_v18 }
 0x164   : > { %v1289_v35 = vpop.f32.mrf.mxu0 }
 0x165   : > { %v1511_v59 = vpop.f32.mrf.mxu1  ;;  %4979 = vmatmul.msk.bf16.gmra.mxu2 %vm224_vm1, %v6138_v43  ;;  %v1360_v19 = vadd.f32 %v1281_v7, %v1138_v44  ;;  %v1413_v7 = vld [vmem:[#allocation2 + $0x122] sm:$0xff] }
 0x166   : > { %4996 = vmatmul.msk.bf16.gmra.mxu3 %vm224_vm1, %v5879_v5 }
 0x167   : > { %v6176_v49 = vadd.f32 %v1503_v53, %v1360_v19  ;;  %5014 = vmatmul.msk.bf16.gmra.mxu0 %vm224_vm1, %v5901_v20  ;;  %v1414_v53 = vld [vmem:[#allocation2 + $0x12a] sm:$0xff] }
 0x168   : > { %5031 = vmatmul.msk.bf16.gmra.mxu1 %vm224_vm1, %v6170_v57  ;;  %v840_v2 = vpop.f32.mrf.mxu2  ;;  %v6186_v9 = vpack.c.bf16 %v1414_v53, %v1413_v7 }
 0x169   : > { %v1062_v50 = vpop.f32.mrf.mxu3  ;;  %v917_v18 = vadd.f32 %v840_v2, %v6019_v38 }
 0x16b   : > { %v1139_v36 = vadd.f32 %v1062_v50, %v917_v18 }
 0x16c   : > { %v1291_v33 = vpop.f32.mrf.mxu0 }
 0x16d   : > { %v1513_v23 = vpop.f32.mrf.mxu1  ;;  %v1361_v31 = vadd.f32 %v1284_v30, %v1139_v36  ;;  %v1416_v36 = vld [vmem:[#allocation2 + $0x142] sm:$0xff] }
 0x16f   : > { %v6183_v48 = vadd.f32 %v1506_v42, %v1361_v31 }
 0x170   : > { %v842_v5 = vpop.f32.mrf.mxu2 }
 0x171   : > { %v1064_v44 = vpop.f32.mrf.mxu3  ;;  %v918_v6 = vadd.f32 %v842_v5, %v6027_v17 }
 0x173   : > { %v1140_v20 = vadd.f32 %v1064_v44, %v918_v6 }
 0x174   : > { %v1294_v15 = vpop.f32.mrf.mxu0 }
 0x175   : > { %v1516_v32 = vpop.f32.mrf.mxu1  ;;  %4980 = vmatmul.msk.bf16.gmra.mxu2 %vm224_vm1, %v6155_v51  ;;  %v1362_v38 = vadd.f32 %v1286_v63, %v1140_v20  ;;  %v5452_v20 = vld [vmem:[%s7727_s3 + $0x30] sm:$0xff] }
 0x176   : > { %4997 = vmatmul.msk.bf16.gmra.mxu3 %vm224_vm1, %v5903_v21  ;;  %2691 = vmatpush.bf16.msra.mxu1 %v5452_v20  ;;  %v1420_v20 = vld [vmem:[#allocation2 + $0x172] sm:$0xff] }
 0x177   : > { %v6192_v42 = vadd.f32 %v1508_v16, %v1362_v38  ;;  %5015 = vmatmul.msk.bf16.gmra.mxu0 %vm224_vm1, %v5925_v40  ;;  %v1415_v16 = vld [vmem:[#allocation2 + $0x13a] sm:$0xff] }
 0x178   : > { %5032 = vmatmul.msk.bf16.gmra.mxu1 %vm224_vm1, %v6186_v9  ;;  %v845_v17 = vpop.f32.mrf.mxu2  ;;  %v1435_v5 = vpack.c.bf16 %v1416_v36, %v1415_v16  ;;  %v310_v16 = vld [vmem:[%s5797_s25 + $0xf0] sm:$0xff]  ;;  %v311_v36 = vld [vmem:[%s5797_s25 + $0xf8] sm:$0xff] }
 0x179   : > { %v1067_v30 = vpop.f32.mrf.mxu3  ;;  %v919_v52 = vadd.f32 %v845_v17, %v6036_v29  ;;  %343 = vst.msk [vmem:[#allocation2 + $0x181] sm:$0xff] %vm224_vm1, %v310_v16 }
 0x17a   : > { %344 = vst.msk [vmem:[#allocation2 + $0x189] sm:$0xff] %vm224_vm1, %v311_v36 }
 0x17b   : > { %v1141_v4 = vadd.f32 %v1067_v30, %v919_v52  ;;  %v1417_v30 = vld [vmem:[#allocation2 + $0x152] sm:$0xff]  ;;  %v1418_v52 = vld [vmem:[#allocation2 + $0x15a] sm:$0xff] }
 0x17c   : > { %v1296_v19 = vpop.f32.mrf.mxu0 }
 0x17d   : > { %v1518_v2 = vpop.f32.mrf.mxu1  ;;  %v1363_v50 = vadd.f32 %v1289_v35, %v1141_v4 }
 0x17f   : > { %v6199_v18 = vadd.f32 %v1511_v59, %v1363_v50  ;;  %v1436_v50 = vpack.c.bf16 %v1418_v52, %v1417_v30 }
 0x180   : > { %v847_v21 = vpop.f32.mrf.mxu2  ;;  %v1199_v36 = vld [vmem:[#allocation2 + $0x181] sm:$0xff] }
 0x181   : > { %v1069_v63 = vpop.f32.mrf.mxu3  ;;  %v920_v31 = vadd.f32 %v847_v21, %v6044_v37 }
 0x183   : > { %v1142_v40 = vadd.f32 %v1069_v63, %v920_v31 }
 0x184   : > { %v1299_v44 = vpop.f32.mrf.mxu0 }
 0x185   : > { %v1521_v7 = vpop.f32.mrf.mxu1  ;;  %4981 = vmatmul.msk.bf16.gmra.mxu2 %vm224_vm1, %v6170_v57  ;;  %v1364_v29 = vadd.f32 %v1291_v33, %v1142_v40 }
 0x186   : > { %4998 = vmatmul.msk.bf16.gmra.mxu3 %vm224_vm1, %v5927_v41 }
 0x187   : > { %v6206_v35 = vadd.f32 %v1513_v23, %v1364_v29  ;;  %5016 = vmatmul.msk.bf16.gmra.mxu0 %vm224_vm1, %v5949_v60 }
 0x188   : > { %5033 = vmatmul.msk.bf16.gmra.mxu1 %vm224_vm1, %v1435_v5  ;;  %v850_v59 = vpop.f32.mrf.mxu2 }
 0x189   : > { %v1072_v37 = vpop.f32.mrf.mxu3  ;;  %v921_v53 = vadd.f32 %v850_v59, %v6054_v58 }
 0x18b   : > { %v1143_v6 = vadd.f32 %v1072_v37, %v921_v53 }
 0x18c   : > { %v1301_v41 = vpop.f32.mrf.mxu0 }
 0x18d   : > { %v6215_v33 = vpop.f32.mrf.mxu1  ;;  %v1365_v23 = vadd.f32 %v1294_v15, %v1143_v6 }
 0x18f   : > { %v6217_v38 = vadd.f32 %v1516_v32, %v1365_v23 }
 0x190   : > { %v852_v60 = vpop.f32.mrf.mxu2 }
 0x191   : > { %v1074_v17 = vpop.f32.mrf.mxu3  ;;  %v922_v58 = vadd.f32 %v852_v60, %v6062_v11 }
 0x193   : > { %v1144_v4 = vadd.f32 %v1074_v17, %v922_v58 }
 0x194   : > { %v1304_v21 = vpop.f32.mrf.mxu0 }
 0x195   : > { %v1526_v63 = vpop.f32.mrf.mxu1  ;;  %4982 = vmatmul.msk.bf16.gmra.mxu2 %vm224_vm1, %v6186_v9  ;;  %v1366_v15 = vadd.f32 %v1296_v19, %v1144_v4 }
 0x196   : > { %4999 = vmatmul.msk.bf16.gmra.mxu3 %vm224_vm1, %v5951_v61 }
 0x197   : > { %v6228_v32 = vadd.f32 %v1518_v2, %v1366_v15  ;;  %5017 = vmatmul.msk.bf16.gmra.mxu0 %vm224_vm1, %v5965_v13  ;;  %v1419_v2 = vld [vmem:[#allocation2 + $0x16a] sm:$0xff] }
 0x198   : > { %5034 = vmatmul.msk.bf16.gmra.mxu1 %vm224_vm1, %v1436_v50  ;;  %v855_v11 = vpop.f32.mrf.mxu2  ;;  %v1437_v60 = vpack.c.bf16 %v1420_v20, %v1419_v2  ;;  %v1200_v15 = vld [vmem:[#allocation2 + $0x189] sm:$0xff] }
 0x199   : > { %v1077_v31 = vpop.f32.mrf.mxu3  ;;  %v923_v40 = vadd.f32 %v855_v11, %v6072_v28  ;;  %v1421_v11 = vld [vmem:[#allocation2 + $0x182] sm:$0xff] }
 0x19b   : > { %v1145_v29 = vadd.f32 %v1077_v31, %v923_v40  ;;  %v1422_v31 = vld [vmem:[#allocation2 + $0x18a] sm:$0xff] }
 0x19c   : > { %v1306_v59 = vpop.f32.mrf.mxu0 }
 0x19d   : > { %v6234_v37 = vpop.f32.mrf.mxu1  ;;  %v1367_v61 = vadd.f32 %v1299_v44, %v1145_v29  ;;  %v1216_v29 = vpack.c.bf16 %v1200_v15, %v1199_v36 }
 0x19f   : > { %v6236_v19 = vadd.f32 %v1521_v7, %v1367_v61  ;;  %v1438_v61 = vpack.c.bf16 %v1422_v31, %v1421_v11 }
 0x1a0   : > { %v857_v53 = vpop.f32.mrf.mxu2 }
 0x1a1   : > { %v1079_v6 = vpop.f32.mrf.mxu3  ;;  %v924_v23 = vadd.f32 %v857_v53, %v6080_v45 }
 0x1a3   : > { %v1146_v13 = vadd.f32 %v1079_v6, %v924_v23 }
 0x1a4   : > { %v1309_v17 = vpop.f32.mrf.mxu0 }
 0x1a5   : > { %v1531_v30 = vpop.f32.mrf.mxu1  ;;  %4983 = vmatmul.msk.bf16.gmra.mxu2 %vm224_vm1, %v1435_v5  ;;  %v6242_v28 = vadd.f32 %v1301_v41, %v1146_v13 }
 0x1a6   : > { %5000 = vmatmul.msk.bf16.gmra.mxu3 %vm224_vm1, %v5967_v14 }
 0x1a7   : > { %5018 = vmatmul.msk.bf16.gmra.mxu0 %vm224_vm1, %v5999_v46 }
 0x1a8   : > { %5035 = vmatmul.msk.bf16.gmra.mxu1 %vm224_vm1, %v1437_v60  ;;  %v860_v44 = vpop.f32.mrf.mxu2 }
 0x1a9   : > { %v1082_v7 = vpop.f32.mrf.mxu3  ;;  %v925_v45 = vadd.f32 %v860_v44, %v6090_v8  ;;  %v977_v44 = vld [vmem:[#allocation2 + $0x180] sm:$0xff] }
 0x1ab   : > { %v1147_v52 = vadd.f32 %v1082_v7, %v925_v45 }
 0x1ac   : > { %v1311_v58 = vpop.f32.mrf.mxu0 }
 0x1ad   : > { %v6248_v4 = vpop.f32.mrf.mxu1  ;;  %v1369_v16 = vadd.f32 %v1304_v21, %v1147_v52 }
 0x1af   : > { %v6250_v5 = vadd.f32 %v1526_v63, %v1369_v16 }
 0x1b0   : > { %v862_v14 = vpop.f32.mrf.mxu2 }
 0x1b1   : > { %v1084_v41 = vpop.f32.mrf.mxu3  ;;  %v926_v46 = vadd.f32 %v862_v14, %v6098_v22 }
 0x1b3   : > { %v1148_v40 = vadd.f32 %v1084_v41, %v926_v46  ;;  %v1614_v46 = vld [vmem:[#allocation2 + $0x30] sm:$0xff] }
 0x1b4   : > { %v1314_v53 = vpop.f32.mrf.mxu0 }
 0x1b5   : > { %v1536_v8 = vpop.f32.mrf.mxu1  ;;  %4984 = vmatmul.msk.bf16.gmra.mxu2 %vm224_vm1, %v1436_v50  ;;  %v6256_v21 = vadd.f32 %v1306_v59, %v1148_v40  ;;  %v978_v50 = vld [vmem:[#allocation2 + $0x188] sm:$0xff]  ;;  %v1836_v40 = vld [vmem:[#allocation2 + $0x31] sm:$0xff] }
 0x1b6   : > { %5001 = vmatmul.msk.bf16.gmra.mxu3 %vm224_vm1, %v6001_v47  ;;  %v994_v52 = vpack.c.bf16 %v978_v50, %v977_v44 }
 0x1b7   : > { %5019 = vmatmul.msk.bf16.gmra.mxu0 %vm224_vm1, %v1216_v29  ;;  %v1837_v29 = vld [vmem:[#allocation2 + $0x39] sm:$0xff] }
 0x1b8   : > { %5036 = vmatmul.msk.bf16.gmra.mxu1 %vm224_vm1, %v1438_v61  ;;  %v865_v63 = vpop.f32.mrf.mxu2 }
 0x1b9   : > { %v1087_v6 = vpop.f32.mrf.mxu3  ;;  %v927_v22 = vadd.f32 %v865_v63, %v6108_v54 }
 0x1bb   : > { %v1149_v2 = vadd.f32 %v1087_v6, %v927_v22  ;;  %v1868_v22 = vpack.c.bf16 %v1837_v29, %v1836_v40 }
 0x1bc   : > { %v1316_v20 = vpop.f32.mrf.mxu0 }
 0x1bd   : > { %v6261_v23 = vpop.f32.mrf.mxu1  ;;  %v1371_v13 = vadd.f32 %v1309_v17, %v1149_v2 }
 0x1bf   : > { %v6263_v7 = vadd.f32 %v1531_v30, %v1371_v13 }
 0x1c0   : > { %v867_v47 = vpop.f32.mrf.mxu2 }
 0x1c1   : > { %v1089_v59 = vpop.f32.mrf.mxu3  ;;  %v928_v45 = vadd.f32 %v867_v47, %v6116_v12  ;;  %v5451_v12 = vld [vmem:[%s7727_s3 + $0x28] sm:$0xff] }
 0x1c2   : > { %2692 = vmatpush.bf16.msra.mxu1 %v5451_v12 }
 0x1c3   : > { %v1150_v16 = vadd.f32 %v1089_v59, %v928_v45 }
 0x1c4   : > { %v1319_v36 = vpop.f32.mrf.mxu0 }
 0x1c5   : > { %v1541_v14 = vpop.f32.mrf.mxu1  ;;  %4985 = vmatmul.msk.bf16.gmra.mxu2 %vm224_vm1, %v1437_v60  ;;  %v6268_v54 = vadd.f32 %v1311_v58, %v1150_v16  ;;  %v1615_v58 = vld [vmem:[#allocation2 + $0x38] sm:$0xff] }
 0x1c6   : > { %5002 = vmatmul.msk.bf16.gmra.mxu3 %vm224_vm1, %v994_v52  ;;  %v1646_v6 = vpack.c.bf16 %v1615_v58, %v1614_v46  ;;  %v1616_v52 = vld [vmem:[#allocation2 + $0x48] sm:$0xff] }
 0x1c7   : > { %5072 = vmatmul.msk.bf16.vlgmr.msra.gmra.mxu0 %vm224_vm1, %v6014_v0 }
 0x1c8   : > { %v870_v17 = vpop.f32.mrf.mxu2 }
 0x1c9   : > { %v1092_v30 = vpop.f32.mrf.mxu3  ;;  %v929_v41 = vadd.f32 %v870_v17, %v6126_v62  ;;  %v1617_v17 = vld [vmem:[#allocation2 + $0x50] sm:$0xff] }
 0x1cb   : > { %v1151_v15 = vadd.f32 %v1092_v30, %v929_v41  ;;  %v1838_v30 = vld [vmem:[#allocation2 + $0x49] sm:$0xff]  ;;  %v1839_v41 = vld [vmem:[#allocation2 + $0x51] sm:$0xff] }
 0x1cc   : > { %v1321_v11 = vpop.f32.mrf.mxu0  ;;  %v1869_v46 = vpack.c.bf16 %v1839_v41, %v1838_v30 }
 0x1cd   : > { %v6276_v31 = vpop.f32.mrf.mxu1  ;;  %v1373_v60 = vadd.f32 %v1314_v53, %v1151_v15 }
 0x1cf   : > { %v6278_v61 = vadd.f32 %v1536_v8, %v1373_v60 }
 0x1d0   : > { %v872_v0 = vpop.f32.mrf.mxu2 }
 0x1d1   : > { %v1094_v63 = vpop.f32.mrf.mxu3  ;;  %v930_v62 = vadd.f32 %v872_v0, %v6134_v24 }
 0x1d3   : > { %v1152_v2 = vadd.f32 %v1094_v63, %v930_v62 }
 0x1d4   : > { %v1324_v13 = vpop.f32.mrf.mxu0 }
 0x1d5   : > { %v1546_v44 = vpop.f32.mrf.mxu1  ;;  %5038 = vmatmul.msk.bf16.vlgmr.msra.gmra.mxu2 %vm224_vm1, %v1646_v6  ;;  %v6283_v53 = vadd.f32 %v1316_v20, %v1152_v2  ;;  %v1618_v6 = vld [vmem:[#allocation2 + $0x60] sm:$0xff] }
 0x1d6   : > { %5055 = vmatmul.msk.bf16.vlgmr.msra.gmra.mxu3 %vm224_vm1, %v1868_v22  ;;  %v1619_v22 = vld [vmem:[#allocation2 + $0x68] sm:$0xff] }
 0x1d7   : > { %5073 = vmatmul.msk.bf16.gmra.mxu0 %vm224_vm1, %v6031_v27  ;;  %v1647_v27 = vpack.c.bf16 %v1617_v17, %v1616_v52  ;;  %v1840_v2 = vld [vmem:[#allocation2 + $0x61] sm:$0xff] }
 0x1d8   : > { %v875_v8 = vpop.f32.mrf.mxu2 }
 0x1d9   : > { %v1097_v50 = vpop.f32.mrf.mxu3  ;;  %v931_v47 = vadd.f32 %v875_v8, %v6025_v10  ;;  %v1841_v8 = vld [vmem:[#allocation2 + $0x69] sm:$0xff] }
 0x1db   : > { %v1153_v59 = vadd.f32 %v1097_v50, %v931_v47 }
 0x1dc   : > { %v1326_v24 = vpop.f32.mrf.mxu0 }
 0x1dd   : > { %v1375_v45 = vadd.f32 %v1319_v36, %v1153_v59  ;;  %v6288_v16 = vpop.f32.mrf.mxu1 }
 0x1df   : > { %v6290_v15 = vadd.f32 %v1541_v14, %v1375_v45  ;;  %v1648_v45 = vpack.c.bf16 %v1619_v22, %v1618_v6 }
 0x1e0   : > { %v877_v20 = vpop.f32.mrf.mxu2 }
 0x1e1   : > { %v1099_v12 = vpop.f32.mrf.mxu3  ;;  %v932_v60 = vadd.f32 %v877_v20, %v6029_v26 }
 0x1e3   : > { %v1154_v58 = vadd.f32 %v1099_v12, %v932_v60 }
 0x1e4   : > { %v1329_v40 = vpop.f32.mrf.mxu0 }
 0x1e5   : > { %5039 = vmatmul.msk.bf16.gmra.mxu2 %vm224_vm1, %v1647_v27  ;;  %v6295_v10 = vadd.f32 %v1321_v11, %v1154_v58  ;;  %v1551_v36 = vpop.f32.mrf.mxu1  ;;  %v1620_v27 = vld [vmem:[#allocation2 + $0x78] sm:$0xff] }
 0x1e6   : > { %5056 = vmatmul.msk.bf16.gmra.mxu3 %vm224_vm1, %v1869_v46  ;;  %v1621_v46 = vld [vmem:[#allocation2 + $0x80] sm:$0xff] }
 0x1e7   : > { %5074 = vmatmul.msk.bf16.gmra.mxu0 %vm224_vm1, %v6048_v56  ;;  %v1870_v56 = vpack.c.bf16 %v1841_v8, %v1840_v2  ;;  %v1842_v58 = vld [vmem:[#allocation2 + $0x79] sm:$0xff]  ;;  %v7754_v2 = vld [vmem:[#allocation9_spill] sm:$0xff] }
 0x1e8   : > { %v880_v14 = vpop.f32.mrf.mxu2 }
 0x1e9   : > { %v1102_v29 = vpop.f32.mrf.mxu3  ;;  %v933_v0 = vadd.f32 %v880_v14, %v6042_v34  ;;  %v1843_v14 = vld [vmem:[#allocation2 + $0x81] sm:$0xff] }
 0x1eb   : > { %v1155_v63 = vadd.f32 %v1102_v29, %v933_v0 }
 0x1ec   : > { %v1331_v26 = vpop.f32.mrf.mxu0 }
 0x1ed   : > { %v1377_v62 = vadd.f32 %v1324_v13, %v1155_v63  ;;  %v6303_v52 = vpop.f32.mrf.mxu1 }
 0x1ef   : > { %v6300_v50 = vadd.f32 %v1546_v44, %v1377_v62  ;;  %v1649_v62 = vpack.c.bf16 %v1621_v46, %v1620_v27  ;;  %v7756_v46 = vld [vmem:[#allocation8_spill] sm:$0xff] }
 0x1f0   : > { %v882_v47 = vpop.f32.mrf.mxu2 }
 0x1f1   : > { %v1104_v11 = vpop.f32.mrf.mxu3  ;;  %v934_v59 = vadd.f32 %v882_v47, %v6046_v55  ;;  %v7755_v47 = vld [vmem:[#allocation7_spill] sm:$0xff] }
 0x1f3   : > { %v1156_v17 = vadd.f32 %v1104_v11, %v934_v59  ;;  %v5450_v59 = vld [vmem:[%s7727_s3 + $0x20] sm:$0xff] }
 0x1f4   : > { %v1334_v30 = vpop.f32.mrf.mxu0  ;;  %2693 = vmatpush.bf16.msra.mxu1 %v5450_v59  ;;  %v1625_v59 = vld [vmem:[#allocation2 + $0xb0] sm:$0xff] }
 0x1f5   : > { %5040 = vmatmul.msk.bf16.gmra.mxu2 %vm224_vm1, %v1648_v45  ;;  %v6307_v34 = vadd.f32 %v1326_v24, %v1156_v17  ;;  %v1556_v20 = vpop.f32.mrf.mxu1  ;;  %v1622_v17 = vld [vmem:[#allocation2 + $0x90] sm:$0xff] }
 0x1f6   : > { %5057 = vmatmul.msk.bf16.gmra.mxu3 %vm224_vm1, %v1870_v56 }
 0x1f7   : > { %5075 = vmatmul.msk.bf16.gmra.mxu0 %vm224_vm1, %v6066_v39  ;;  %v1871_v39 = vpack.c.bf16 %v1843_v14, %v1842_v58 }
 0x1f8   : > { %v885_v13 = vpop.f32.mrf.mxu2 }
 0x1f9   : > { %v1107_v44 = vpop.f32.mrf.mxu3  ;;  %v935_v41 = vadd.f32 %v885_v13, %v6060_v3  ;;  %v1844_v13 = vld [vmem:[#allocation2 + $0x91] sm:$0xff] }
 0x1fb   : > { %v1157_v55 = vadd.f32 %v1107_v44, %v935_v41  ;;  %v1845_v44 = vld [vmem:[#allocation2 + $0x99] sm:$0xff] }
 0x1fc   : > { %v1336_v12 = vpop.f32.mrf.mxu0 }
 0x1fd   : > { %v1379_v60 = vadd.f32 %v1329_v40, %v1157_v55  ;;  %v6319_v40 = vpop.f32.mrf.mxu1 }
 0x1ff   : > { %v6312_v29 = vadd.f32 %v1551_v36, %v1379_v60 }
 0x200   : > { %v887_v0 = vpop.f32.mrf.mxu2 }
 0x201   : > { %v1109_v24 = vpop.f32.mrf.mxu3  ;;  %v936_v63 = vadd.f32 %v887_v0, %v6064_v25  ;;  %v1872_v0 = vpack.c.bf16 %v1845_v44, %v1844_v13  ;;  %v7759_v44 = vld [vmem:[#allocation11_spill] sm:$0xff] }
 0x203   : > { %v1158_v6 = vadd.f32 %v1109_v24, %v936_v63 }
 0x204   : > { %v1339_v22 = vpop.f32.mrf.mxu0 }
 0x205   : > { %5041 = vmatmul.msk.bf16.gmra.mxu2 %vm224_vm1, %v1649_v62  ;;  %v6317_v3 = vadd.f32 %v1331_v26, %v1158_v6  ;;  %v1623_v26 = vld [vmem:[#allocation2 + $0x98] sm:$0xff]  ;;  %v1561_v55 = vpop.f32.mrf.mxu1  ;;  %v7757_v62 = vld [vmem:[#allocation12_spill] sm:$0xff] }
 0x206   : > { %5058 = vmatmul.msk.bf16.gmra.mxu3 %vm224_vm1, %v1871_v39  ;;  %v1650_v14 = vpack.c.bf16 %v1623_v26, %v1622_v17  ;;  %v7758_v6 = vld [vmem:[#allocation10_spill] sm:$0xff] }
 0x207   : > { %5076 = vmatmul.msk.bf16.gmra.mxu0 %vm224_vm1, %v7754_v2  ;;  %v1847_v17 = vld [vmem:[#allocation2 + $0xb1] sm:$0xff] }
 0x208   : > { %v890_v36 = vpop.f32.mrf.mxu2 }
 0x209   : > { %v1112_v8 = vpop.f32.mrf.mxu3  ;;  %v937_v11 = vadd.f32 %v890_v36, %v7755_v47 }
 0x20b   : > { %v1159_v25 = vadd.f32 %v1112_v8, %v937_v11 }
 0x20c   : > { %v1341_v45 = vpop.f32.mrf.mxu0 }
 0x20d   : > { %v1381_v56 = vadd.f32 %v1334_v30, %v1159_v25  ;;  %v6337_v36 = vpop.f32.mrf.mxu1  ;;  %v1624_v25 = vld [vmem:[#allocation2 + $0xa8] sm:$0xff] }
 0x20f   : > { %v6327_v41 = vadd.f32 %v1556_v20, %v1381_v56  ;;  %v1846_v56 = vld [vmem:[#allocation2 + $0xa9] sm:$0xff] }
 0x210   : > { %v892_v60 = vpop.f32.mrf.mxu2 }
 0x211   : > { %v1114_v27 = vpop.f32.mrf.mxu3  ;;  %v938_v58 = vadd.f32 %v892_v60, %v7756_v46  ;;  %v1873_v46 = vpack.c.bf16 %v1847_v17, %v1846_v56  ;;  %v1848_v56 = vld [vmem:[#allocation2 + $0xc1] sm:$0xff]  ;;  %v1849_v17 = vld [vmem:[#allocation2 + $0xc9] sm:$0xff] }
 0x213   : > { %v1160_v24 = vadd.f32 %v1114_v27, %v938_v58  ;;  %v1651_v27 = vpack.c.bf16 %v1625_v59, %v1624_v25  ;;  %v1627_v59 = vld [vmem:[#allocation2 + $0xc8] sm:$0xff] }
 0x214   : > { %v1344_v63 = vpop.f32.mrf.mxu0 }
 0x215   : > { %5042 = vmatmul.msk.bf16.gmra.mxu2 %vm224_vm1, %v1650_v14  ;;  %v6332_v30 = vadd.f32 %v1336_v12, %v1160_v24  ;;  %v1566_v14 = vpop.f32.mrf.mxu1  ;;  %v7760_v24 = vld [vmem:[#allocation15_spill] sm:$0xff] }
 0x216   : > { %5059 = vmatmul.msk.bf16.gmra.mxu3 %vm224_vm1, %v1872_v0 }
 0x217   : > { %5077 = vmatmul.msk.bf16.gmra.mxu0 %vm224_vm1, %v7757_v62 }
 0x218   : > { %v895_v20 = vpop.f32.mrf.mxu2 }
 0x219   : > { %v1117_v39 = vpop.f32.mrf.mxu3  ;;  %v939_v2 = vadd.f32 %v895_v20, %v7758_v6  ;;  %v7761_v20 = vld [vmem:[#allocation13_spill] sm:$0xff] }
 0x21b   : > { %v1161_v8 = vadd.f32 %v1117_v39, %v939_v2 }
 0x21c   : > { %v1346_v47 = vpop.f32.mrf.mxu0 }
 0x21d   : > { %v1383_v11 = vadd.f32 %v1339_v22, %v1161_v8  ;;  %v6349_v25 = vpop.f32.mrf.mxu1 }
 0x21f   : > { %v6339_v26 = vadd.f32 %v1561_v55, %v1383_v11  ;;  %v1626_v11 = vld [vmem:[#allocation2 + $0xc0] sm:$0xff] }
 0x220   : > { %v897_v12 = vpop.f32.mrf.mxu2 }
 0x221   : > { %v1119_v13 = vpop.f32.mrf.mxu3  ;;  %v940_v60 = vadd.f32 %v897_v12, %v7759_v44  ;;  %v7762_v44 = vld [vmem:[#allocation14_spill] sm:$0xff] }
 0x223   : > { %v1162_v58 = vadd.f32 %v1119_v13, %v940_v60 }
 0x224   : > { %v1349_v0 = vpop.f32.mrf.mxu0 }
 0x225   : > { %5043 = vmatmul.msk.bf16.gmra.mxu2 %vm224_vm1, %v1651_v27  ;;  %v6344_v22 = vadd.f32 %v1341_v45, %v1162_v58  ;;  %v1652_v27 = vpack.c.bf16 %v1627_v59, %v1626_v11  ;;  %v1628_v11 = vld [vmem:[#allocation2 + $0xd8] sm:$0xff]  ;;  %v1629_v59 = vld [vmem:[#allocation2 + $0xe0] sm:$0xff] }
 0x226   : > { %5060 = vmatmul.msk.bf16.gmra.mxu3 %vm224_vm1, %v1873_v46  ;;  %v1874_v46 = vpack.c.bf16 %v1849_v17, %v1848_v56  ;;  %v1850_v56 = vld [vmem:[#allocation2 + $0xd9] sm:$0xff]  ;;  %v1851_v17 = vld [vmem:[#allocation2 + $0xe1] sm:$0xff] }
 0x227   : > { %5078 = vmatmul.msk.bf16.gmra.mxu0 %vm224_vm1, %v7760_v24 }
 0x228   : > { %v900_v55 = vpop.f32.mrf.mxu2 }
 0x229   : > { %v1122_v62 = vpop.f32.mrf.mxu3  ;;  %v941_v39 = vadd.f32 %v900_v55, %v7761_v20  ;;  %v1571_v55 = vpop.f32.mrf.mxu1 }
 0x22b   : > { %v1163_v6 = vadd.f32 %v1122_v62, %v941_v39  ;;  %v7764_v39 = vld [vmem:[#allocation16_spill] sm:$0xff] }
 0x22c   : > { %v1351_v2 = vpop.f32.mrf.mxu0 }
 0x22d   : > { %v1385_v8 = vadd.f32 %v1344_v63, %v1163_v6 }
 0x22f   : > { %v6351_v12 = vadd.f32 %v1566_v14, %v1385_v8  ;;  %v7763_v14 = vmov 0.0  }
 0x230   : > { %v902_v45 = vpop.f32.mrf.mxu2  ;;  %2417 = vst.msk [vmem:[#allocation3 + $0x18] sm:$0xff] %vm2412_vm3, %v7763_v14 }
 0x231   : > { %v1124_v13 = vpop.f32.mrf.mxu3  ;;  %v942_v60 = vadd.f32 %v902_v45, %v7762_v44  ;;  %2418 = vst.msk [vmem:[#allocation3 + $0x20] sm:$0xff] %vm2412_vm3, %v7763_v14 }
 0x232   : > { %2413 = vst.msk [vmem:[#allocation3] sm:$0xff] %vm2412_vm3, %v7763_v14 }
 0x233   : > { %v1164_v58 = vadd.f32 %v1124_v13, %v942_v60  ;;  %2414 = vst.msk [vmem:[#allocation3 + $0x8] sm:$0xff] %vm2412_vm3, %v7763_v14 }
 0x234   : > { %v1354_v24 = vpop.f32.mrf.mxu0  ;;  %2420 = vst.msk [vmem:[#allocation3 + $0x30] sm:$0xff] %vm2412_vm3, %v7763_v14 }
 0x235   : > { %5044 = vmatmul.msk.bf16.gmra.mxu2 %vm224_vm1, %v1652_v27  ;;  %v6356_v63 = vadd.f32 %v1346_v47, %v1164_v58  ;;  %2421 = vst.msk [vmem:[#allocation3 + $0x38] sm:$0xff] %vm2412_vm3, %v7763_v14  ;;  %v1653_v27 = vpack.c.bf16 %v1629_v59, %v1628_v11  ;;  %v6388_v58 = vpop.f32.mrf.mxu1 }
 0x236   : > { %5061 = vmatmul.msk.bf16.gmra.mxu3 %vm224_vm1, %v1874_v46  ;;  %2423 = vst.msk [vmem:[#allocation3 + $0x48] sm:$0xff] %vm2412_vm3, %v7763_v14  ;;  %v1875_v46 = vpack.c.bf16 %v1851_v17, %v1850_v56 }
 0x237   : > { %5079 = vmatmul.msk.bf16.gmra.mxu0 %vm224_vm1, %v6138_v43  ;;  %2424 = vst.msk [vmem:[#allocation3 + $0x50] sm:$0xff] %vm2412_vm3, %v7763_v14 }
 0x238   : > { %v905_v62 = vpop.f32.mrf.mxu2  ;;  %2426 = vst.msk [vmem:[#allocation3 + $0x60] sm:$0xff] %vm2412_vm3, %v7763_v14 }
 0x239   : > { %v1127_v20 = vpop.f32.mrf.mxu3  ;;  %v943_v6 = vadd.f32 %v905_v62, %v7764_v39  ;;  %2427 = vst.msk [vmem:[#allocation3 + $0x68] sm:$0xff] %vm2412_vm3, %v7763_v14  ;;  %v5449_v39 = vld [vmem:[%s7727_s3 + $0x18] sm:$0xff] }
 0x23a   : > { %2429 = vst.msk [vmem:[#allocation3 + $0x78] sm:$0xff] %vm2412_vm3, %v7763_v14  ;;  %2851 = vmatpush.bf16.msrb.mxu2 %v5449_v39  ;;  %v7769_v39 = vld [vmem:[#allocation19_spill] sm:$0xff] }
 0x23b   : > { %v1165_v47 = vadd.f32 %v1127_v20, %v943_v6  ;;  %7766 = vst [vmem:[#allocation9_spill] sm:$0xff] %v6388_v58 }
 0x23c   : > { %v6371_v43 = vpop.f32.mrf.mxu0  ;;  %2430 = vst.msk [vmem:[#allocation3 + $0x80] sm:$0xff] %vm2412_vm3, %v7763_v14 }
 0x23d   : > { %v1387_v8 = vadd.f32 %v1349_v0, %v1165_v47  ;;  %v7765_v0 = vld [vmem:[#allocation17_spill] sm:$0xff]  ;;  %2432 = vst.msk [vmem:[#allocation3 + $0x90] sm:$0xff] %vm2412_vm3, %v7763_v14  ;;  %v1576_v59 = vpop.f32.mrf.mxu1 }
 0x23e   : > { %2433 = vst.msk [vmem:[#allocation3 + $0x98] sm:$0xff] %vm2412_vm3, %v7763_v14 }
 0x23f   : > { %v6379_v45 = vadd.f32 %v1571_v55, %v1387_v8  ;;  %2435 = vst.msk [vmem:[#allocation3 + $0xa8] sm:$0xff] %vm2412_vm3, %v7763_v14  ;;  %v7767_v8 = vld [vmem:[#allocation18_spill] sm:$0xff] }
 0x240   : > { %v907_v13 = vpop.f32.mrf.mxu2  ;;  %2436 = vst.msk [vmem:[#allocation3 + $0xb0] sm:$0xff] %vm2412_vm3, %v7763_v14 }
 0x241   : > { %v1129_v44 = vpop.f32.mrf.mxu3  ;;  %v944_v60 = vadd.f32 %v907_v13, %v7765_v0  ;;  %2438 = vst.msk [vmem:[#allocation3 + $0xc0] sm:$0xff] %vm2412_vm3, %v7763_v14  ;;  %v1630_v13 = vld [vmem:[#allocation2 + $0xf0] sm:$0xff] }
 0x242   : > { %2439 = vst.msk [vmem:[#allocation3 + $0xc8] sm:$0xff] %vm2412_vm3, %v7763_v14  ;;  %v1852_v0 = vld [vmem:[#allocation2 + $0xf1] sm:$0xff] }
 0x243   : > { %v1166_v55 = vadd.f32 %v1129_v44, %v944_v60  ;;  %2441 = vst.msk [vmem:[#allocation3 + $0xd8] sm:$0xff] %vm2412_vm3, %v7763_v14  ;;  %v1631_v44 = vld [vmem:[#allocation2 + $0xf8] sm:$0xff] }
 0x244   : > { %v6394_v62 = vpop.f32.mrf.mxu0  ;;  %2442 = vst.msk [vmem:[#allocation3 + $0xe0] sm:$0xff] %vm2412_vm3, %v7763_v14  ;;  %v1853_v60 = vld [vmem:[#allocation2 + $0xf9] sm:$0xff] }
 0x245   : > { %5045 = vmatmul.msk.bf16.gmra.mxu2 %vm224_vm1, %v1653_v27  ;;  %v6400_v20 = vadd.f32 %v1351_v2, %v1166_v55  ;;  %v5457_v2 = vld [vmem:[%s7727_s3 + $0x58] sm:$0xff]  ;;  %2444 = vst.msk [vmem:[#allocation3 + $0xf0] sm:$0xff] %vm2412_vm3, %v7763_v14 }
 0x246   : > { %5062 = vmatmul.msk.bf16.gmra.mxu3 %vm224_vm1, %v1875_v46  ;;  %2445 = vst.msk [vmem:[#allocation3 + $0xf8] sm:$0xff] %vm2412_vm3, %v7763_v14  ;;  %v5461_v46 = vld [vmem:[%s7727_s3 + $0x78] sm:$0xff] }
 0x247   : > { %5080 = vmatmul.msk.bf16.gmra.mxu0 %vm224_vm1, %v6155_v51  ;;  %3069 = vmatpush.bf16.msrb.mxu3 %v5457_v2  ;;  %2447 = vst.msk [vmem:[#allocation3 + $0x108] sm:$0xff] %vm2412_vm3, %v7763_v14 }
 0x248   : > { %v910_v6 = vpop.f32.mrf.mxu2  ;;  %2448 = vst.msk [vmem:[#allocation3 + $0x110] sm:$0xff] %vm2412_vm3, %v7763_v14  ;;  %3319 = vmatpush.bf16.msrb.mxu0 %v5461_v46  ;;  %v1632_v46 = vld [vmem:[#allocation2 + $0x108] sm:$0xff] }
 0x249   : > { %v1132_v47 = vpop.f32.mrf.mxu3  ;;  %v945_v11 = vadd.f32 %v910_v6, %v7767_v8  ;;  %2450 = vst.msk [vmem:[#allocation3 + $0x120] sm:$0xff] %vm2412_vm3, %v7763_v14  ;;  %v1654_v6 = vpack.c.bf16 %v1631_v44, %v1630_v13 }
 0x24a   : > { %2451 = vst.msk [vmem:[#allocation3 + $0x128] sm:$0xff] %vm2412_vm3, %v7763_v14 }
 0x24b   : > { %v1167_v51 = vadd.f32 %v1132_v47, %v945_v11  ;;  %v1876_v47 = vpack.c.bf16 %v1853_v60, %v1852_v0  ;;  %2453 = vst.msk [vmem:[#allocation3 + $0x138] sm:$0xff] %vm2412_vm3, %v7763_v14 }
 0x24c   : > { %v6425_v56 = vpop.f32.mrf.mxu0  ;;  %2454 = vst.msk [vmem:[#allocation3 + $0x140] sm:$0xff] %vm2412_vm3, %v7763_v14 }
 0x24d   : > { %v1389_v17 = vadd.f32 %v1354_v24, %v1167_v51  ;;  %2456 = vst.msk [vmem:[#allocation3 + $0x150] sm:$0xff] %vm2412_vm3, %v7763_v14 }
 0x24e   : > { %2457 = vst.msk [vmem:[#allocation3 + $0x158] sm:$0xff] %vm2412_vm3, %v7763_v14 }
 0x24f   : > { %v6433_v27 = vadd.f32 %v1576_v59, %v1389_v17  ;;  %2459 = vst.msk [vmem:[#allocation3 + $0x168] sm:$0xff] %vm2412_vm3, %v7763_v14  ;;  %v5465_v59 = vld [vmem:[%s7727_s3 + $0x98] sm:$0xff] }
 0x250   : > { %v912_v24 = vpop.f32.mrf.mxu2  ;;  %2460 = vst.msk [vmem:[#allocation3 + $0x170] sm:$0xff] %vm2412_vm3, %v7763_v14  ;;  %3569 = vmatpush.bf16.msrb.mxu1 %v5465_v59 }
 0x251   : > { %7768 = vst [vmem:[#allocation7_spill] sm:$0xff] %v6433_v27  ;;  %v1134_v55 = vpop.f32.mrf.mxu3  ;;  %v946_v2 = vadd.f32 %v912_v24, %v7769_v39  ;;  %v1633_v24 = vld [vmem:[#allocation2 + $0x110] sm:$0xff] }
 0x252   : > { %2462 = vst.msk [vmem:[#allocation3 + $0x180] sm:$0xff] %vm2412_vm3, %v7763_v14  ;;  %v1855_v39 = vld [vmem:[#allocation2 + $0x111] sm:$0xff] }
 0x253   : > { %v1168_v8 = vadd.f32 %v1134_v55, %v946_v2  ;;  %2463 = vst.msk [vmem:[#allocation3 + $0x188] sm:$0xff] %vm2412_vm3, %v7763_v14  ;;  %v1854_v55 = vld [vmem:[#allocation2 + $0x109] sm:$0xff] }
 0x254   : > { %v6451_v11 = vpop.f32.mrf.mxu0  ;;  %2465 = vst.msk [vmem:[#allocation3 + $0x198] sm:$0xff] %vm2412_vm3, %v7763_v14 }
 0x255   : > { %5046 = vmatmul.msk.bf16.gmra.mxu2 %vm224_vm1, %v1654_v6  ;;  %v6456_v51 = vadd.f32 %v6371_v43, %v1168_v8  ;;  %v2280_v43 = vld [vmem:[%s7726_s2] sm:$0x7]  ;;  %2466 = vst.msk [vmem:[#allocation3 + $0x1a0] sm:$0xff] %vm2412_vm3, %v7763_v14 }
 0x256   : > { %5063 = vmatmul.msk.bf16.gmra.mxu3 %vm224_vm1, %v1876_v47  ;;  %v6479_v0 = vperm.slane %v2280_v43, 0  ;;  %2419 = vst.msk [vmem:[#allocation3 + $0x28] sm:$0x3] %vm2415_vm4, %v7763_v14  ;;  %v6493_v6 = vperm.slane %v2280_v43, 1  ;;  %v6497_v47 = vperm.slane %v2280_v43, 2 }
 0x257   : > { %7770 = vst [vmem:[#allocation8_spill] sm:$0xff] %v6456_v51  ;;  %5081 = vmatmul.msk.bf16.gmra.mxu0 %vm224_vm1, %v6170_v57 }
 0x258   : > { %v1724_v17 = vpop.f32.mrf.mxu2  ;;  %2416 = vst.msk [vmem:[#allocation3 + $0x10] sm:$0x3] %vm2415_vm4, %v7763_v14 }
 0x259   : > { %v1946_v13 = vpop.f32.mrf.mxu3  ;;  %v1804_v44 = vadd.f32 %v1724_v17, %v6168_v1  ;;  %2422 = vst.msk [vmem:[#allocation3 + $0x40] sm:$0x3] %vm2415_vm4, %v7763_v14 }
 0x25a   : > { %2425 = vst.msk [vmem:[#allocation3 + $0x58] sm:$0x3] %vm2415_vm4, %v7763_v14 }
 0x25b   : > { %v2026_v57 = vadd.f32 %v1946_v13, %v1804_v44  ;;  %2428 = vst.msk [vmem:[#allocation3 + $0x70] sm:$0x3] %vm2415_vm4, %v7763_v14  ;;  %v2557_v13 = vld [vmem:[#allocation3 + $0x1] sm:$0xff]  ;;  %v1655_v44 = vpack.c.bf16 %v1633_v24, %v1632_v46 }
 0x25c   : > { %v6485_v60 = vpop.f32.mrf.mxu0  ;;  %2431 = vst.msk [vmem:[#allocation3 + $0x88] sm:$0x3] %vm2415_vm4, %v7763_v14 }
 0x25d   : > { %v2248_v1 = vadd.f32 %v6394_v62, %v2026_v57  ;;  %2434 = vst.msk [vmem:[#allocation3 + $0xa0] sm:$0x3] %vm2415_vm4, %v7763_v14  ;;  %v1877_v57 = vpack.c.bf16 %v1855_v39, %v1854_v55 }
 0x25e   : > { %2437 = vst.msk [vmem:[#allocation3 + $0xb8] sm:$0x3] %vm2415_vm4, %v7763_v14 }
 0x25f   : > { %v2282_v2 = vadd.f32 %v6479_v0, %v2248_v1  ;;  %2440 = vst.msk [vmem:[#allocation3 + $0xd0] sm:$0x3] %vm2415_vm4, %v7763_v14  ;;  %v2558_v51 = vld [vmem:[#allocation3 + $0x9] sm:$0xff] }
 0x260   : > { %v1726_v62 = vpop.f32.mrf.mxu2  ;;  %2443 = vst.msk [vmem:[#allocation3 + $0xe8] sm:$0x3] %vm2415_vm4, %v7763_v14 }
 0x261   : > { %v1948_v8 = vpop.f32.mrf.mxu3  ;;  %v2314_v59 = vmax.f32 %v2282_v2, 0.0  ;;  %v1805_v17 = vadd.f32 %v1726_v62, %v6176_v49  ;;  %v2589_v49 = vpack.c.bf16 %v2558_v51, %v2557_v13  ;;  %2446 = vst.msk [vmem:[#allocation3 + $0x100] sm:$0x3] %vm2415_vm4, %v7763_v14  ;;  %v1634_v13 = vld [vmem:[#allocation2 + $0x120] sm:$0xff] }
 0x262   : > { %2449 = vst.msk [vmem:[#allocation3 + $0x118] sm:$0x3] %vm2415_vm4, %v7763_v14 }
 0x263   : > { %v2347_v43 = vmul.f32 %v6493_v6, %v2314_v59  ;;  %v2027_v1 = vadd.f32 %v1948_v8, %v1805_v17  ;;  %5112 = vmatmul.msk.bf16.vlgmr.msra.gmra.mxu1 %vm2412_vm3, %v2589_v49  ;;  %2452 = vst.msk [vmem:[#allocation3 + $0x130] sm:$0x3] %vm2415_vm4, %v7763_v14 }
 0x264   : > { %v6511_v2 = vpop.f32.mrf.mxu0  ;;  %2455 = vst.msk [vmem:[#allocation3 + $0x148] sm:$0x3] %vm2415_vm4, %v7763_v14 }
 0x265   : > { %v2380_v62 = vadd.f32 %v6497_v47, %v2347_v43  ;;  %v2249_v46 = vadd.f32 %v6425_v56, %v2027_v1  ;;  %5047 = vmatmul.msk.bf16.gmra.mxu2 %vm224_vm1, %v1655_v44  ;;  %2458 = vst.msk [vmem:[#allocation3 + $0x160] sm:$0x3] %vm2415_vm4, %v7763_v14  ;;  %v1635_v44 = vld [vmem:[#allocation2 + $0x128] sm:$0xff] }
 0x266   : > { %5064 = vmatmul.msk.bf16.gmra.mxu3 %vm224_vm1, %v1877_v57  ;;  %2461 = vst.msk [vmem:[#allocation3 + $0x178] sm:$0x3] %vm2415_vm4, %v7763_v14  ;;  %v1856_v57 = vld [vmem:[#allocation2 + $0x121] sm:$0xff]  ;;  %v1857_v43 = vld [vmem:[#allocation2 + $0x129] sm:$0xff] }
 0x267   : > { %2469 = vst.msk [vmem:[#allocation3 + $0x19] sm:$0xff] %vm2412_vm3, %v2380_v62  ;;  %v2283_v51 = vadd.f32 %v6479_v0, %v2249_v46  ;;  %5082 = vmatmul.msk.bf16.gmra.mxu0 %vm224_vm1, %v6186_v9  ;;  %v2080_v46 = vld [vmem:[#allocation2 + $0x13a] sm:$0xff] }
 0x268   : > { %v1729_v56 = vpop.f32.mrf.mxu2  ;;  %2464 = vst.msk [vmem:[#allocation3 + $0x190] sm:$0x3] %vm2415_vm4, %v7763_v14 }
 0x269   : > { %v1951_v24 = vpop.f32.mrf.mxu3  ;;  %v2315_v55 = vmax.f32 %v2283_v51, 0.0  ;;  %v1806_v39 = vadd.f32 %v1729_v56, %v6183_v48  ;;  %2467 = vst.msk [vmem:[#allocation3 + $0x1a8] sm:$0x3] %vm2415_vm4, %v7763_v14  ;;  %v2081_v51 = vld [vmem:[#allocation2 + $0x142] sm:$0xff] }
 0x26b   : > { %v2348_v8 = vmul.f32 %v6493_v6, %v2315_v55  ;;  %v2028_v9 = vadd.f32 %v1951_v24, %v1806_v39  ;;  %v1656_v55 = vpack.c.bf16 %v1635_v44, %v1634_v13  ;;  %v1878_v39 = vpack.c.bf16 %v1857_v43, %v1856_v57 }
 0x26c   : > { %v2180_v59 = vpop.f32.mrf.mxu0 }
 0x26d   : > { %v2381_v17 = vadd.f32 %v6497_v47, %v2348_v8  ;;  %v2250_v48 = vadd.f32 %v6451_v11, %v2028_v9  ;;  %v2101_v8 = vpack.c.bf16 %v2081_v51, %v2080_v46  ;;  %v1636_v51 = vld [vmem:[#allocation2 + $0x138] sm:$0xff] }
 0x26f   : > { %2470 = vst.msk [vmem:[#allocation3 + $0x21] sm:$0xff] %vm2412_vm3, %v2381_v17  ;;  %v2284_v1 = vadd.f32 %v6479_v0, %v2250_v48  ;;  %v2559_v48 = vld [vmem:[#allocation3 + $0x19] sm:$0xff] }
 0x270   : > { %v1731_v49 = vpop.f32.mrf.mxu2 }
 0x271   : > { %v1953_v62 = vpop.f32.mrf.mxu3  ;;  %v2316_v56 = vmax.f32 %v2284_v1, 0.0  ;;  %v1807_v24 = vadd.f32 %v1731_v49, %v6192_v42 }
 0x273   : > { %v2349_v14 = vmul.f32 %v6493_v6, %v2316_v56  ;;  %v2029_v11 = vadd.f32 %v1953_v62, %v1807_v24  ;;  %v1858_v56 = vld [vmem:[#allocation2 + $0x139] sm:$0xff]  ;;  %v1859_v24 = vld [vmem:[#allocation2 + $0x141] sm:$0xff] }
 0x274   : > { %v2183_v9 = vpop.f32.mrf.mxu0 }
 0x275   : > { %v2382_v27 = vadd.f32 %v6497_v47, %v2349_v14  ;;  %v2251_v17 = vadd.f32 %v6485_v60, %v2029_v11  ;;  %5048 = vmatmul.msk.bf16.gmra.mxu2 %vm224_vm1, %v1656_v55  ;;  %v2082_v14 = vld [vmem:[#allocation2 + $0x152] sm:$0xff]  ;;  %v2083_v11 = vld [vmem:[#allocation2 + $0x15a] sm:$0xff] }
 0x276   : > { %5065 = vmatmul.msk.bf16.gmra.mxu3 %vm224_vm1, %v1878_v39  ;;  %v2560_v58 = vld [vmem:[#allocation3 + $0x21] sm:$0xff] }
 0x277   : > { %2471 = vst.msk [vmem:[#allocation3 + $0x31] sm:$0xff] %vm2412_vm3, %v2382_v27  ;;  %v2285_v42 = vadd.f32 %v6479_v0, %v2251_v17  ;;  %v2590_v13 = vpack.c.bf16 %v2560_v58, %v2559_v48  ;;  %5083 = vmatmul.msk.bf16.gmra.mxu0 %vm224_vm1, %v2101_v8  ;;  %v1637_v58 = vld [vmem:[#allocation2 + $0x140] sm:$0xff] }
 0x278   : > { %v1734_v44 = vpop.f32.mrf.mxu2  ;;  %v1657_v48 = vpack.c.bf16 %v1637_v58, %v1636_v51 }
 0x279   : > { %v1956_v57 = vpop.f32.mrf.mxu3  ;;  %v2317_v43 = vmax.f32 %v2285_v42, 0.0  ;;  %v1808_v1 = vadd.f32 %v1734_v44, %v6199_v18  ;;  %5113 = vmatmul.msk.bf16.gmra.mxu1 %vm2412_vm3, %v2590_v13  ;;  %v1879_v42 = vpack.c.bf16 %v1859_v24, %v1858_v56  ;;  %v2102_v44 = vpack.c.bf16 %v2083_v11, %v2082_v14 }
 0x27b   : > { %v2350_v60 = vmul.f32 %v6493_v6, %v2317_v43  ;;  %v2030_v49 = vadd.f32 %v1956_v57, %v1808_v1 }
 0x27c   : > { %v6556_v62 = vpop.f32.mrf.mxu0 }
 0x27d   : > { %v2383_v46 = vadd.f32 %v6497_v47, %v2350_v60  ;;  %v2252_v27 = vadd.f32 %v6511_v2, %v2030_v49 }
 0x27e   : > { %v2561_v60 = vld [vmem:[#allocation3 + $0x31] sm:$0xff] }
 0x27f   : > { %2472 = vst.msk [vmem:[#allocation3 + $0x39] sm:$0xff] %vm2412_vm3, %v2383_v46  ;;  %v2286_v55 = vadd.f32 %v6479_v0, %v2252_v27  ;;  %v5448_v27 = vld [vmem:[%s7727_s3 + $0x10] sm:$0xff] }
 0x280   : > { %v1736_v18 = vpop.f32.mrf.mxu2  ;;  %2852 = vmatpush.bf16.msrb.mxu2 %v5448_v27 }
 0x281   : > { %v1958_v39 = vpop.f32.mrf.mxu3  ;;  %v2318_v8 = vmax.f32 %v2286_v55, 0.0  ;;  %v1809_v17 = vadd.f32 %v1736_v18, %v6206_v35 }
 0x283   : > { %v2351_v13 = vmul.f32 %v6493_v6, %v2318_v8  ;;  %v2031_v2 = vadd.f32 %v1958_v39, %v1809_v17  ;;  %v1638_v8 = vld [vmem:[#allocation2 + $0x150] sm:$0xff]  ;;  %v1639_v17 = vld [vmem:[#allocation2 + $0x158] sm:$0xff] }
 0x284   : > { %v6564_v57 = vpop.f32.mrf.mxu0 }
 0x285   : > { %v2384_v43 = vadd.f32 %v6497_v47, %v2351_v13  ;;  %v2253_v1 = vadd.f32 %v2180_v59, %v2031_v2  ;;  %5049 = vmatmul.msk.bf16.gmra.mxu2 %vm224_vm1, %v1657_v48  ;;  %v5456_v59 = vld [vmem:[%s7727_s3 + $0x50] sm:$0xff] }
 0x286   : > { %5066 = vmatmul.msk.bf16.gmra.mxu3 %vm224_vm1, %v1879_v42  ;;  %v2562_v49 = vld [vmem:[#allocation3 + $0x39] sm:$0xff]  ;;  %v1860_v48 = vld [vmem:[#allocation2 + $0x151] sm:$0xff]  ;;  %v1861_v42 = vld [vmem:[#allocation2 + $0x159] sm:$0xff] }
 0x287   : > { %2473 = vst.msk [vmem:[#allocation3 + $0x49] sm:$0xff] %vm2412_vm3, %v2384_v43  ;;  %v2287_v35 = vadd.f32 %v6479_v0, %v2253_v1  ;;  %v2591_v46 = vpack.c.bf16 %v2562_v49, %v2561_v60  ;;  %5084 = vmatmul.msk.bf16.gmra.mxu0 %vm224_vm1, %v2102_v44  ;;  %3070 = vmatpush.bf16.msrb.mxu3 %v5456_v59  ;;  %v5460_v13 = vld [vmem:[%s7727_s3 + $0x70] sm:$0xff] }
 0x288   : > { %v1739_v51 = vpop.f32.mrf.mxu2  ;;  %v2084_v43 = vld [vmem:[#allocation2 + $0x16a] sm:$0xff]  ;;  %v2085_v1 = vld [vmem:[#allocation2 + $0x172] sm:$0xff]  ;;  %3320 = vmatpush.bf16.msrb.mxu0 %v5460_v13 }
 0x289   : > { %v1961_v58 = vpop.f32.mrf.mxu3  ;;  %v2319_v56 = vmax.f32 %v2287_v35, 0.0  ;;  %v1810_v24 = vadd.f32 %v1739_v51, %v6217_v38  ;;  %5114 = vmatmul.msk.bf16.gmra.mxu1 %vm2412_vm3, %v2591_v46  ;;  %v1880_v35 = vpack.c.bf16 %v1861_v42, %v1860_v48  ;;  %v2103_v59 = vpack.c.bf16 %v2085_v1, %v2084_v43  ;;  %v1641_v43 = vld [vmem:[#allocation2 + $0x170] sm:$0xff] }
 0x28a   : > { %v1862_v1 = vld [vmem:[#allocation2 + $0x169] sm:$0xff] }
 0x28b   : > { %v2352_v55 = vmul.f32 %v6493_v6, %v2319_v56  ;;  %v2032_v18 = vadd.f32 %v1961_v58, %v1810_v24 }
 0x28c   : > { %v6581_v39 = vpop.f32.mrf.mxu0 }
 0x28d   : > { %v2385_v14 = vadd.f32 %v6497_v47, %v2352_v55  ;;  %v2254_v11 = vadd.f32 %v2183_v9, %v2032_v18  ;;  %v1658_v9 = vpack.c.bf16 %v1639_v17, %v1638_v8 }
 0x28e   : > { %v2563_v24 = vld [vmem:[#allocation3 + $0x49] sm:$0xff] }
 0x28f   : > { %2474 = vst.msk [vmem:[#allocation3 + $0x51] sm:$0xff] %vm2412_vm3, %v2385_v14  ;;  %v2288_v38 = vadd.f32 %v6479_v0, %v2254_v11  ;;  %v5464_v14 = vld [vmem:[%s7727_s3 + $0x90] sm:$0xff] }
 0x290   : > { %v1741_v2 = vpop.f32.mrf.mxu2  ;;  %3570 = vmatpush.bf16.msrb.mxu1 %v5464_v14 }
 0x291   : > { %v1963_v44 = vpop.f32.mrf.mxu3  ;;  %v2320_v60 = vmax.f32 %v2288_v38, 0.0  ;;  %v1811_v49 = vadd.f32 %v1741_v2, %v6228_v32 }
 0x293   : > { %v2353_v46 = vmul.f32 %v6493_v6, %v2320_v60  ;;  %v2033_v27 = vadd.f32 %v1963_v44, %v1811_v49  ;;  %v1640_v44 = vld [vmem:[#allocation2 + $0x168] sm:$0xff]  ;;  %v1863_v60 = vld [vmem:[#allocation2 + $0x171] sm:$0xff]  ;;  %v1590_v49 = vadd.f32 %v6215_v33, %v6242_v28 }
 0x294   : > { %v2193_v51 = vpop.f32.mrf.mxu0 }
 0x295   : > { %v2386_v58 = vadd.f32 %v6497_v47, %v2353_v46  ;;  %v2255_v56 = vadd.f32 %v6556_v62, %v2033_v27  ;;  %5050 = vmatmul.msk.bf16.gmra.mxu2 %vm224_vm1, %v1658_v9  ;;  %v2086_v46 = vld [vmem:[#allocation2 + $0x182] sm:$0xff]  ;;  %v2087_v27 = vld [vmem:[#allocation2 + $0x18a] sm:$0xff] }
 0x296   : > { %5067 = vmatmul.msk.bf16.gmra.mxu3 %vm224_vm1, %v1880_v35  ;;  %v2564_v55 = vld [vmem:[#allocation3 + $0x51] sm:$0xff] }
 0x297   : > { %2475 = vst.msk [vmem:[#allocation3 + $0x61] sm:$0xff] %vm2412_vm3, %v2386_v58  ;;  %v2289_v32 = vadd.f32 %v6479_v0, %v2255_v56  ;;  %v2592_v18 = vpack.c.bf16 %v2564_v55, %v2563_v24  ;;  %5085 = vmatmul.msk.bf16.gmra.mxu0 %vm224_vm1, %v2103_v59  ;;  %v1659_v56 = vpack.c.bf16 %v1641_v43, %v1640_v44  ;;  %v5459_v44 = vld [vmem:[%s7727_s3 + $0x68] sm:$0xff] }
 0x298   : > { %v1744_v11 = vpop.f32.mrf.mxu2  ;;  %v1881_v24 = vpack.c.bf16 %v1863_v60, %v1862_v1  ;;  %3321 = vmatpush.bf16.msrb.mxu0 %v5459_v44 }
 0x299   : > { %v1966_v8 = vpop.f32.mrf.mxu3  ;;  %v2321_v62 = vmax.f32 %v2289_v32, 0.0  ;;  %v1812_v17 = vadd.f32 %v1744_v11, %v6236_v19  ;;  %5115 = vmatmul.msk.bf16.gmra.mxu1 %vm2412_vm3, %v2592_v18  ;;  %v2104_v32 = vpack.c.bf16 %v2087_v27, %v2086_v46  ;;  %v5458_v27 = vld [vmem:[%s7727_s3 + $0x60] sm:$0xff] }
 0x29b   : > { %v2354_v48 = vmul.f32 %v6493_v6, %v2321_v62  ;;  %v2034_v42 = vadd.f32 %v1966_v8, %v1812_v17 }
 0x29c   : > { %v6604_v38 = vpop.f32.mrf.mxu0  ;;  %3322 = vmatpush.bf16.msrb.mxu0 %v5458_v27  ;;  %v1645_v27 = vld [vmem:[#allocation2 + $0x1a0] sm:$0xff] }
 0x29d   : > { %v2387_v13 = vadd.f32 %v6497_v47, %v2354_v48  ;;  %v2256_v2 = vadd.f32 %v6564_v57, %v2034_v42 }
 0x29e   : > { %v2565_v14 = vld [vmem:[#allocation3 + $0x61] sm:$0xff] }
 0x29f   : > { %2476 = vst.msk [vmem:[#allocation3 + $0x69] sm:$0xff] %vm2412_vm3, %v2387_v13  ;;  %v2290_v19 = vadd.f32 %v6479_v0, %v2256_v2 }
 0x2a0   : > { %v1746_v9 = vpop.f32.mrf.mxu2 }
 0x2a1   : > { %v1968_v35 = vpop.f32.mrf.mxu3  ;;  %v2322_v59 = vmax.f32 %v2290_v19, 0.0  ;;  %v1813_v58 = vadd.f32 %v1746_v9, %v1590_v49  ;;  %v1642_v49 = vld [vmem:[#allocation2 + $0x180] sm:$0xff]  ;;  %v1643_v19 = vld [vmem:[#allocation2 + $0x188] sm:$0xff] }
 0x2a2   : > { %v1864_v9 = vld [vmem:[#allocation2 + $0x181] sm:$0xff] }
 0x2a3   : > { %v2355_v57 = vmul.f32 %v6493_v6, %v2322_v59  ;;  %v2035_v55 = vadd.f32 %v1968_v35, %v1813_v58  ;;  %v1865_v35 = vld [vmem:[#allocation2 + $0x189] sm:$0xff] }
 0x2a4   : > { %v6613_v18 = vpop.f32.mrf.mxu0 }
 0x2a5   : > { %v2388_v33 = vadd.f32 %v6497_v47, %v2355_v57  ;;  %v2257_v28 = vadd.f32 %v6581_v39, %v2035_v55  ;;  %5051 = vmatmul.msk.bf16.gmra.mxu2 %vm224_vm1, %v1659_v56  ;;  %v2088_v56 = vld [vmem:[#allocation2 + $0x19a] sm:$0xff]  ;;  %v1660_v55 = vpack.c.bf16 %v1643_v19, %v1642_v49 }
 0x2a6   : > { %5068 = vmatmul.msk.bf16.gmra.mxu3 %vm224_vm1, %v1881_v24  ;;  %v2566_v11 = vld [vmem:[#allocation3 + $0x69] sm:$0xff] }
 0x2a7   : > { %2477 = vst.msk [vmem:[#allocation3 + $0x79] sm:$0xff] %vm2412_vm3, %v2388_v33  ;;  %v2291_v8 = vadd.f32 %v6479_v0, %v2257_v28  ;;  %v2593_v62 = vpack.c.bf16 %v2566_v11, %v2565_v14  ;;  %5086 = vmatmul.msk.bf16.gmra.mxu0 %vm224_vm1, %v2104_v32  ;;  %v1882_v32 = vpack.c.bf16 %v1865_v35, %v1864_v9 }
 0x2a8   : > { %v1749_v17 = vpop.f32.mrf.mxu2 }
 0x2a9   : > { %v1971_v48 = vpop.f32.mrf.mxu3  ;;  %v2323_v42 = vmax.f32 %v2291_v8, 0.0  ;;  %v1814_v13 = vadd.f32 %v1749_v17, %v6250_v5  ;;  %5116 = vmatmul.msk.bf16.gmra.mxu1 %vm2412_vm3, %v2593_v62  ;;  %v1592_v5 = vadd.f32 %v6234_v37, %v6256_v21  ;;  %v5447_v37 = vld [vmem:[%s7727_s3 + $0x8] sm:$0xff]  ;;  %v5446_v17 = vld [vmem:[%s7727_s3] sm:$0xff] }
 0x2aa   : > { %v5455_v21 = vld [vmem:[%s7727_s3 + $0x48] sm:$0xff]  ;;  %2853 = vmatpush.bf16.msrb.mxu2 %v5447_v37 }
 0x2ab   : > { %v2356_v39 = vmul.f32 %v6493_v6, %v2323_v42  ;;  %v2036_v2 = vadd.f32 %v1971_v48, %v1814_v13  ;;  %3071 = vmatpush.bf16.msrb.mxu3 %v5455_v21  ;;  %v5454_v48 = vld [vmem:[%s7727_s3 + $0x40] sm:$0xff]  ;;  %v3187_v21 = vld [vmem:[#allocation3 + $0x20] sm:$0xff] }
 0x2ac   : > { %v6628_v43 = vpop.f32.mrf.mxu0 }
 0x2ad   : > { %v2389_v1 = vadd.f32 %v6497_v47, %v2356_v39  ;;  %v2258_v60 = vadd.f32 %v2193_v51, %v2036_v2  ;;  %v2089_v51 = vld [vmem:[#allocation2 + $0x1a2] sm:$0xff] }
 0x2ae   : > { %v2105_v14 = vpack.c.bf16 %v2089_v51, %v2088_v56  ;;  %v2567_v42 = vld [vmem:[#allocation3 + $0x79] sm:$0xff]  ;;  %2854 = vmatpush.bf16.msrb.mxu2 %v5446_v17  ;;  %v1594_v56 = vadd.f32 %v6248_v4, %v6268_v54 }
 0x2af   : > { %2478 = vst.msk [vmem:[#allocation3 + $0x81] sm:$0xff] %vm2412_vm3, %v2389_v1  ;;  %v2292_v46 = vadd.f32 %v6479_v0, %v2258_v60  ;;  %3072 = vmatpush.bf16.msrb.mxu3 %v5454_v48 }
 0x2b0   : > { %v1751_v59 = vpop.f32.mrf.mxu2 }
 0x2b1   : > { %v1973_v58 = vpop.f32.mrf.mxu3  ;;  %v2324_v24 = vmax.f32 %v2292_v46, 0.0  ;;  %v1815_v57 = vadd.f32 %v1751_v59, %v1592_v5  ;;  %v1644_v46 = vld [vmem:[#allocation2 + $0x198] sm:$0xff] }
 0x2b2   : > { %v1866_v59 = vld [vmem:[#allocation2 + $0x199] sm:$0xff] }
 0x2b3   : > { %v2357_v33 = vmul.f32 %v6493_v6, %v2324_v24  ;;  %v2037_v28 = vadd.f32 %v1973_v58, %v1815_v57  ;;  %v1867_v58 = vld [vmem:[#allocation2 + $0x1a1] sm:$0xff] }
 0x2b4   : > { %v6645_v11 = vpop.f32.mrf.mxu0  ;;  %v1883_v37 = vpack.c.bf16 %v1867_v58, %v1866_v59 }
 0x2b5   : > { %v2390_v8 = vadd.f32 %v6497_v47, %v2357_v33  ;;  %v2259_v62 = vadd.f32 %v6604_v38, %v2037_v28  ;;  %5052 = vmatmul.msk.bf16.gmra.mxu2 %vm224_vm1, %v1660_v55 }
 0x2b6   : > { %5069 = vmatmul.msk.bf16.gmra.mxu3 %vm224_vm1, %v1882_v32  ;;  %v2568_v13 = vld [vmem:[#allocation3 + $0x81] sm:$0xff]  ;;  %v1661_v32 = vpack.c.bf16 %v1645_v27, %v1644_v46  ;;  %v2937_v46 = vld [vmem:[#allocation3 + $0xa] sm:$0xff]  ;;  %v1596_v27 = vadd.f32 %v6261_v23, %v6283_v53 }
 0x2b7   : > { %2479 = vst.msk [vmem:[#allocation3 + $0x91] sm:$0xff] %vm2412_vm3, %v2390_v8  ;;  %v2293_v39 = vadd.f32 %v6479_v0, %v2259_v62  ;;  %v2594_v2 = vpack.c.bf16 %v2568_v13, %v2567_v42  ;;  %5087 = vmatmul.msk.bf16.gmra.mxu0 %vm224_vm1, %v2105_v14  ;;  %v3186_v14 = vld [vmem:[#allocation3 + $0x18] sm:$0xff] }
 0x2b8   : > { %v1754_v38 = vpop.f32.mrf.mxu2  ;;  %v6676_v54 = vpack.c.bf16 %v3187_v21, %v3186_v14 }
 0x2b9   : > { %v1976_v44 = vpop.f32.mrf.mxu3  ;;  %v2325_v1 = vmax.f32 %v2293_v39, 0.0  ;;  %v1816_v60 = vadd.f32 %v1754_v38, %v6263_v7  ;;  %5117 = vmatmul.msk.bf16.gmra.mxu1 %vm2412_vm3, %v2594_v2 }
 0x2bb   : > { %v2358_v49 = vmul.f32 %v6493_v6, %v2325_v1  ;;  %v2038_v19 = vadd.f32 %v1976_v44, %v1816_v60 }
 0x2bc   : > { %v2205_v9 = vpop.f32.mrf.mxu0 }
 0x2bd   : > { %v2391_v35 = vadd.f32 %v6497_v47, %v2358_v49  ;;  %v2260_v5 = vadd.f32 %v6613_v18, %v2038_v19  ;;  %v2501_v19 = vld [vmem:[#allocation3] sm:$0xff] }
 0x2be   : > { %v2569_v62 = vld [vmem:[#allocation3 + $0x91] sm:$0xff] }
 0x2bf   : > { %2480 = vst.msk [vmem:[#allocation3 + $0x99] sm:$0xff] %vm2412_vm3, %v2391_v35  ;;  %v2294_v7 = vadd.f32 %v6479_v0, %v2260_v5  ;;  %v2502_v35 = vld [vmem:[#allocation3 + $0x8] sm:$0xff] }
 0x2c0   : > { %v1756_v51 = vpop.f32.mrf.mxu2  ;;  %v2936_v5 = vld [vmem:[#allocation3 + $0x2] sm:$0xff] }
 0x2c1   : > { %v1978_v24 = vpop.f32.mrf.mxu3  ;;  %v2326_v57 = vmax.f32 %v2294_v7, 0.0  ;;  %v1817_v55 = vadd.f32 %v1756_v51, %v1594_v56  ;;  %v2533_v51 = vpack.c.bf16 %v2502_v35, %v2501_v19  ;;  %v2938_v19 = vld [vmem:[#allocation3 + $0x1a] sm:$0xff]  ;;  %v2939_v35 = vld [vmem:[#allocation3 + $0x22] sm:$0xff] }
 0x2c3   : > { %v2359_v18 = vmul.f32 %v6493_v6, %v2326_v57  ;;  %v2039_v33 = vadd.f32 %v1978_v24, %v1817_v55  ;;  %v2968_v24 = vpack.c.bf16 %v2937_v46, %v2936_v5  ;;  %v3189_v57 = vld [vmem:[#allocation3 + $0x38] sm:$0xff] }
 0x2c4   : > { %v6670_v28 = vpop.f32.mrf.mxu0 }
 0x2c5   : > { %v2392_v8 = vadd.f32 %v6497_v47, %v2359_v18  ;;  %v2261_v4 = vadd.f32 %v6628_v43, %v2039_v33  ;;  %5053 = vmatmul.msk.bf16.gmra.mxu2 %vm224_vm1, %v1661_v32 }
 0x2c6   : > { %5070 = vmatmul.msk.bf16.gmra.mxu3 %vm224_vm1, %v1883_v37  ;;  %v2570_v17 = vld [vmem:[#allocation3 + $0x99] sm:$0xff]  ;;  %v3188_v37 = vld [vmem:[#allocation3 + $0x30] sm:$0xff] }
 0x2c7   : > { %2481 = vst.msk [vmem:[#allocation3 + $0xa9] sm:$0xff] %vm2412_vm3, %v2392_v8  ;;  %v2295_v48 = vadd.f32 %v6479_v0, %v2261_v4  ;;  %v2595_v42 = vpack.c.bf16 %v2570_v17, %v2569_v62  ;;  %5224 = vmatmul.msk.bf16.vlgmr.msrb.gmra.mxu0 %vm2412_vm3, %v6676_v54  ;;  %v6695_v23 = vpack.c.bf16 %v3189_v57, %v3188_v37 }
 0x2c8   : > { %v1759_v13 = vpop.f32.mrf.mxu2 }
 0x2c9   : > { %v1981_v39 = vpop.f32.mrf.mxu3  ;;  %v2327_v2 = vmax.f32 %v2295_v48, 0.0  ;;  %v1818_v43 = vadd.f32 %v1759_v13, %v6278_v61  ;;  %5118 = vmatmul.msk.bf16.gmra.mxu1 %vm2412_vm3, %v2595_v42 }
 0x2cb   : > { %v2360_v38 = vmul.f32 %v6493_v6, %v2327_v2  ;;  %v2040_v44 = vadd.f32 %v1981_v39, %v1818_v43  ;;  %v6707_v39 = vpop.f32.mrf.mxu1 }
 0x2cc   : > { %v2210_v1 = vpop.f32.mrf.mxu0 }
 0x2cd   : > { %v2393_v60 = vadd.f32 %v6497_v47, %v2360_v38  ;;  %v2262_v49 = vadd.f32 %v6645_v11, %v2040_v44  ;;  %v1598_v44 = vadd.f32 %v6276_v31, %v6295_v10 }
 0x2ce   : > { %v2571_v53 = vld [vmem:[#allocation3 + $0xa9] sm:$0xff] }
 0x2cf   : > { %2482 = vst.msk [vmem:[#allocation3 + $0xb1] sm:$0xff] %vm2412_vm3, %v2393_v60  ;;  %v2296_v61 = vadd.f32 %v6479_v0, %v2262_v49 }
 0x2d0   : > { %v1761_v59 = vpop.f32.mrf.mxu2 }
 0x2d1   : > { %v1983_v58 = vpop.f32.mrf.mxu3  ;;  %v2328_v56 = vmax.f32 %v2296_v61, 0.0  ;;  %v1819_v7 = vadd.f32 %v1761_v59, %v1596_v27  ;;  %v3191_v27 = vld [vmem:[#allocation3 + $0x50] sm:$0xff] }
 0x2d3   : > { %v2361_v11 = vmul.f32 %v6493_v6, %v2328_v56  ;;  %v2041_v55 = vadd.f32 %v1983_v58, %v1819_v7  ;;  %v2969_v58 = vpack.c.bf16 %v2939_v35, %v2938_v19  ;;  %v3190_v7 = vld [vmem:[#allocation3 + $0x48] sm:$0xff] }
 0x2d4   : > { %v2213_v32 = vpop.f32.mrf.mxu0 }
 0x2d5   : > { %v2394_v21 = vadd.f32 %v6497_v47, %v2361_v11  ;;  %v2263_v18 = vadd.f32 %v2205_v9, %v2041_v55  ;;  %5144 = vmatmul.msk.bf16.vlgmr.msrb.gmra.mxu2 %vm2412_vm3, %v2533_v51  ;;  %v5463_v9 = vld [vmem:[%s7727_s3 + $0x88] sm:$0xff]  ;;  %v6722_v51 = vpack.c.bf16 %v3191_v27, %v3190_v7 }
 0x2d6   : > { %5184 = vmatmul.msk.bf16.vlgmr.msrb.gmra.mxu3 %vm2412_vm3, %v2968_v24  ;;  %v2572_v33 = vld [vmem:[#allocation3 + $0xb1] sm:$0xff]  ;;  %3571 = vmatpush.bf16.msrb.mxu1 %v5463_v9 }
 0x2d7   : > { %2483 = vst.msk [vmem:[#allocation3 + $0xc1] sm:$0xff] %vm2412_vm3, %v2394_v21  ;;  %v2297_v14 = vadd.f32 %v6479_v0, %v2263_v18  ;;  %v2596_v8 = vpack.c.bf16 %v2572_v33, %v2571_v53  ;;  %5225 = vmatmul.msk.bf16.gmra.mxu0 %vm2412_vm3, %v6695_v23 }
 0x2d8   : > { %v1764_v4 = vpop.f32.mrf.mxu2 }
 0x2d9   : > { %v1986_v62 = vpop.f32.mrf.mxu3  ;;  %v2329_v17 = vmax.f32 %v2297_v14, 0.0  ;;  %v1820_v48 = vadd.f32 %v1764_v4, %v6290_v15  ;;  %5119 = vmatmul.msk.bf16.gmra.mxu1 %vm2412_vm3, %v2596_v8  ;;  %v1600_v4 = vadd.f32 %v6288_v16, %v6307_v34 }
 0x2db   : > { %v2362_v42 = vmul.f32 %v6493_v6, %v2329_v17  ;;  %v2042_v13 = vadd.f32 %v1986_v62, %v1820_v48  ;;  %v2940_v48 = vld [vmem:[#allocation3 + $0x32] sm:$0xff] }
 0x2dc   : > { %v2215_v2 = vpop.f32.mrf.mxu0 }
 0x2dd   : > { %v2395_v43 = vadd.f32 %v6497_v47, %v2362_v42  ;;  %v2264_v38 = vadd.f32 %v6670_v28, %v2042_v13  ;;  %v2941_v42 = vld [vmem:[#allocation3 + $0x3a] sm:$0xff] }
 0x2de   : > { %v2573_v24 = vld [vmem:[#allocation3 + $0xc1] sm:$0xff] }
 0x2df   : > { %2484 = vst.msk [vmem:[#allocation3 + $0xc9] sm:$0xff] %vm2412_vm3, %v2395_v43  ;;  %v2298_v15 = vadd.f32 %v6479_v0, %v2264_v38  ;;  %v3193_v38 = vld [vmem:[#allocation3 + $0x68] sm:$0xff] }
 0x2e0   : > { %v1766_v60 = vpop.f32.mrf.mxu2  ;;  %v6716_v56 = vpop.f32.mrf.mxu1 }
 0x2e1   : > { %v1988_v49 = vpop.f32.mrf.mxu3  ;;  %v2330_v5 = vmax.f32 %v2298_v15, 0.0  ;;  %v1821_v46 = vadd.f32 %v1766_v60, %v1598_v44 }
 0x2e3   : > { %v2363_v61 = vmul.f32 %v6493_v6, %v2330_v5  ;;  %v2043_v59 = vadd.f32 %v1988_v49, %v1821_v46  ;;  %v3192_v49 = vld [vmem:[#allocation3 + $0x60] sm:$0xff] }
 0x2e4   : > { %v2218_v28 = vpop.f32.mrf.mxu0  ;;  %v6743_v34 = vpack.c.bf16 %v3193_v38, %v3192_v49 }
 0x2e5   : > { %v2396_v31 = vadd.f32 %v6497_v47, %v2363_v61  ;;  %v2265_v10 = vadd.f32 %v2210_v1, %v2043_v59  ;;  %5145 = vmatmul.msk.bf16.gmra.mxu2 %vm2412_vm3, %v6676_v54 }
 0x2e6   : > { %5185 = vmatmul.msk.bf16.gmra.mxu3 %vm2412_vm3, %v2969_v58  ;;  %v2574_v57 = vld [vmem:[#allocation3 + $0xc9] sm:$0xff] }
 0x2e7   : > { %2485 = vst.msk [vmem:[#allocation3 + $0xd9] sm:$0xff] %vm2412_vm3, %v2396_v31  ;;  %v2299_v11 = vadd.f32 %v6479_v0, %v2265_v10  ;;  %v2597_v55 = vpack.c.bf16 %v2574_v57, %v2573_v24  ;;  %5226 = vmatmul.msk.bf16.gmra.mxu0 %vm2412_vm3, %v6722_v51 }
 0x2e8   : > { %v1769_v37 = vpop.f32.mrf.mxu2  ;;  %v6732_v9 = vpop.f32.mrf.mxu1 }
 0x2e9   : > { %v1991_v21 = vpop.f32.mrf.mxu3  ;;  %v2331_v1 = vmax.f32 %v2299_v11, 0.0  ;;  %v1822_v18 = vadd.f32 %v1769_v37, %v6300_v50  ;;  %5120 = vmatmul.msk.bf16.gmra.mxu1 %vm2412_vm3, %v2597_v55  ;;  %v1602_v55 = vadd.f32 %v6303_v52, %v6317_v3 }
 0x2eb   : > { %v2364_v54 = vmul.f32 %v6493_v6, %v2331_v1  ;;  %v2044_v53 = vadd.f32 %v1991_v21, %v1822_v18  ;;  %v2942_v1 = vld [vmem:[#allocation3 + $0x4a] sm:$0xff]  ;;  %v2943_v18 = vld [vmem:[#allocation3 + $0x52] sm:$0xff] }
 0x2ec   : > { %v2220_v33 = vpop.f32.mrf.mxu0 }
 0x2ed   : > { %v2397_v14 = vadd.f32 %v6497_v47, %v2364_v54  ;;  %v2266_v8 = vadd.f32 %v2213_v32, %v2044_v53  ;;  %v2970_v32 = vpack.c.bf16 %v2941_v42, %v2940_v48 }
 0x2ee   : > { %v2575_v5 = vld [vmem:[#allocation3 + $0xd9] sm:$0xff] }
 0x2ef   : > { %2486 = vst.msk [vmem:[#allocation3 + $0xe1] sm:$0xff] %vm2412_vm3, %v2397_v14  ;;  %v2300_v62 = vadd.f32 %v6479_v0, %v2266_v8  ;;  %v3195_v14 = vld [vmem:[#allocation3 + $0x80] sm:$0xff] }
 0x2f0   : > { %v1771_v17 = vpop.f32.mrf.mxu2 }
 0x2f1   : > { %v1993_v50 = vpop.f32.mrf.mxu3  ;;  %v2332_v13 = vmax.f32 %v2300_v62, 0.0  ;;  %v1823_v43 = vadd.f32 %v1771_v17, %v1600_v4  ;;  %v3194_v17 = vld [vmem:[#allocation3 + $0x78] sm:$0xff] }
 0x2f3   : > { %v2365_v44 = vmul.f32 %v6493_v6, %v2332_v13  ;;  %v2045_v15 = vadd.f32 %v1993_v50, %v1823_v43  ;;  %v6768_v50 = vpack.c.bf16 %v3195_v14, %v3194_v17 }
 0x2f4   : > { %v2223_v60 = vpop.f32.mrf.mxu0 }
 0x2f5   : > { %v2398_v19 = vadd.f32 %v6497_v47, %v2365_v44  ;;  %v2267_v16 = vadd.f32 %v2215_v2, %v2045_v15  ;;  %5146 = vmatmul.msk.bf16.gmra.mxu2 %vm2412_vm3, %v6695_v23 }
 0x2f6   : > { %5186 = vmatmul.msk.bf16.gmra.mxu3 %vm2412_vm3, %v2970_v32  ;;  %v6745_v35 = vpop.f32.mrf.mxu1  ;;  %v2576_v46 = vld [vmem:[#allocation3 + $0xe1] sm:$0xff] }
 0x2f7   : > { %2487 = vst.msk [vmem:[#allocation3 + $0xf1] sm:$0xff] %vm2412_vm3, %v2398_v19  ;;  %v2301_v27 = vadd.f32 %v6479_v0, %v2267_v16  ;;  %v2598_v61 = vpack.c.bf16 %v2576_v46, %v2575_v5  ;;  %5227 = vmatmul.msk.bf16.gmra.mxu0 %vm2412_vm3, %v6743_v34 }
 0x2f8   : > { %v1774_v2 = vpop.f32.mrf.mxu2 }
 0x2f9   : > { %v1996_v59 = vpop.f32.mrf.mxu3  ;;  %v2333_v58 = vmax.f32 %v2301_v27, 0.0  ;;  %v1824_v23 = vadd.f32 %v1774_v2, %v6312_v29  ;;  %5121 = vmatmul.msk.bf16.gmra.mxu1 %vm2412_vm3, %v2598_v61  ;;  %v1604_v27 = vadd.f32 %v6319_v40, %v6332_v30 }
 0x2fb   : > { %v2366_v7 = vmul.f32 %v6493_v6, %v2333_v58  ;;  %v2046_v31 = vadd.f32 %v1996_v59, %v1824_v23  ;;  %v2944_v59 = vld [vmem:[#allocation3 + $0x62] sm:$0xff]  ;;  %v2945_v58 = vld [vmem:[#allocation3 + $0x6a] sm:$0xff] }
 0x2fc   : > { %v2225_v10 = vpop.f32.mrf.mxu0 }
 0x2fd   : > { %v2399_v24 = vadd.f32 %v6497_v47, %v2366_v7  ;;  %v2268_v57 = vadd.f32 %v2218_v28, %v2046_v31  ;;  %v2971_v28 = vpack.c.bf16 %v2943_v18, %v2942_v1  ;;  %v3197_v31 = vld [vmem:[#allocation3 + $0x98] sm:$0xff] }
 0x2fe   : > { %v6755_v11 = vpop.f32.mrf.mxu1  ;;  %v2577_v42 = vld [vmem:[#allocation3 + $0xf1] sm:$0xff] }
 0x2ff   : > { %2488 = vst.msk [vmem:[#allocation3 + $0xf9] sm:$0xff] %vm2412_vm3, %v2399_v24  ;;  %v2302_v37 = vadd.f32 %v6479_v0, %v2268_v57 }
 0x300   : > { %v1776_v21 = vpop.f32.mrf.mxu2 }
 0x301   : > { %v1998_v29 = vpop.f32.mrf.mxu3  ;;  %v2334_v54 = vmax.f32 %v2302_v37, 0.0  ;;  %v1825_v53 = vadd.f32 %v1776_v21, %v1602_v55  ;;  %v3196_v37 = vld [vmem:[#allocation3 + $0x90] sm:$0xff] }
 0x302   : > { %v6793_v21 = vpack.c.bf16 %v3197_v31, %v3196_v37 }
 0x303   : > { %v2367_v8 = vmul.f32 %v6493_v6, %v2334_v54  ;;  %v2047_v4 = vadd.f32 %v1998_v29, %v1825_v53 }
 0x304   : > { %v6762_v62 = vpop.f32.mrf.mxu0 }
 0x305   : > { %v2400_v52 = vadd.f32 %v6497_v47, %v2367_v8  ;;  %v2269_v3 = vadd.f32 %v2220_v33, %v2047_v4  ;;  %5147 = vmatmul.msk.bf16.gmra.mxu2 %vm2412_vm3, %v6722_v51 }
 0x306   : > { %5187 = vmatmul.msk.bf16.gmra.mxu3 %vm2412_vm3, %v2971_v28  ;;  %v6770_v48 = vpop.f32.mrf.mxu1  ;;  %v2578_v13 = vld [vmem:[#allocation3 + $0xf9] sm:$0xff] }
 0x307   : > { %2489 = vst.msk [vmem:[#allocation3 + $0x109] sm:$0xff] %vm2412_vm3, %v2400_v52  ;;  %v2303_v43 = vadd.f32 %v6479_v0, %v2269_v3  ;;  %v2599_v38 = vpack.c.bf16 %v2578_v13, %v2577_v42  ;;  %5228 = vmatmul.msk.bf16.gmra.mxu0 %vm2412_vm3, %v6768_v50 }
 0x308   : > { %v1779_v33 = vpop.f32.mrf.mxu2 }
 0x309   : > { %v2001_v44 = vpop.f32.mrf.mxu3  ;;  %v2335_v15 = vmax.f32 %v2303_v43, 0.0  ;;  %v1826_v51 = vadd.f32 %v1779_v33, %v6327_v41  ;;  %5122 = vmatmul.msk.bf16.gmra.mxu1 %vm2412_vm3, %v2599_v38  ;;  %v1606_v43 = vadd.f32 %v6337_v36, %v6344_v22 }
 0x30b   : > { %v2368_v32 = vmul.f32 %v6493_v6, %v2335_v15  ;;  %v2048_v49 = vadd.f32 %v2001_v44, %v1826_v51  ;;  %v2946_v44 = vld [vmem:[#allocation3 + $0x7a] sm:$0xff]  ;;  %v2947_v15 = vld [vmem:[#allocation3 + $0x82] sm:$0xff] }
 0x30c   : > { %v2230_v19 = vpop.f32.mrf.mxu0 }
 0x30d   : > { %v2401_v16 = vadd.f32 %v6497_v47, %v2368_v32  ;;  %v2270_v5 = vadd.f32 %v2223_v60, %v2048_v49  ;;  %v2972_v60 = vpack.c.bf16 %v2945_v58, %v2944_v59  ;;  %v3199_v49 = vld [vmem:[#allocation3 + $0xb0] sm:$0xff] }
 0x30e   : > { %v6780_v46 = vpop.f32.mrf.mxu1  ;;  %v2579_v1 = vld [vmem:[#allocation3 + $0x109] sm:$0xff] }
 0x30f   : > { %2490 = vst.msk [vmem:[#allocation3 + $0x111] sm:$0xff] %vm2412_vm3, %v2401_v16  ;;  %v2304_v61 = vadd.f32 %v6479_v0, %v2270_v5 }
 0x310   : > { %v1781_v2 = vpop.f32.mrf.mxu2 }
 0x311   : > { %v2003_v41 = vpop.f32.mrf.mxu3  ;;  %v2336_v23 = vmax.f32 %v2304_v61, 0.0  ;;  %v1827_v7 = vadd.f32 %v1781_v2, %v1604_v27  ;;  %v3198_v61 = vld [vmem:[#allocation3 + $0xa8] sm:$0xff] }
 0x312   : > { %v6820_v22 = vpack.c.bf16 %v3199_v49, %v3198_v61 }
 0x313   : > { %v2369_v24 = vmul.f32 %v6493_v6, %v2336_v23  ;;  %v2049_v57 = vadd.f32 %v2003_v41, %v1827_v7 }
 0x314   : > { %v6787_v55 = vpop.f32.mrf.mxu0 }
 0x315   : > { %v2402_v40 = vadd.f32 %v6497_v47, %v2369_v24  ;;  %v2271_v30 = vadd.f32 %v2225_v10, %v2049_v57  ;;  %5148 = vmatmul.msk.bf16.gmra.mxu2 %vm2412_vm3, %v6743_v34  ;;  %v5462_v34 = vld [vmem:[%s7727_s3 + $0x80] sm:$0xff] }
 0x316   : > { %5188 = vmatmul.msk.bf16.gmra.mxu3 %vm2412_vm3, %v2972_v60  ;;  %v6795_v29 = vpop.f32.mrf.mxu1  ;;  %v2580_v18 = vld [vmem:[#allocation3 + $0x111] sm:$0xff]  ;;  %3572 = vmatpush.bf16.msrb.mxu1 %v5462_v34 }
 0x317   : > { %2491 = vst.msk [vmem:[#allocation3 + $0x121] sm:$0xff] %vm2412_vm3, %v2402_v40  ;;  %v2305_v54 = vadd.f32 %v6479_v0, %v2271_v30  ;;  %v2600_v53 = vpack.c.bf16 %v2580_v18, %v2579_v1  ;;  %5229 = vmatmul.msk.bf16.gmra.mxu0 %vm2412_vm3, %v6793_v21  ;;  %v1608_v18 = vadd.f32 %v6349_v25, %v6356_v63  ;;  %v2948_v34 = vld [vmem:[#allocation3 + $0x92] sm:$0xff] }
 0x318   : > { %v1784_v10 = vpop.f32.mrf.mxu2 }
 0x319   : > { %v2006_v14 = vpop.f32.mrf.mxu3  ;;  %v2337_v8 = vmax.f32 %v2305_v54, 0.0  ;;  %v1828_v4 = vadd.f32 %v1784_v10, %v6339_v26  ;;  %5123 = vmatmul.msk.bf16.gmra.mxu1 %vm2412_vm3, %v2600_v53  ;;  %v2949_v10 = vld [vmem:[#allocation3 + $0x9a] sm:$0xff] }
 0x31b   : > { %v2370_v28 = vmul.f32 %v6493_v6, %v2337_v8  ;;  %v2050_v17 = vadd.f32 %v2006_v14, %v1828_v4  ;;  %v3201_v4 = vld [vmem:[#allocation3 + $0xc8] sm:$0xff] }
 0x31c   : > { %v2235_v52 = vpop.f32.mrf.mxu0 }
 0x31d   : > { %v2403_v3 = vadd.f32 %v6497_v47, %v2370_v28  ;;  %v2272_v42 = vadd.f32 %v6762_v62, %v2050_v17  ;;  %v2973_v62 = vpack.c.bf16 %v2947_v15, %v2946_v44 }
 0x31e   : > { %v6809_v13 = vpop.f32.mrf.mxu1  ;;  %v2581_v59 = vld [vmem:[#allocation3 + $0x121] sm:$0xff] }
 0x31f   : > { %2492 = vst.msk [vmem:[#allocation3 + $0x129] sm:$0xff] %vm2412_vm3, %v2403_v3  ;;  %v2306_v26 = vadd.f32 %v6479_v0, %v2272_v42  ;;  %v3200_v42 = vld [vmem:[#allocation3 + $0xc0] sm:$0xff] }
 0x320   : > { %v1786_v38 = vpop.f32.mrf.mxu2 }
 0x321   : > { %v2008_v33 = vpop.f32.mrf.mxu3  ;;  %v2338_v51 = vmax.f32 %v2306_v26, 0.0  ;;  %v1829_v32 = vadd.f32 %v1786_v38, %v1606_v43  ;;  %v6846_v43 = vpack.c.bf16 %v3201_v4, %v3200_v42 }
 0x323   : > { %v2371_v16 = vmul.f32 %v6493_v6, %v2338_v51  ;;  %v2051_v5 = vadd.f32 %v2008_v33, %v1829_v32 }
 0x324   : > { %v2238_v27 = vpop.f32.mrf.mxu0 }
 0x325   : > { %v2404_v2 = vadd.f32 %v6497_v47, %v2371_v16  ;;  %v2273_v36 = vadd.f32 %v2230_v19, %v2051_v5  ;;  %5149 = vmatmul.msk.bf16.gmra.mxu2 %vm2412_vm3, %v6768_v50 }
 0x326   : > { %5189 = vmatmul.msk.bf16.gmra.mxu3 %vm2412_vm3, %v2973_v62  ;;  %v6822_v41 = vpop.f32.mrf.mxu1  ;;  %v2582_v58 = vld [vmem:[#allocation3 + $0x129] sm:$0xff] }
 0x327   : > { %2493 = vst.msk [vmem:[#allocation3 + $0x139] sm:$0xff] %vm2412_vm3, %v2404_v2  ;;  %v2307_v23 = vadd.f32 %v6479_v0, %v2273_v36  ;;  %v2601_v7 = vpack.c.bf16 %v2582_v58, %v2581_v59  ;;  %5230 = vmatmul.msk.bf16.gmra.mxu0 %vm2412_vm3, %v6820_v22  ;;  %v7771_v36 = vld [vmem:[#allocation9_spill] sm:$0xff] }
 0x328   : > { %v1789_v19 = vpop.f32.mrf.mxu2  ;;  %v1610_v59 = vadd.f32 %v7771_v36, %v6400_v20  ;;  %v3203_v20 = vld [vmem:[#allocation3 + $0xe0] sm:$0xff] }
 0x329   : > { %v2011_v31 = vpop.f32.mrf.mxu3  ;;  %v2339_v24 = vmax.f32 %v2307_v23, 0.0  ;;  %v1830_v50 = vadd.f32 %v1789_v19, %v6351_v12  ;;  %5124 = vmatmul.msk.bf16.gmra.mxu1 %vm2412_vm3, %v2601_v7  ;;  %v5473_v23 = vld [vmem:[%s7727_s3 + $0xd8] sm:$0xff] }
 0x32a   : > { %4070 = vmatpush.bf16.msra.mxu3 %v5473_v23 }
 0x32b   : > { %v2372_v57 = vmul.f32 %v6493_v6, %v2339_v24  ;;  %v2052_v60 = vadd.f32 %v2011_v31, %v1830_v50  ;;  %v2951_v31 = vld [vmem:[#allocation3 + $0xb2] sm:$0xff] }
 0x32c   : > { %v2240_v37 = vpop.f32.mrf.mxu0 }
 0x32d   : > { %v2405_v40 = vadd.f32 %v6497_v47, %v2372_v57  ;;  %v2274_v30 = vadd.f32 %v6787_v55, %v2052_v60  ;;  %v2974_v55 = vpack.c.bf16 %v2949_v10, %v2948_v34 }
 0x32e   : > { %v6833_v1 = vpop.f32.mrf.mxu1  ;;  %v2583_v38 = vld [vmem:[#allocation3 + $0x139] sm:$0xff] }
 0x32f   : > { %2494 = vst.msk [vmem:[#allocation3 + $0x141] sm:$0xff] %vm2412_vm3, %v2405_v40  ;;  %v2308_v54 = vadd.f32 %v6479_v0, %v2274_v30 }
 0x330   : > { %v1791_v12 = vpop.f32.mrf.mxu2 }
 0x331   : > { %v2013_v53 = vpop.f32.mrf.mxu3  ;;  %v2340_v14 = vmax.f32 %v2308_v54, 0.0  ;;  %v1831_v8 = vadd.f32 %v1791_v12, %v1608_v18  ;;  %v3202_v18 = vld [vmem:[#allocation3 + $0xd8] sm:$0xff] }
 0x333   : > { %v2373_v28 = vmul.f32 %v6493_v6, %v2340_v14  ;;  %v2053_v17 = vadd.f32 %v2013_v53, %v1831_v8  ;;  %v6882_v53 = vpack.c.bf16 %v3203_v20, %v3202_v18  ;;  %v5477_v8 = vld [vmem:[%s7727_s3 + $0xf8] sm:$0xff] }
 0x334   : > { %v6840_v3 = vpop.f32.mrf.mxu0  ;;  %4320 = vmatpush.bf16.msra.mxu0 %v5477_v8 }
 0x335   : > { %v2406_v25 = vadd.f32 %v6497_v47, %v2373_v28  ;;  %v2275_v63 = vadd.f32 %v2235_v52, %v2053_v17  ;;  %5150 = vmatmul.msk.bf16.gmra.mxu2 %vm2412_vm3, %v6793_v21 }
 0x336   : > { %5190 = vmatmul.msk.bf16.gmra.mxu3 %vm2412_vm3, %v2974_v55  ;;  %v6848_v26 = vpop.f32.mrf.mxu1  ;;  %v2584_v33 = vld [vmem:[#allocation3 + $0x141] sm:$0xff]  ;;  %v7772_v55 = vld [vmem:[#allocation7_spill] sm:$0xff] }
 0x337   : > { %2495 = vst.msk [vmem:[#allocation3 + $0x151] sm:$0xff] %vm2412_vm3, %v2406_v25  ;;  %v2309_v44 = vadd.f32 %v6479_v0, %v2275_v63  ;;  %v2602_v15 = vpack.c.bf16 %v2584_v33, %v2583_v38  ;;  %5231 = vmatmul.msk.bf16.gmra.mxu0 %vm2412_vm3, %v6846_v43  ;;  %v5481_v38 = vld [vmem:[%s7727_s3 + $0x118] sm:$0xff] }
 0x338   : > { %v1794_v52 = vpop.f32.mrf.mxu2  ;;  %4570 = vmatpush.bf16.msra.mxu1 %v5481_v38 }
 0x339   : > { %v2016_v51 = vpop.f32.mrf.mxu3  ;;  %v2341_v32 = vmax.f32 %v2309_v44, 0.0  ;;  %v1832_v21 = vadd.f32 %v1794_v52, %v6379_v45  ;;  %5125 = vmatmul.msk.bf16.gmra.mxu1 %vm2412_vm3, %v2602_v15  ;;  %v5469_v45 = vld [vmem:[%s7727_s3 + $0xb8] sm:$0xff] }
 0x33a   : > { %3819 = vmatpush.bf16.msra.mxu2 %v5469_v45 }
 0x33b   : > { %v2374_v49 = vmul.f32 %v6493_v6, %v2341_v32  ;;  %v2054_v16 = vadd.f32 %v2016_v51, %v1832_v21  ;;  %v7773_v51 = vld [vmem:[#allocation8_spill] sm:$0xff] }
 0x33c   : > { %v6857_v5 = vpop.f32.mrf.mxu0  ;;  %v1612_v32 = vadd.f32 %v6707_v39, %v7773_v51  ;;  %v3436_v51 = vld [vmem:[#allocation3 + $0x19] sm:$0xff] }
 0x33d   : > { %v2407_v62 = vadd.f32 %v6497_v47, %v2374_v49  ;;  %v2276_v61 = vadd.f32 %v2238_v27, %v2054_v16  ;;  %v2950_v27 = vld [vmem:[#allocation3 + $0xaa] sm:$0xff] }
 0x33e   : > { %v6860_v2 = vpop.f32.mrf.mxu1  ;;  %v6873_v40 = vpack.c.bf16 %v2951_v31, %v2950_v27  ;;  %v2585_v10 = vld [vmem:[#allocation3 + $0x151] sm:$0xff] }
 0x33f   : > { %2496 = vst.msk [vmem:[#allocation3 + $0x159] sm:$0xff] %vm2412_vm3, %v2407_v62  ;;  %v2310_v58 = vadd.f32 %v6479_v0, %v2276_v61  ;;  %v2952_v62 = vld [vmem:[#allocation3 + $0xc2] sm:$0xff]  ;;  %v2953_v61 = vld [vmem:[#allocation3 + $0xca] sm:$0xff] }
 0x340   : > { %v1796_v7 = vpop.f32.mrf.mxu2  ;;  %v6911_v23 = vpack.c.bf16 %v2953_v61, %v2952_v62 }
 0x341   : > { %v2018_v19 = vpop.f32.mrf.mxu3  ;;  %v2342_v24 = vmax.f32 %v2310_v58, 0.0  ;;  %v1833_v50 = vadd.f32 %v1796_v7, %v1610_v59  ;;  %v3205_v58 = vld [vmem:[#allocation3 + $0xf8] sm:$0xff] }
 0x343   : > { %v2375_v57 = vmul.f32 %v6493_v6, %v2342_v24  ;;  %v2055_v60 = vadd.f32 %v2018_v19, %v1833_v50  ;;  %v3204_v19 = vld [vmem:[#allocation3 + $0xf0] sm:$0xff] }
 0x344   : > { %v6875_v30 = vpop.f32.mrf.mxu0  ;;  %v3227_v31 = vpack.c.bf16 %v3205_v58, %v3204_v19  ;;  %v2957_v58 = vld [vmem:[#allocation3 + $0xfa] sm:$0xff] }
 0x345   : > { %v2408_v54 = vadd.f32 %v6497_v47, %v2375_v57  ;;  %v2277_v12 = vadd.f32 %v2240_v37, %v2055_v60  ;;  %5151 = vmatmul.msk.bf16.gmra.mxu2 %vm2412_vm3, %v6820_v22 }
 0x346   : > { %5191 = vmatmul.msk.bf16.gmra.mxu3 %vm2412_vm3, %v6873_v40  ;;  %v6884_v34 = vpop.f32.mrf.mxu1  ;;  %v2586_v14 = vld [vmem:[#allocation3 + $0x159] sm:$0xff] }
 0x347   : > { %2497 = vst.msk [vmem:[#allocation3 + $0x169] sm:$0xff] %vm2412_vm3, %v2408_v54  ;;  %v2311_v37 = vadd.f32 %v6479_v0, %v2277_v12  ;;  %v6891_v4 = vpack.c.bf16 %v2586_v14, %v2585_v10  ;;  %5232 = vmatmul.msk.bf16.gmra.mxu0 %vm2412_vm3, %v6882_v53 }
 0x348   : > { %v1799_v22 = vpop.f32.mrf.mxu2 }
 0x349   : > { %v2021_v28 = vpop.f32.mrf.mxu3  ;;  %v2343_v17 = vmax.f32 %v2311_v37, 0.0  ;;  %v1834_v42 = vadd.f32 %v1799_v22, %v7772_v55  ;;  %5126 = vmatmul.msk.bf16.gmra.mxu1 %vm2412_vm3, %v6891_v4 }
 0x34b   : > { %v2376_v25 = vmul.f32 %v6493_v6, %v2343_v17  ;;  %v2056_v63 = vadd.f32 %v2021_v28, %v1834_v42  ;;  %v2954_v17 = vld [vmem:[#allocation3 + $0xda] sm:$0xff]  ;;  %v3207_v42 = vld [vmem:[#allocation3 + $0x110] sm:$0xff] }
 0x34c   : > { %v3326_v33 = vpop.f32.mrf.mxu0 }
 0x34d   : > { %v2409_v44 = vadd.f32 %v6497_v47, %v2376_v25  ;;  %v2278_v15 = vadd.f32 %v6840_v3, %v2056_v63  ;;  %v3437_v63 = vld [vmem:[#allocation3 + $0x21] sm:$0xff] }
 0x34e   : > { %v6904_v52 = vpop.f32.mrf.mxu1  ;;  %v2587_v50 = vld [vmem:[#allocation3 + $0x169] sm:$0xff] }
 0x34f   : > { %2498 = vst.msk [vmem:[#allocation3 + $0x171] sm:$0xff] %vm2412_vm3, %v2409_v44  ;;  %v2312_v21 = vadd.f32 %v6479_v0, %v2278_v15 }
 0x350   : > { %v1801_v49 = vpop.f32.mrf.mxu2 }
 0x351   : > { %v2023_v16 = vpop.f32.mrf.mxu3  ;;  %v2344_v36 = vmax.f32 %v2312_v21, 0.0  ;;  %v1835_v59 = vadd.f32 %v1801_v49, %v1612_v32 }
 0x353   : > { %v2377_v45 = vmul.f32 %v6493_v6, %v2344_v36  ;;  %v2057_v3 = vadd.f32 %v2023_v16, %v1835_v59  ;;  %v2956_v59 = vld [vmem:[#allocation3 + $0xf2] sm:$0xff] }
 0x354   : > { %v3329_v7 = vpop.f32.mrf.mxu0 }
 0x355   : > { %v2410_v39 = vadd.f32 %v6497_v47, %v2377_v45  ;;  %v2279_v27 = vadd.f32 %v6857_v5, %v2057_v3  ;;  %5152 = vmatmul.msk.bf16.gmra.mxu2 %vm2412_vm3, %v6846_v43  ;;  %v3209_v3 = vld [vmem:[#allocation3 + $0x128] sm:$0xff] }
 0x356   : > { %5192 = vmatmul.msk.bf16.gmra.mxu3 %vm2412_vm3, %v6911_v23  ;;  %v6919_v24 = vpop.f32.mrf.mxu1  ;;  %v2588_v20 = vld [vmem:[#allocation3 + $0x171] sm:$0xff] }
 0x357   : > { %2499 = vst.msk [vmem:[#allocation3 + $0x181] sm:$0xff] %vm2412_vm3, %v2410_v39  ;;  %v2313_v57 = vadd.f32 %v6479_v0, %v2279_v27  ;;  %v6923_v60 = vpack.c.bf16 %v2588_v20, %v2587_v50  ;;  %5233 = vmatmul.msk.bf16.gmra.mxu0 %vm2412_vm3, %v3227_v31  ;;  %v6956_v39 = vpack.c.bf16 %v2957_v58, %v2956_v59  ;;  %v3439_v27 = vld [vmem:[#allocation3 + $0x39] sm:$0xff] }
 0x358   : > { %v2856_v5 = vpop.f32.mrf.mxu2  ;;  %v3208_v50 = vld [vmem:[#allocation3 + $0x120] sm:$0xff] }
 0x359   : > { %v3074_v18 = vpop.f32.mrf.mxu3  ;;  %v2345_v54 = vmax.f32 %v2313_v57, 0.0  ;;  %v2857_v43 = vadd.f32 %v2856_v5, %v6716_v56  ;;  %5127 = vmatmul.msk.bf16.gmra.mxu1 %vm2412_vm3, %v6923_v60  ;;  %v2955_v56 = vld [vmem:[#allocation3 + $0xe2] sm:$0xff]  ;;  %v3438_v5 = vld [vmem:[#allocation3 + $0x31] sm:$0xff] }
 0x35a   : > { %v5480_v59 = vld [vmem:[%s7727_s3 + $0x110] sm:$0xff] }
 0x35b   : > { %v2378_v12 = vmul.f32 %v6493_v6, %v2345_v54  ;;  %v3154_v10 = vadd.f32 %v3074_v18, %v2857_v43  ;;  %v6938_v6 = vpack.c.bf16 %v2955_v56, %v2954_v17  ;;  %v6965_v18 = vpack.c.bf16 %v3439_v27, %v3438_v5  ;;  %v2958_v17 = vld [vmem:[#allocation3 + $0x10a] sm:$0xff]  ;;  %v2959_v56 = vld [vmem:[#allocation3 + $0x112] sm:$0xff]  ;;  %4571 = vmatpush.bf16.msra.mxu1 %v5480_v59 }
 0x35c   : > { %v3331_v14 = vpop.f32.mrf.mxu0  ;;  %v2961_v5 = vld [vmem:[#allocation3 + $0x12a] sm:$0xff] }
 0x35d   : > { %v2411_v8 = vadd.f32 %v6497_v47, %v2378_v12  ;;  %v6932_v0 = vadd.f32 %v6875_v30, %v3154_v10  ;;  %v3206_v47 = vld [vmem:[#allocation3 + $0x108] sm:$0xff]  ;;  %v5468_v12 = vld [vmem:[%s7727_s3 + $0xb0] sm:$0xff] }
 0x35e   : > { %v6934_v37 = vpop.f32.mrf.mxu1  ;;  %v3228_v30 = vpack.c.bf16 %v3207_v42, %v3206_v47  ;;  %3820 = vmatpush.bf16.msra.mxu2 %v5468_v12  ;;  %v3211_v42 = vld [vmem:[#allocation3 + $0x140] sm:$0xff]  ;;  %v3441_v47 = vld [vmem:[#allocation3 + $0x51] sm:$0xff] }
 0x35f   : > { %2500 = vst.msk [vmem:[#allocation3 + $0x189] sm:$0xff] %vm2412_vm3, %v2411_v8 }
 0x360   : > { %v2858_v22 = vpop.f32.mrf.mxu2 }
 0x361   : > { %v3076_v28 = vpop.f32.mrf.mxu3  ;;  %v2859_v55 = vadd.f32 %v2858_v22, %v6732_v9  ;;  %v3468_v9 = vpack.c.bf16 %v3437_v63, %v3436_v51  ;;  %v5472_v22 = vld [vmem:[%s7727_s3 + $0xd0] sm:$0xff]  ;;  %v6982_v63 = vpack.c.bf16 %v2959_v56, %v2958_v17  ;;  %v3210_v51 = vld [vmem:[#allocation3 + $0x138] sm:$0xff] }
 0x362   : > { %4071 = vmatpush.bf16.msra.mxu3 %v5472_v22  ;;  %v3212_v22 = vld [vmem:[#allocation3 + $0x150] sm:$0xff]  ;;  %v3442_v17 = vld [vmem:[#allocation3 + $0x61] sm:$0xff] }
 0x363   : > { %v3155_v25 = vadd.f32 %v3076_v28, %v2859_v55 }
 0x364   : > { %v3334_v38 = vpop.f32.mrf.mxu0 }
 0x365   : > { %5153 = vmatmul.msk.bf16.gmra.mxu2 %vm2412_vm3, %v6882_v53  ;;  %v6944_v44 = vadd.f32 %v3326_v33, %v3155_v25 }
 0x366   : > { %5193 = vmatmul.msk.bf16.gmra.mxu3 %vm2412_vm3, %v6938_v6  ;;  %v6946_v15 = vpop.f32.mrf.mxu1 }
 0x367   : > { %5234 = vmatmul.msk.bf16.gmra.mxu0 %vm2412_vm3, %v3228_v30 }
 0x368   : > { %v2861_v32 = vpop.f32.mrf.mxu2 }
 0x369   : > { %v3079_v21 = vpop.f32.mrf.mxu3  ;;  %v2862_v49 = vadd.f32 %v2861_v32, %v6745_v35  ;;  %5264 = vmatmul.msk.bf16.vlgmr.msrb.gmra.mxu1 %vm2412_vm3, %v3468_v9  ;;  %v3230_v9 = vpack.c.bf16 %v3211_v42, %v3210_v51 }
 0x36b   : > { %v3156_v16 = vadd.f32 %v3079_v21, %v2862_v49  ;;  %v3440_v49 = vld [vmem:[#allocation3 + $0x49] sm:$0xff] }
 0x36c   : > { %v3336_v53 = vpop.f32.mrf.mxu0 }
 0x36d   : > { %v6951_v62 = vadd.f32 %v3329_v7, %v3156_v16  ;;  %v3229_v7 = vpack.c.bf16 %v3209_v3, %v3208_v50  ;;  %v6994_v16 = vpack.c.bf16 %v3441_v47, %v3440_v49  ;;  %v2960_v50 = vld [vmem:[#allocation3 + $0x122] sm:$0xff] }
 0x36e   : > { %v6953_v61 = vpop.f32.mrf.mxu1 }
 0x370   : > { %v2863_v33 = vpop.f32.mrf.mxu2 }
 0x371   : > { %v3081_v36 = vpop.f32.mrf.mxu3  ;;  %v2864_v45 = vadd.f32 %v2863_v33, %v6755_v11 }
 0x373   : > { %v3157_v19 = vadd.f32 %v3081_v36, %v2864_v45 }
 0x374   : > { %v3339_v35 = vpop.f32.mrf.mxu0 }
 0x375   : > { %5154 = vmatmul.msk.bf16.gmra.mxu2 %vm2412_vm3, %v3227_v31  ;;  %v6961_v20 = vadd.f32 %v3331_v14, %v3157_v19 }
 0x376   : > { %5194 = vmatmul.msk.bf16.gmra.mxu3 %vm2412_vm3, %v6956_v39  ;;  %v6963_v57 = vpop.f32.mrf.mxu1 }
 0x377   : > { %5235 = vmatmul.msk.bf16.gmra.mxu0 %vm2412_vm3, %v3229_v7 }
 0x378   : > { %v2866_v11 = vpop.f32.mrf.mxu2 }
 0x379   : > { %v3084_v54 = vpop.f32.mrf.mxu3  ;;  %v2867_v43 = vadd.f32 %v2866_v11, %v6770_v48  ;;  %5265 = vmatmul.msk.bf16.gmra.mxu1 %vm2412_vm3, %v6965_v18  ;;  %v3213_v11 = vld [vmem:[#allocation3 + $0x158] sm:$0xff] }
 0x37b   : > { %v3158_v31 = vadd.f32 %v3084_v54, %v2867_v43  ;;  %v7008_v43 = vpack.c.bf16 %v2961_v5, %v2960_v50 }
 0x37c   : > { %v3341_v10 = vpop.f32.mrf.mxu0 }
 0x37d   : > { %v6974_v14 = vadd.f32 %v3334_v38, %v3158_v31  ;;  %7774 = vst [vmem:[#allocation12_spill] sm:$0xff] %v7008_v43  ;;  %v3443_v31 = vld [vmem:[#allocation3 + $0x69] sm:$0xff] }
 0x37e   : > { %v6976_v8 = vpop.f32.mrf.mxu1  ;;  %v7017_v56 = vpack.c.bf16 %v3443_v31, %v3442_v17  ;;  %v5474_v17 = vld [vmem:[%s7727_s3 + $0xe0] sm:$0xff] }
 0x380   : > { %v2868_v28 = vpop.f32.mrf.mxu2 }
 0x381   : > { %v3086_v48 = vpop.f32.mrf.mxu3  ;;  %v2869_v55 = vadd.f32 %v2868_v28, %v6780_v46  ;;  %v5476_v46 = vld [vmem:[%s7727_s3 + $0xf0] sm:$0xff] }
 0x382   : > { %4321 = vmatpush.bf16.msra.mxu0 %v5476_v46  ;;  %v2962_v46 = vld [vmem:[#allocation3 + $0x13a] sm:$0xff] }
 0x383   : > { %v3159_v25 = vadd.f32 %v3086_v48, %v2869_v55 }
 0x384   : > { %v3344_v38 = vpop.f32.mrf.mxu0 }
 0x385   : > { %5155 = vmatmul.msk.bf16.gmra.mxu2 %vm2412_vm3, %v3228_v30  ;;  %v6987_v32 = vadd.f32 %v3336_v53, %v3159_v25 }
 0x386   : > { %5195 = vmatmul.msk.bf16.gmra.mxu3 %vm2412_vm3, %v6982_v63  ;;  %v6989_v21 = vpop.f32.mrf.mxu1 }
 0x387   : > { %5236 = vmatmul.msk.bf16.gmra.mxu0 %vm2412_vm3, %v3230_v9 }
 0x388   : > { %v2871_v33 = vpop.f32.mrf.mxu2 }
 0x389   : > { %v3089_v36 = vpop.f32.mrf.mxu3  ;;  %v2872_v30 = vadd.f32 %v2871_v33, %v6795_v29  ;;  %5266 = vmatmul.msk.bf16.gmra.mxu1 %vm2412_vm3, %v6994_v16  ;;  %v2963_v33 = vld [vmem:[#allocation3 + $0x142] sm:$0xff] }
 0x38a   : > { %v7028_v59 = vpack.c.bf16 %v2963_v33, %v2962_v46  ;;  %v2965_v46 = vld [vmem:[#allocation3 + $0x15a] sm:$0xff] }
 0x38b   : > { %v3160_v53 = vadd.f32 %v3089_v36, %v2872_v30  ;;  %v3215_v30 = vld [vmem:[#allocation3 + $0x170] sm:$0xff] }
 0x38c   : > { %v3346_v58 = vpop.f32.mrf.mxu0  ;;  %7775 = vst [vmem:[#allocation10_spill] sm:$0xff] %v7028_v59 }
 0x38d   : > { %v7003_v45 = vadd.f32 %v3339_v35, %v3160_v53  ;;  %v3231_v35 = vpack.c.bf16 %v3213_v11, %v3212_v22 }
 0x38e   : > { %v7005_v3 = vpop.f32.mrf.mxu1 }
 0x390   : > { %v2873_v19 = vpop.f32.mrf.mxu2 }
 0x391   : > { %v3091_v27 = vpop.f32.mrf.mxu3  ;;  %v2874_v29 = vadd.f32 %v2873_v19, %v6809_v13 }
 0x393   : > { %v3161_v54 = vadd.f32 %v3091_v27, %v2874_v29  ;;  %v3214_v27 = vld [vmem:[#allocation3 + $0x168] sm:$0xff]  ;;  %v3444_v29 = vld [vmem:[#allocation3 + $0x79] sm:$0xff] }
 0x394   : > { %v3349_v12 = vpop.f32.mrf.mxu0 }
 0x395   : > { %5156 = vmatmul.msk.bf16.gmra.mxu2 %vm2412_vm3, %v3229_v7  ;;  %v7013_v28 = vadd.f32 %v3341_v10, %v3161_v54 }
 0x396   : > { %5196 = vmatmul.msk.bf16.gmra.mxu3 %vm2412_vm3, %v7008_v43  ;;  %v7015_v48 = vpop.f32.mrf.mxu1 }
 0x397   : > { %5237 = vmatmul.msk.bf16.gmra.mxu0 %vm2412_vm3, %v3231_v35 }
 0x398   : > { %v2876_v13 = vpop.f32.mrf.mxu2 }
 0x399   : > { %v3094_v55 = vpop.f32.mrf.mxu3  ;;  %v2877_v42 = vadd.f32 %v2876_v13, %v6822_v41  ;;  %5267 = vmatmul.msk.bf16.gmra.mxu1 %vm2412_vm3, %v7017_v56  ;;  %v3445_v41 = vld [vmem:[#allocation3 + $0x81] sm:$0xff] }
 0x39a   : > { %v7037_v11 = vpack.c.bf16 %v3445_v41, %v3444_v29  ;;  %v5470_v41 = vld [vmem:[%s7727_s3 + $0xc0] sm:$0xff] }
 0x39b   : > { %v3162_v7 = vadd.f32 %v3094_v55, %v2877_v42  ;;  %v5471_v42 = vld [vmem:[%s7727_s3 + $0xc8] sm:$0xff] }
 0x39c   : > { %v3351_v25 = vpop.f32.mrf.mxu0  ;;  %4072 = vmatpush.bf16.msra.mxu3 %v5471_v42 }
 0x39d   : > { %v7023_v47 = vadd.f32 %v3344_v38, %v3162_v7  ;;  %v3232_v38 = vpack.c.bf16 %v3215_v30, %v3214_v27  ;;  %v3447_v27 = vld [vmem:[#allocation3 + $0x99] sm:$0xff] }
 0x39e   : > { %v7025_v10 = vpop.f32.mrf.mxu1 }
 0x3a0   : > { %v2878_v51 = vpop.f32.mrf.mxu2  ;;  %4073 = vmatpush.bf16.msra.mxu3 %v5470_v41 }
 0x3a1   : > { %v3096_v49 = vpop.f32.mrf.mxu3  ;;  %v2879_v36 = vadd.f32 %v2878_v51, %v6833_v1 }
 0x3a3   : > { %v3163_v53 = vadd.f32 %v3096_v49, %v2879_v36  ;;  %v2964_v49 = vld [vmem:[#allocation3 + $0x152] sm:$0xff] }
 0x3a4   : > { %v3354_v19 = vpop.f32.mrf.mxu0  ;;  %v7060_v30 = vpack.c.bf16 %v2965_v46, %v2964_v49 }
 0x3a5   : > { %5157 = vmatmul.msk.bf16.gmra.mxu2 %vm2412_vm3, %v3230_v9  ;;  %v7033_v50 = vadd.f32 %v3346_v58, %v3163_v53  ;;  %v5475_v58 = vld [vmem:[%s7727_s3 + $0xe8] sm:$0xff]  ;;  %v5466_v53 = vld [vmem:[%s7727_s3 + $0xa0] sm:$0xff] }
 0x3a6   : > { %5197 = vmatmul.msk.bf16.gmra.mxu3 %vm2412_vm3, %v7028_v59  ;;  %v7035_v5 = vpop.f32.mrf.mxu1  ;;  %4322 = vmatpush.bf16.msra.mxu0 %v5475_v58  ;;  %7776 = vst [vmem:[#allocation11_spill] sm:$0xff] %v7060_v30 }
 0x3a7   : > { %5238 = vmatmul.msk.bf16.gmra.mxu0 %vm2412_vm3, %v3232_v38 }
 0x3a8   : > { %v2881_v1 = vpop.f32.mrf.mxu2 }
 0x3a9   : > { %v3099_v54 = vpop.f32.mrf.mxu3  ;;  %v2882_v31 = vadd.f32 %v2881_v1, %v6848_v26  ;;  %5268 = vmatmul.msk.bf16.gmra.mxu1 %vm2412_vm3, %v7037_v11  ;;  %v5467_v26 = vld [vmem:[%s7727_s3 + $0xa8] sm:$0xff]  ;;  %v3216_v1 = vld [vmem:[#allocation3 + $0x180] sm:$0xff] }
 0x3aa   : > { %3821 = vmatpush.bf16.msra.mxu2 %v5467_v26  ;;  %4323 = vmatpush.bf16.msra.mxu0 %v5474_v17 }
 0x3ab   : > { %v3164_v9 = vadd.f32 %v3099_v54, %v2882_v31 }
 0x3ac   : > { %v3356_v22 = vpop.f32.mrf.mxu0 }
 0x3ad   : > { %v7049_v13 = vadd.f32 %v3349_v12, %v3164_v9  ;;  %v3217_v12 = vld [vmem:[#allocation3 + $0x188] sm:$0xff]  ;;  %v3446_v9 = vld [vmem:[#allocation3 + $0x91] sm:$0xff] }
 0x3ae   : > { %v7051_v55 = vpop.f32.mrf.mxu1  ;;  %3822 = vmatpush.bf16.msra.mxu2 %v5466_v53  ;;  %v7075_v58 = vpack.c.bf16 %v3447_v27, %v3446_v9  ;;  %v3449_v27 = vld [vmem:[#allocation3 + $0xb1] sm:$0xff] }
 0x3b0   : > { %v2883_v7 = vpop.f32.mrf.mxu2 }
 0x3b1   : > { %v3101_v51 = vpop.f32.mrf.mxu3  ;;  %v2884_v33 = vadd.f32 %v2883_v7, %v6860_v2  ;;  %v3233_v2 = vpack.c.bf16 %v3217_v12, %v3216_v1  ;;  %v2967_v12 = vld [vmem:[#allocation3 + $0x172] sm:$0xff] }
 0x3b3   : > { %v3165_v36 = vadd.f32 %v3101_v51, %v2884_v33  ;;  %v2966_v33 = vld [vmem:[#allocation3 + $0x16a] sm:$0xff] }
 0x3b4   : > { %v3359_v29 = vpop.f32.mrf.mxu0  ;;  %v7086_v41 = vpack.c.bf16 %v2967_v12, %v2966_v33  ;;  %v3686_v33 = vld [vmem:[#allocation3 + $0x1a] sm:$0xff]  ;;  %v3687_v12 = vld [vmem:[#allocation3 + $0x22] sm:$0xff] }
 0x3b5   : > { %5158 = vmatmul.msk.bf16.gmra.mxu2 %vm2412_vm3, %v3231_v35  ;;  %v7071_v54 = vadd.f32 %v3351_v25, %v3165_v36 }
 0x3b6   : > { %5198 = vmatmul.msk.bf16.gmra.mxu3 %vm2412_vm3, %v7060_v30  ;;  %v7073_v31 = vpop.f32.mrf.mxu1  ;;  %7777 = vst [vmem:[#allocation15_spill] sm:$0xff] %v7086_v41 }
 0x3b7   : > { %5239 = vmatmul.msk.bf16.gmra.mxu0 %vm2412_vm3, %v3233_v2  ;;  %v3448_v2 = vld [vmem:[#allocation3 + $0xa9] sm:$0xff] }
 0x3b8   : > { %v2886_v17 = vpop.f32.mrf.mxu2  ;;  %v7095_v9 = vpack.c.bf16 %v3449_v27, %v3448_v2  ;;  %v3718_v2 = vpack.c.bf16 %v3687_v12, %v3686_v33 }
 0x3b9   : > { %v3104_v26 = vpop.f32.mrf.mxu3  ;;  %v2887_v42 = vadd.f32 %v2886_v17, %v6884_v34  ;;  %5269 = vmatmul.msk.bf16.gmra.mxu1 %vm2412_vm3, %v7075_v58 }
 0x3bb   : > { %v3166_v35 = vadd.f32 %v3104_v26, %v2887_v42 }
 0x3bc   : > { %v3361_v7 = vpop.f32.mrf.mxu0 }
 0x3bd   : > { %v7081_v25 = vadd.f32 %v3354_v19, %v3166_v35 }
 0x3be   : > { %v7083_v51 = vpop.f32.mrf.mxu1 }
 0x3c0   : > { %v2888_v49 = vpop.f32.mrf.mxu2 }
 0x3c1   : > { %v3106_v46 = vpop.f32.mrf.mxu3  ;;  %v2889_v36 = vadd.f32 %v2888_v49, %v6904_v52 }
 0x3c3   : > { %v3167_v53 = vadd.f32 %v3106_v46, %v2889_v36  ;;  %v3938_v36 = vld [vmem:[#allocation3 + $0x38] sm:$0xff] }
 0x3c4   : > { %v3364_v34 = vpop.f32.mrf.mxu0 }
 0x3c5   : > { %5159 = vmatmul.msk.bf16.gmra.mxu2 %vm2412_vm3, %v3232_v38  ;;  %v7091_v19 = vadd.f32 %v3356_v22, %v3167_v53  ;;  %v5479_v22 = vld [vmem:[%s7727_s3 + $0x108] sm:$0xff]  ;;  %v3937_v53 = vld [vmem:[#allocation3 + $0x30] sm:$0xff] }
 0x3c6   : > { %5199 = vmatmul.msk.bf16.gmra.mxu3 %vm2412_vm3, %v7086_v41  ;;  %v7093_v1 = vpop.f32.mrf.mxu1  ;;  %4572 = vmatpush.bf16.msra.mxu1 %v5479_v22  ;;  %v3450_v22 = vld [vmem:[#allocation3 + $0xc1] sm:$0xff] }
 0x3c7   : > { %5384 = vmatmul.msk.bf16.vlgmr.msra.gmra.mxu0 %vm2412_vm3, %v6965_v18 }
 0x3c8   : > { %v2891_v52 = vpop.f32.mrf.mxu2 }
 0x3c9   : > { %v3109_v17 = vpop.f32.mrf.mxu3  ;;  %v2892_v26 = vadd.f32 %v2891_v52, %v6919_v24  ;;  %5270 = vmatmul.msk.bf16.gmra.mxu1 %vm2412_vm3, %v7095_v9  ;;  %v3969_v52 = vpack.c.bf16 %v3938_v36, %v3937_v53 }
 0x3cb   : > { %v3168_v38 = vadd.f32 %v3109_v17, %v2892_v26  ;;  %v3451_v17 = vld [vmem:[#allocation3 + $0xc9] sm:$0xff] }
 0x3cc   : > { %v3366_v42 = vpop.f32.mrf.mxu0  ;;  %v7116_v41 = vpack.c.bf16 %v3451_v17, %v3450_v22  ;;  %v3939_v17 = vld [vmem:[#allocation3 + $0x48] sm:$0xff] }
 0x3cd   : > { %v7105_v35 = vadd.f32 %v3359_v29, %v3168_v38 }
 0x3ce   : > { %v7107_v49 = vpop.f32.mrf.mxu1 }
 0x3d0   : > { %v2893_v46 = vpop.f32.mrf.mxu2 }
 0x3d1   : > { %v3111_v18 = vpop.f32.mrf.mxu3  ;;  %v2894_v24 = vadd.f32 %v2893_v46, %v6934_v37 }
 0x3d3   : > { %v3169_v27 = vadd.f32 %v3111_v18, %v2894_v24 }
 0x3d4   : > { %v3369_v26 = vpop.f32.mrf.mxu0 }
 0x3d5   : > { %5304 = vmatmul.msk.bf16.vlgmr.msra.gmra.mxu2 %vm2412_vm3, %v3718_v2  ;;  %v7112_v29 = vadd.f32 %v3361_v7, %v3169_v27  ;;  %v3688_v27 = vld [vmem:[#allocation3 + $0x32] sm:$0xff]  ;;  %v3689_v2 = vld [vmem:[#allocation3 + $0x3a] sm:$0xff] }
 0x3d6   : > { %5344 = vmatmul.msk.bf16.vlgmr.msra.gmra.mxu3 %vm2412_vm3, %v3969_v52  ;;  %v7114_v38 = vpop.f32.mrf.mxu1  ;;  %v3940_v52 = vld [vmem:[#allocation3 + $0x50] sm:$0xff]  ;;  %v7128_v30 = vpack.c.bf16 %v3689_v2, %v3688_v27 }
 0x3d7   : > { %5385 = vmatmul.msk.bf16.gmra.mxu0 %vm2412_vm3, %v6994_v16 }
 0x3d8   : > { %v2896_v37 = vpop.f32.mrf.mxu2 }
 0x3d9   : > { %v3114_v46 = vpop.f32.mrf.mxu3  ;;  %v2897_v18 = vadd.f32 %v2896_v37, %v6946_v15  ;;  %5271 = vmatmul.msk.bf16.gmra.mxu1 %vm2412_vm3, %v7116_v41  ;;  %v3970_v15 = vpack.c.bf16 %v3940_v52, %v3939_v17  ;;  %v3453_v37 = vld [vmem:[#allocation3 + $0xe1] sm:$0xff] }
 0x3db   : > { %v3170_v33 = vadd.f32 %v3114_v46, %v2897_v18  ;;  %v3452_v18 = vld [vmem:[#allocation3 + $0xd9] sm:$0xff] }
 0x3dc   : > { %v3371_v12 = vpop.f32.mrf.mxu0 }
 0x3dd   : > { %v7123_v36 = vadd.f32 %v3364_v34, %v3170_v33 }
 0x3de   : > { %v7125_v7 = vpop.f32.mrf.mxu1 }
 0x3e0   : > { %v2898_v24 = vpop.f32.mrf.mxu2 }
 0x3e1   : > { %v3116_v53 = vpop.f32.mrf.mxu3  ;;  %v2899_v16 = vadd.f32 %v2898_v24, %v6953_v61  ;;  %v7138_v61 = vpack.c.bf16 %v3453_v37, %v3452_v18  ;;  %v3691_v37 = vld [vmem:[#allocation3 + $0x52] sm:$0xff]  ;;  %v3941_v18 = vld [vmem:[#allocation3 + $0x60] sm:$0xff] }
 0x3e3   : > { %v3171_v22 = vadd.f32 %v3116_v53, %v2899_v16 }
 0x3e4   : > { %v3374_v59 = vpop.f32.mrf.mxu0 }
 0x3e5   : > { %5305 = vmatmul.msk.bf16.gmra.mxu2 %vm2412_vm3, %v7128_v30  ;;  %v7133_v34 = vadd.f32 %v3366_v42, %v3171_v22 }
 0x3e6   : > { %5345 = vmatmul.msk.bf16.gmra.mxu3 %vm2412_vm3, %v3970_v15  ;;  %v3574_v46 = vpop.f32.mrf.mxu1  ;;  %v3690_v15 = vld [vmem:[#allocation3 + $0x4a] sm:$0xff] }
 0x3e7   : > { %v7136_v33 = vadd.f32 %v3574_v46, %v6932_v0  ;;  %5386 = vmatmul.msk.bf16.gmra.mxu0 %vm2412_vm3, %v7017_v56  ;;  %v3942_v56 = vld [vmem:[#allocation3 + $0x68] sm:$0xff] }
 0x3e8   : > { %v2901_v24 = vpop.f32.mrf.mxu2  ;;  %v3971_v43 = vpack.c.bf16 %v3942_v56, %v3941_v18 }
 0x3e9   : > { %v3119_v53 = vpop.f32.mrf.mxu3  ;;  %v2902_v27 = vadd.f32 %v2901_v24, %v6963_v57  ;;  %5272 = vmatmul.msk.bf16.gmra.mxu1 %vm2412_vm3, %v7138_v61  ;;  %v7151_v24 = vpack.c.bf16 %v3691_v37, %v3690_v15 }
 0x3eb   : > { %v3172_v2 = vadd.f32 %v3119_v53, %v2902_v27  ;;  %v3455_v53 = vld [vmem:[#allocation3 + $0xf9] sm:$0xff] }
 0x3ec   : > { %v3376_v42 = vpop.f32.mrf.mxu0 }
 0x3ed   : > { %v7145_v52 = vadd.f32 %v3369_v26, %v3172_v2  ;;  %v3454_v2 = vld [vmem:[#allocation3 + $0xf1] sm:$0xff] }
 0x3ee   : > { %v3576_v16 = vpop.f32.mrf.mxu1 }
 0x3ef   : > { %v7148_v0 = vadd.f32 %v3576_v16, %v6944_v44 }
 0x3f0   : > { %v2903_v17 = vpop.f32.mrf.mxu2 }
 0x3f1   : > { %v3121_v22 = vpop.f32.mrf.mxu3  ;;  %v2904_v46 = vadd.f32 %v2903_v17, %v6976_v8  ;;  %v7161_v8 = vpack.c.bf16 %v3455_v53, %v3454_v2  ;;  %v3693_v53 = vld [vmem:[#allocation3 + $0x6a] sm:$0xff]  ;;  %v3943_v2 = vld [vmem:[#allocation3 + $0x78] sm:$0xff] }
 0x3f3   : > { %v3173_v57 = vadd.f32 %v3121_v22, %v2904_v46 }
 0x3f4   : > { %v3379_v27 = vpop.f32.mrf.mxu0 }
 0x3f5   : > { %5306 = vmatmul.msk.bf16.gmra.mxu2 %vm2412_vm3, %v7151_v24  ;;  %v7156_v44 = vadd.f32 %v3371_v12, %v3173_v57  ;;  %v3692_v57 = vld [vmem:[#allocation3 + $0x62] sm:$0xff] }
 0x3f6   : > { %5346 = vmatmul.msk.bf16.gmra.mxu3 %vm2412_vm3, %v3971_v43  ;;  %v3579_v26 = vpop.f32.mrf.mxu1 }
 0x3f7   : > { %7778 = vst [vmem:[#allocation13_spill] sm:$0xff] %v7156_v44  ;;  %v7159_v16 = vadd.f32 %v3579_v26, %v6951_v62  ;;  %5387 = vmatmul.msk.bf16.gmra.mxu0 %vm2412_vm3, %v7037_v11  ;;  %v3944_v11 = vld [vmem:[#allocation3 + $0x80] sm:$0xff] }
 0x3f8   : > { %v2906_v17 = vpop.f32.mrf.mxu2  ;;  %v3972_v44 = vpack.c.bf16 %v3944_v11, %v3943_v2 }
 0x3f9   : > { %v3124_v22 = vpop.f32.mrf.mxu3  ;;  %v2907_v15 = vadd.f32 %v2906_v17, %v6989_v21  ;;  %5273 = vmatmul.msk.bf16.gmra.mxu1 %vm2412_vm3, %v7161_v8  ;;  %v7174_v17 = vpack.c.bf16 %v3693_v53, %v3692_v57 }
 0x3fb   : > { %v3174_v43 = vadd.f32 %v3124_v22, %v2907_v15  ;;  %v3457_v22 = vld [vmem:[#allocation3 + $0x111] sm:$0xff] }
 0x3fc   : > { %v3381_v12 = vpop.f32.mrf.mxu0 }
 0x3fd   : > { %v7168_v37 = vadd.f32 %v3374_v59, %v3174_v43  ;;  %v3456_v43 = vld [vmem:[#allocation3 + $0x109] sm:$0xff] }
 0x3fe   : > { %v3581_v56 = vpop.f32.mrf.mxu1 }
 0x3ff   : > { %v7171_v62 = vadd.f32 %v3581_v56, %v6961_v20 }
 0x400   : > { %v2908_v46 = vpop.f32.mrf.mxu2 }
 0x401   : > { %v3126_v18 = vpop.f32.mrf.mxu3  ;;  %v2909_v26 = vadd.f32 %v2908_v46, %v7005_v3  ;;  %v7184_v3 = vpack.c.bf16 %v3457_v22, %v3456_v43  ;;  %v3946_v22 = vld [vmem:[#allocation3 + $0x98] sm:$0xff]  ;;  %v3945_v43 = vld [vmem:[#allocation3 + $0x90] sm:$0xff] }
 0x403   : > { %v3175_v21 = vadd.f32 %v3126_v18, %v2909_v26 }
 0x404   : > { %v3384_v15 = vpop.f32.mrf.mxu0 }
 0x405   : > { %5307 = vmatmul.msk.bf16.gmra.mxu2 %vm2412_vm3, %v7174_v17  ;;  %v7179_v20 = vadd.f32 %v3376_v42, %v3175_v21  ;;  %v5478_v42 = vld [vmem:[%s7727_s3 + $0x100] sm:$0xff]  ;;  %v3694_v21 = vld [vmem:[#allocation3 + $0x7a] sm:$0xff] }
 0x406   : > { %5347 = vmatmul.msk.bf16.gmra.mxu3 %vm2412_vm3, %v3972_v44  ;;  %v3584_v59 = vpop.f32.mrf.mxu1  ;;  %4573 = vmatpush.bf16.msra.mxu1 %v5478_v42 }
 0x407   : > { %7779 = vst [vmem:[#allocation14_spill] sm:$0xff] %v7179_v20  ;;  %v7182_v56 = vadd.f32 %v3584_v59, %v6974_v14  ;;  %5388 = vmatmul.msk.bf16.gmra.mxu0 %vm2412_vm3, %v7075_v58  ;;  %v3459_v20 = vld [vmem:[#allocation3 + $0x129] sm:$0xff] }
 0x408   : > { %v2911_v46 = vpop.f32.mrf.mxu2 }
 0x409   : > { %v3129_v18 = vpop.f32.mrf.mxu3  ;;  %v2912_v57 = vadd.f32 %v2911_v46, %v7015_v48  ;;  %5274 = vmatmul.msk.bf16.gmra.mxu1 %vm2412_vm3, %v7184_v3  ;;  %v3695_v48 = vld [vmem:[#allocation3 + $0x82] sm:$0xff] }
 0x40b   : > { %v3176_v44 = vadd.f32 %v3129_v18, %v2912_v57  ;;  %v7200_v18 = vpack.c.bf16 %v3695_v48, %v3694_v21  ;;  %v3973_v57 = vpack.c.bf16 %v3946_v22, %v3945_v43 }
 0x40c   : > { %v3386_v53 = vpop.f32.mrf.mxu0 }
 0x40d   : > { %v7194_v14 = vadd.f32 %v3379_v27, %v3176_v44  ;;  %v3458_v44 = vld [vmem:[#allocation3 + $0x121] sm:$0xff] }
 0x40e   : > { %v3586_v11 = vpop.f32.mrf.mxu1 }
 0x40f   : > { %v7197_v26 = vadd.f32 %v3586_v11, %v6987_v32 }
 0x410   : > { %v2913_v58 = vpop.f32.mrf.mxu2 }
 0x411   : > { %v3131_v2 = vpop.f32.mrf.mxu3  ;;  %v2914_v59 = vadd.f32 %v2913_v58, %v7025_v10  ;;  %v7210_v10 = vpack.c.bf16 %v3459_v20, %v3458_v44  ;;  %v3947_v44 = vld [vmem:[#allocation3 + $0xa8] sm:$0xff] }
 0x413   : > { %v3177_v46 = vadd.f32 %v3131_v2, %v2914_v59 }
 0x414   : > { %v3389_v42 = vpop.f32.mrf.mxu0 }
 0x415   : > { %5308 = vmatmul.msk.bf16.gmra.mxu2 %vm2412_vm3, %v7200_v18  ;;  %v7205_v32 = vadd.f32 %v3381_v12, %v3177_v46  ;;  %v3696_v46 = vld [vmem:[#allocation3 + $0x92] sm:$0xff] }
 0x416   : > { %5348 = vmatmul.msk.bf16.gmra.mxu3 %vm2412_vm3, %v3973_v57  ;;  %v3589_v27 = vpop.f32.mrf.mxu1  ;;  %v3697_v57 = vld [vmem:[#allocation3 + $0x9a] sm:$0xff] }
 0x417   : > { %7780 = vst [vmem:[#allocation16_spill] sm:$0xff] %v7205_v32  ;;  %v7208_v11 = vadd.f32 %v3589_v27, %v7003_v45  ;;  %5389 = vmatmul.msk.bf16.gmra.mxu0 %vm2412_vm3, %v7095_v9  ;;  %v3948_v9 = vld [vmem:[#allocation3 + $0xb0] sm:$0xff] }
 0x418   : > { %v2916_v58 = vpop.f32.mrf.mxu2  ;;  %v3974_v32 = vpack.c.bf16 %v3948_v9, %v3947_v44 }
 0x419   : > { %v3134_v2 = vpop.f32.mrf.mxu3  ;;  %v2917_v21 = vadd.f32 %v2916_v58, %v7035_v5  ;;  %5275 = vmatmul.msk.bf16.gmra.mxu1 %vm2412_vm3, %v7210_v10  ;;  %v7223_v58 = vpack.c.bf16 %v3697_v57, %v3696_v46 }
 0x41b   : > { %v3178_v48 = vadd.f32 %v3134_v2, %v2917_v21  ;;  %v3461_v2 = vld [vmem:[#allocation3 + $0x141] sm:$0xff] }
 0x41c   : > { %v3391_v12 = vpop.f32.mrf.mxu0 }
 0x41d   : > { %v7217_v22 = vadd.f32 %v3384_v15, %v3178_v48  ;;  %v3460_v48 = vld [vmem:[#allocation3 + $0x139] sm:$0xff] }
 0x41e   : > { %v3591_v59 = vpop.f32.mrf.mxu1 }
 0x41f   : > { %v7220_v45 = vadd.f32 %v3591_v59, %v7013_v28 }
 0x420   : > { %v2918_v20 = vpop.f32.mrf.mxu2 }
 0x421   : > { %v3136_v43 = vpop.f32.mrf.mxu3  ;;  %v2919_v27 = vadd.f32 %v2918_v20, %v7051_v55  ;;  %v7233_v55 = vpack.c.bf16 %v3461_v2, %v3460_v48  ;;  %v3949_v2 = vld [vmem:[#allocation3 + $0xc0] sm:$0xff] }
 0x423   : > { %v3179_v5 = vadd.f32 %v3136_v43, %v2919_v27 }
 0x424   : > { %v3394_v28 = vpop.f32.mrf.mxu0 }
 0x425   : > { %5309 = vmatmul.msk.bf16.gmra.mxu2 %vm2412_vm3, %v7223_v58  ;;  %v7228_v15 = vadd.f32 %v3386_v53, %v3179_v5  ;;  %v3950_v5 = vld [vmem:[#allocation3 + $0xc8] sm:$0xff] }
 0x426   : > { %5349 = vmatmul.msk.bf16.gmra.mxu3 %vm2412_vm3, %v3974_v32  ;;  %v3594_v21 = vpop.f32.mrf.mxu1  ;;  %v3975_v48 = vpack.c.bf16 %v3950_v5, %v3949_v2  ;;  %v3951_v5 = vld [vmem:[#allocation3 + $0xd8] sm:$0xff] }
 0x427   : > { %v7231_v59 = vadd.f32 %v3594_v21, %v7023_v47  ;;  %5390 = vmatmul.msk.bf16.gmra.mxu0 %vm2412_vm3, %v7116_v41 }
 0x428   : > { %v2921_v20 = vpop.f32.mrf.mxu2 }
 0x429   : > { %v3139_v43 = vpop.f32.mrf.mxu3  ;;  %v2922_v46 = vadd.f32 %v2921_v20, %v7073_v31  ;;  %5276 = vmatmul.msk.bf16.gmra.mxu1 %vm2412_vm3, %v7233_v55 }
 0x42b   : > { %v3180_v32 = vadd.f32 %v3139_v43, %v2922_v46 }
 0x42c   : > { %v3396_v47 = vpop.f32.mrf.mxu0 }
 0x42d   : > { %v7240_v53 = vadd.f32 %v3389_v42, %v3180_v32 }
 0x42e   : > { %v3596_v57 = vpop.f32.mrf.mxu1 }
 0x42f   : > { %v7243_v9 = vadd.f32 %v3596_v57, %v7033_v50 }
 0x430   : > { %v2923_v27 = vpop.f32.mrf.mxu2 }
 0x431   : > { %v3141_v44 = vpop.f32.mrf.mxu3  ;;  %v2924_v41 = vadd.f32 %v2923_v27, %v7083_v51 }
 0x433   : > { %v3181_v21 = vadd.f32 %v3141_v44, %v2924_v41  ;;  %v3952_v44 = vld [vmem:[#allocation3 + $0xe0] sm:$0xff] }
 0x434   : > { %v3399_v46 = vpop.f32.mrf.mxu0 }
 0x435   : > { %5310 = vmatmul.msk.bf16.gmra.mxu2 %vm2412_vm3, %v6873_v40  ;;  %v7249_v31 = vadd.f32 %v3391_v12, %v3181_v21 }
 0x436   : > { %5350 = vmatmul.msk.bf16.gmra.mxu3 %vm2412_vm3, %v3975_v48  ;;  %v3599_v42 = vpop.f32.mrf.mxu1 }
 0x437   : > { %v7252_v50 = vadd.f32 %v3599_v42, %v7049_v13  ;;  %5391 = vmatmul.msk.bf16.gmra.mxu0 %vm2412_vm3, %v7138_v61 }
 0x438   : > { %v2926_v20 = vpop.f32.mrf.mxu2 }
 0x439   : > { %v3144_v43 = vpop.f32.mrf.mxu3  ;;  %v2927_v51 = vadd.f32 %v2926_v20, %v7093_v1  ;;  %5277 = vmatmul.msk.bf16.gmra.mxu1 %vm2412_vm3, %v6891_v4  ;;  %v3976_v1 = vpack.c.bf16 %v3952_v44, %v3951_v5  ;;  %v3466_v44 = vld [vmem:[#allocation3 + $0x181] sm:$0xff] }
 0x43b   : > { %v3182_v40 = vadd.f32 %v3144_v43, %v2927_v51 }
 0x43c   : > { %v3401_v2 = vpop.f32.mrf.mxu0 }
 0x43d   : > { %v7259_v32 = vadd.f32 %v3394_v28, %v3182_v40  ;;  %v3954_v40 = vld [vmem:[#allocation3 + $0xf8] sm:$0xff] }
 0x43e   : > { %v3601_v12 = vpop.f32.mrf.mxu1 }
 0x43f   : > { %v7262_v57 = vadd.f32 %v3601_v12, %v7071_v54  ;;  %v3953_v12 = vld [vmem:[#allocation3 + $0xf0] sm:$0xff] }
 0x440   : > { %v2928_v13 = vpop.f32.mrf.mxu2 }
 0x441   : > { %v3146_v27 = vpop.f32.mrf.mxu3  ;;  %v2929_v61 = vadd.f32 %v2928_v13, %v7107_v49 }
 0x443   : > { %v3183_v41 = vadd.f32 %v3146_v27, %v2929_v61  ;;  %v3977_v27 = vpack.c.bf16 %v3954_v40, %v3953_v12 }
 0x445   : > { %5311 = vmatmul.msk.bf16.gmra.mxu2 %vm2412_vm3, %v6911_v23  ;;  %v7268_v4 = vadd.f32 %v3396_v47, %v3183_v41  ;;  %v4325_v23 = vpop.f32.mrf.mxu0 }
 0x446   : > { %5351 = vmatmul.msk.bf16.gmra.mxu3 %vm2412_vm3, %v3976_v1  ;;  %v3604_v28 = vpop.f32.mrf.mxu1 }
 0x447   : > { %v7271_v54 = vadd.f32 %v3604_v28, %v7081_v25  ;;  %5392 = vmatmul.msk.bf16.gmra.mxu0 %vm2412_vm3, %v7161_v8 }
 0x448   : > { %v2931_v21 = vpop.f32.mrf.mxu2 }
 0x449   : > { %v3149_v49 = vpop.f32.mrf.mxu3  ;;  %v2932_v48 = vadd.f32 %v2931_v21, %v7114_v38  ;;  %5278 = vmatmul.msk.bf16.gmra.mxu1 %vm2412_vm3, %v6923_v60  ;;  %v3467_v38 = vld [vmem:[#allocation3 + $0x189] sm:$0xff] }
 0x44a   : > { %v7292_v5 = vpack.c.bf16 %v3467_v38, %v3466_v44  ;;  %v3958_v44 = vld [vmem:[#allocation3 + $0x128] sm:$0xff] }
 0x44b   : > { %v3184_v42 = vadd.f32 %v3149_v49, %v2932_v48  ;;  %v3956_v48 = vld [vmem:[#allocation3 + $0x110] sm:$0xff] }
 0x44d   : > { %v7278_v20 = vadd.f32 %v3399_v46, %v3184_v42 }
 0x44e   : > { %v3606_v47 = vpop.f32.mrf.mxu1 }
 0x44f   : > { %v7281_v43 = vadd.f32 %v3606_v47, %v7091_v19  ;;  %v4327_v19 = vpop.f32.mrf.mxu0  ;;  %v3955_v47 = vld [vmem:[#allocation3 + $0x108] sm:$0xff] }
 0x450   : > { %v2933_v25 = vpop.f32.mrf.mxu2 }
 0x451   : > { %v3151_v51 = vpop.f32.mrf.mxu3  ;;  %v2934_v8 = vadd.f32 %v2933_v25, %v7125_v7 }
 0x453   : > { %v3185_v13 = vadd.f32 %v3151_v51, %v2934_v8  ;;  %v3978_v51 = vpack.c.bf16 %v3956_v48, %v3955_v47 }
 0x455   : > { %5312 = vmatmul.msk.bf16.gmra.mxu2 %vm2412_vm3, %v6938_v6  ;;  %v7287_v60 = vadd.f32 %v3401_v2, %v3185_v13 }
 0x456   : > { %5352 = vmatmul.msk.bf16.gmra.mxu3 %vm2412_vm3, %v3977_v27  ;;  %v3609_v46 = vpop.f32.mrf.mxu1 }
 0x457   : > { %v7290_v61 = vadd.f32 %v3609_v46, %v7105_v35  ;;  %5393 = vmatmul.msk.bf16.gmra.mxu0 %vm2412_vm3, %v7184_v3  ;;  %v4330_v42 = vpop.f32.mrf.mxu0 }
 0x458   : > { %v3824_v7 = vpop.f32.mrf.mxu2 }
 0x459   : > { %v4075_v41 = vpop.f32.mrf.mxu3  ;;  %v3904_v1 = vadd.f32 %v3824_v7, %v7136_v33  ;;  %5279 = vmatmul.msk.bf16.gmra.mxu1 %vm2412_vm3, %v7292_v5 }
 0x45b   : > { %v4155_v6 = vadd.f32 %v4075_v41, %v3904_v1 }
 0x45d   : > { %v7299_v2 = vadd.f32 %v4325_v23, %v4155_v6 }
 0x45e   : > { %v3611_v28 = vpop.f32.mrf.mxu1 }
 0x45f   : > { %v7302_v21 = vadd.f32 %v3611_v28, %v7112_v29  ;;  %v4332_v12 = vpop.f32.mrf.mxu0 }
 0x460   : > { %v3826_v35 = vpop.f32.mrf.mxu2 }
 0x461   : > { %v4077_v49 = vpop.f32.mrf.mxu3  ;;  %v3905_v3 = vadd.f32 %v3826_v35, %v7148_v0 }
 0x463   : > { %v4156_v25 = vadd.f32 %v4077_v49, %v3905_v3 }
 0x465   : > { %5313 = vmatmul.msk.bf16.gmra.mxu2 %vm2412_vm3, %v6956_v39  ;;  %v7308_v33 = vadd.f32 %v4327_v19, %v4156_v25  ;;  %v3957_v19 = vld [vmem:[#allocation3 + $0x120] sm:$0xff] }
 0x466   : > { %5353 = vmatmul.msk.bf16.gmra.mxu3 %vm2412_vm3, %v3978_v51  ;;  %v3614_v23 = vpop.f32.mrf.mxu1  ;;  %v3979_v41 = vpack.c.bf16 %v3958_v44, %v3957_v19  ;;  %v3960_v25 = vld [vmem:[#allocation3 + $0x140] sm:$0xff]  ;;  %v3959_v51 = vld [vmem:[#allocation3 + $0x138] sm:$0xff] }
 0x467   : > { %v7311_v29 = vadd.f32 %v3614_v23, %v7123_v36  ;;  %5394 = vmatmul.msk.bf16.gmra.mxu0 %vm2412_vm3, %v7210_v10  ;;  %v4212_v23 = vld [vmem:[#allocation3 + $0x159] sm:$0xff] }
 0x468   : > { %v3829_v40 = vpop.f32.mrf.mxu2 }
 0x469   : > { %v4080_v8 = vpop.f32.mrf.mxu3  ;;  %v3906_v0 = vadd.f32 %v3829_v40, %v7159_v16  ;;  %5424 = vmatmul.msk.bf16.vlgmr.msra.gmra.mxu1 %vm2412_vm3, %v7128_v30  ;;  %v4335_v16 = vpop.f32.mrf.mxu0 }
 0x46b   : > { %v4157_v39 = vadd.f32 %v4080_v8, %v3906_v0  ;;  %v4211_v8 = vld [vmem:[#allocation3 + $0x151] sm:$0xff] }
 0x46c   : > { %v7782_v0 = vld [vmem:[#allocation12_spill] sm:$0xff] }
 0x46d   : > { %v7318_v13 = vadd.f32 %v4330_v42, %v4157_v39  ;;  %v7781_v42 = vld [vmem:[#allocation13_spill] sm:$0xff] }
 0x46e   : > { %v3616_v27 = vpop.f32.mrf.mxu1 }
 0x46f   : > { %v7321_v38 = vadd.f32 %v3616_v27, %v7133_v34 }
 0x470   : > { %v3831_v36 = vpop.f32.mrf.mxu2 }
 0x471   : > { %v4082_v46 = vpop.f32.mrf.mxu3  ;;  %v3907_v10 = vadd.f32 %v3831_v36, %v7171_v62  ;;  %v4337_v48 = vpop.f32.mrf.mxu0 }
 0x473   : > { %v4158_v7 = vadd.f32 %v4082_v46, %v3907_v10 }
 0x475   : > { %5314 = vmatmul.msk.bf16.gmra.mxu2 %vm2412_vm3, %v6982_v63  ;;  %v7327_v30 = vadd.f32 %v4332_v12, %v4158_v7 }
 0x476   : > { %5354 = vmatmul.msk.bf16.gmra.mxu3 %vm2412_vm3, %v3979_v41  ;;  %v3619_v1 = vpop.f32.mrf.mxu1  ;;  %v7783_v41 = vld [vmem:[#allocation14_spill] sm:$0xff] }
 0x477   : > { %v7330_v34 = vadd.f32 %v3619_v1, %v7145_v52  ;;  %5395 = vmatmul.msk.bf16.gmra.mxu0 %vm2412_vm3, %v7233_v55 }
 0x478   : > { %v3834_v6 = vpop.f32.mrf.mxu2 }
 0x479   : > { %v4085_v62 = vpop.f32.mrf.mxu3  ;;  %v3908_v28 = vadd.f32 %v3834_v6, %v7182_v56  ;;  %5425 = vmatmul.msk.bf16.gmra.mxu1 %vm2412_vm3, %v7151_v24  ;;  %v3980_v56 = vpack.c.bf16 %v3960_v25, %v3959_v51  ;;  %v4231_v24 = vpack.c.bf16 %v4212_v23, %v4211_v8  ;;  %v4340_v44 = vpop.f32.mrf.mxu0  ;;  %v7785_v51 = vld [vmem:[#allocation16_spill] sm:$0xff] }
 0x47b   : > { %v4159_v35 = vadd.f32 %v4085_v62, %v3908_v28  ;;  %v3961_v28 = vld [vmem:[#allocation3 + $0x150] sm:$0xff] }
 0x47d   : > { %v7337_v63 = vadd.f32 %v4335_v16, %v4159_v35  ;;  %v4214_v35 = vld [vmem:[#allocation3 + $0x171] sm:$0xff] }
 0x47e   : > { %v3621_v49 = vpop.f32.mrf.mxu1 }
 0x47f   : > { %v7340_v3 = vadd.f32 %v3621_v49, %v7781_v42  ;;  %v4213_v42 = vld [vmem:[#allocation3 + $0x169] sm:$0xff] }
 0x480   : > { %v3836_v52 = vpop.f32.mrf.mxu2 }
 0x481   : > { %v4087_v47 = vpop.f32.mrf.mxu3  ;;  %v3909_v55 = vadd.f32 %v3836_v52, %v7197_v26  ;;  %v4232_v52 = vpack.c.bf16 %v4214_v35, %v4213_v42  ;;  %v3716_v35 = vld [vmem:[#allocation3 + $0x182] sm:$0xff] }
 0x482   : > { %v4449_v42 = vld [vmem:[#allocation3 + $0xc2] sm:$0xff] }
 0x483   : > { %v4160_v40 = vadd.f32 %v4087_v47, %v3909_v55 }
 0x485   : > { %5315 = vmatmul.msk.bf16.gmra.mxu2 %vm2412_vm3, %v7782_v0  ;;  %v7346_v12 = vadd.f32 %v4337_v48, %v4160_v40  ;;  %v4342_v48 = vpop.f32.mrf.mxu0  ;;  %v3964_v40 = vld [vmem:[#allocation3 + $0x170] sm:$0xff] }
 0x486   : > { %5355 = vmatmul.msk.bf16.gmra.mxu3 %vm2412_vm3, %v3980_v56  ;;  %v3624_v39 = vpop.f32.mrf.mxu1  ;;  %v3963_v56 = vld [vmem:[#allocation3 + $0x168] sm:$0xff]  ;;  %v7786_v0 = vld [vmem:[#allocation11_spill] sm:$0xff] }
 0x487   : > { %v7349_v27 = vadd.f32 %v3624_v39, %v7168_v37  ;;  %5396 = vmatmul.msk.bf16.gmra.mxu0 %vm2412_vm3, %v4231_v24  ;;  %v3962_v37 = vld [vmem:[#allocation3 + $0x158] sm:$0xff]  ;;  %v3982_v8 = vpack.c.bf16 %v3964_v40, %v3963_v56  ;;  %v4452_v40 = vld [vmem:[#allocation3 + $0xe2] sm:$0xff] }
 0x488   : > { %v3839_v26 = vpop.f32.mrf.mxu2 }
 0x489   : > { %v4090_v36 = vpop.f32.mrf.mxu3  ;;  %v3910_v46 = vadd.f32 %v3839_v26, %v7208_v11  ;;  %5426 = vmatmul.msk.bf16.gmra.mxu1 %vm2412_vm3, %v7174_v17  ;;  %v3981_v11 = vpack.c.bf16 %v3962_v37, %v3961_v28  ;;  %v7784_v17 = vld [vmem:[#allocation10_spill] sm:$0xff] }
 0x48a   : > { %v3966_v26 = vld [vmem:[#allocation3 + $0x188] sm:$0xff] }
 0x48b   : > { %v4161_v10 = vadd.f32 %v4090_v36, %v3910_v46  ;;  %v4217_v36 = vld [vmem:[#allocation3 + $0x199] sm:$0xff]  ;;  %v4218_v46 = vld [vmem:[#allocation3 + $0x1a1] sm:$0xff] }
 0x48d   : > { %v7355_v19 = vadd.f32 %v4340_v44, %v4161_v10  ;;  %v3965_v44 = vld [vmem:[#allocation3 + $0x180] sm:$0xff] }
 0x48e   : > { %v3626_v7 = vpop.f32.mrf.mxu1  ;;  %v3983_v10 = vpack.c.bf16 %v3966_v26, %v3965_v44  ;;  %v4454_v26 = vld [vmem:[#allocation3 + $0xfa] sm:$0xff] }
 0x48f   : > { %v7358_v16 = vadd.f32 %v3626_v7, %v7783_v41  ;;  %v4234_v7 = vpack.c.bf16 %v4218_v46, %v4217_v36  ;;  %v4447_v41 = vld [vmem:[#allocation3 + $0xaa] sm:$0xff] }
 0x490   : > { %v3841_v1 = vpop.f32.mrf.mxu2 }
 0x491   : > { %v3911_v6 = vadd.f32 %v3841_v1, %v7220_v45  ;;  %v4092_v62 = vpop.f32.mrf.mxu3  ;;  %v4448_v1 = vld [vmem:[#allocation3 + $0xb2] sm:$0xff] }
 0x492   : > { %v4474_v37 = vpack.c.bf16 %v4448_v1, %v4447_v41 }
 0x493   : > { %v4162_v49 = vadd.f32 %v4092_v62, %v3911_v6  ;;  %v3967_v6 = vld [vmem:[#allocation3 + $0x198] sm:$0xff]  ;;  %v3968_v62 = vld [vmem:[#allocation3 + $0x1a0] sm:$0xff] }
 0x495   : > { %5316 = vmatmul.msk.bf16.gmra.mxu2 %vm2412_vm3, %v7784_v17  ;;  %v7364_v47 = vadd.f32 %v4342_v48, %v4162_v49  ;;  %v3717_v49 = vld [vmem:[#allocation3 + $0x18a] sm:$0xff] }
 0x496   : > { %5356 = vmatmul.msk.bf16.gmra.mxu3 %vm2412_vm3, %v3981_v11  ;;  %v3629_v25 = vpop.f32.mrf.mxu1  ;;  %v3984_v11 = vpack.c.bf16 %v3968_v62, %v3967_v6  ;;  %v7399_v48 = vpack.c.bf16 %v3717_v49, %v3716_v35  ;;  %v4450_v17 = vld [vmem:[#allocation3 + $0xca] sm:$0xff]  ;;  %v4456_v49 = vld [vmem:[#allocation3 + $0x112] sm:$0xff] }
 0x497   : > { %v7367_v55 = vadd.f32 %v3629_v25, %v7194_v14  ;;  %5397 = vmatmul.msk.bf16.gmra.mxu0 %vm2412_vm3, %v4232_v52  ;;  %v4475_v25 = vpack.c.bf16 %v4450_v17, %v4449_v42  ;;  %v4455_v35 = vld [vmem:[#allocation3 + $0x10a] sm:$0xff] }
 0x498   : > { %v7433_v1 = vpop.f32.mrf.mxu2 }
 0x499   : > { %5427 = vmatmul.msk.bf16.gmra.mxu1 %vm2412_vm3, %v7200_v18  ;;  %v7443_v6 = vpop.f32.mrf.mxu3 }
 0x49e   : > { %v3631_v45 = vpop.f32.mrf.mxu1 }
 0x49f   : > { %v7373_v23 = vadd.f32 %v3631_v45, %v7785_v51  ;;  %v4451_v51 = vld [vmem:[#allocation3 + $0xda] sm:$0xff] }
 0x4a0   : > { %v7448_v17 = vpop.f32.mrf.mxu2 }
 0x4a5   : > { %5317 = vmatmul.msk.bf16.gmra.mxu2 %vm2412_vm3, %v7786_v0  ;;  %v4476_v0 = vpack.c.bf16 %v4452_v40, %v4451_v51 }
 0x4a6   : > { %5357 = vmatmul.msk.bf16.gmra.mxu3 %vm2412_vm3, %v3982_v8  ;;  %v3634_v24 = vpop.f32.mrf.mxu1 }
 0x4a7   : > { %v7379_v14 = vadd.f32 %v3634_v24, %v7217_v22  ;;  %5398 = vmatmul.msk.bf16.gmra.mxu0 %vm2412_vm3, %v7292_v5  ;;  %v7787_v22 = vld [vmem:[#allocation15_spill] sm:$0xff] }
 0x4a9   : > { %5428 = vmatmul.msk.bf16.gmra.mxu1 %vm2412_vm3, %v7223_v58 }
 0x4ae   : > { %v3636_v18 = vpop.f32.mrf.mxu1 }
 0x4af   : > { %v7386_v39 = vadd.f32 %v3636_v18, %v7228_v15  ;;  %v4453_v18 = vld [vmem:[#allocation3 + $0xf2] sm:$0xff] }
 0x4b0   : > { %v4477_v44 = vpack.c.bf16 %v4454_v26, %v4453_v18  ;;  %v7463_v26 = vpop.f32.mrf.mxu2 }
 0x4b5   : > { %5318 = vmatmul.msk.bf16.gmra.mxu2 %vm2412_vm3, %v7787_v22 }
 0x4b6   : > { %5358 = vmatmul.msk.bf16.gmra.mxu3 %vm2412_vm3, %v3983_v10  ;;  %v3639_v5 = vpop.f32.mrf.mxu1 }
 0x4b7   : > { %v7392_v58 = vadd.f32 %v3639_v5, %v7240_v53  ;;  %5399 = vmatmul.msk.bf16.gmra.mxu0 %vm2412_vm3, %v4234_v7 }
 0x4b9   : > { %5429 = vmatmul.msk.bf16.gmra.mxu1 %vm2412_vm3, %v4474_v37 }
 0x4be   : > { %v3641_v15 = vpop.f32.mrf.mxu1 }
 0x4bf   : > { %v7397_v28 = vadd.f32 %v3641_v15, %v7249_v31 }
 0x4c5   : > { %5319 = vmatmul.msk.bf16.gmra.mxu2 %vm2412_vm3, %v7399_v48 }
 0x4c6   : > { %5359 = vmatmul.msk.bf16.gmra.mxu3 %vm2412_vm3, %v3984_v11  ;;  %v3644_v53 = vpop.f32.mrf.mxu1  ;;  %v7445_v11 = vpop.f32.mrf.mxu0 }
 0x4c7   : > { %v7405_v52 = vadd.f32 %v3644_v53, %v7259_v32 }
 0x4c9   : > { %5430 = vmatmul.msk.bf16.gmra.mxu1 %vm2412_vm3, %v4475_v25 }
 0x4ce   : > { %v3646_v31 = vpop.f32.mrf.mxu1 }
 0x4cf   : > { %v7409_v45 = vadd.f32 %v3646_v31, %v7268_v4  ;;  %v4687_v4 = vld [vmem:[%s7728_s4] sm:$0x7]  ;;  %v4478_v31 = vpack.c.bf16 %v4456_v49, %v4455_v35  ;;  %v7479_v35 = vpop.f32.mrf.mxu2 }
 0x4d0   : > { %v7421_v36 = vperm.slane %v4687_v4, 0  ;;  %v7426_v7 = vperm.slane %v4687_v4, 1  ;;  %v7431_v41 = vperm.slane %v4687_v4, 2  ;;  %v7459_v4 = vpop.f32.mrf.mxu0 }
 0x4d6   : > { %v3649_v56 = vpop.f32.mrf.mxu1 }
 0x4d7   : > { %v7412_v8 = vadd.f32 %v3649_v56, %v7278_v20  ;;  %v7456_v56 = vpop.f32.mrf.mxu3 }
 0x4d9   : > { %5431 = vmatmul.msk.bf16.gmra.mxu1 %vm2412_vm3, %v4476_v0 }
 0x4de   : > { %v3651_v32 = vpop.f32.mrf.mxu1 }
 0x4df   : > { %v7416_v24 = vadd.f32 %v3651_v32, %v7287_v60 }
 0x4e6   : > { %v4575_v46 = vpop.f32.mrf.mxu1 }
 0x4e7   : > { %v4655_v20 = vadd.f32 %v4575_v46, %v7299_v2 }
 0x4e9   : > { %v4689_v10 = vadd.f32 %v7421_v36, %v4655_v20  ;;  %5432 = vmatmul.msk.bf16.gmra.mxu1 %vm2412_vm3, %v4477_v44  ;;  %v4457_v44 = vld [vmem:[#allocation3 + $0x122] sm:$0xff] }
 0x4eb   : > { %v4721_v60 = vmax.f32 %v4689_v10, 0.0  ;;  %v4458_v10 = vld [vmem:[#allocation3 + $0x12a] sm:$0xff] }
 0x4ed   : > { %v4754_v22 = vmul.f32 %v7426_v7, %v4721_v60 }
 0x4ee   : > { %v4577_v5 = vpop.f32.mrf.mxu1 }
 0x4ef   : > { %v4787_v2 = vadd.f32 %v7431_v41, %v4754_v22  ;;  %v4656_v37 = vadd.f32 %v4577_v5, %v7308_v33  ;;  %v7469_v22 = vpop.f32.mrf.mxu3 }
 0x4f1   : > { %4819 = vst.msk [vmem:[%s7438_s10] sm:$0xff] %vm2412_vm3, %v4787_v2  ;;  %v4690_v15 = vadd.f32 %v7421_v36, %v4656_v37 }
 0x4f3   : > { %v4722_v62 = vmax.f32 %v4690_v15, 0.0  ;;  %v7473_v15 = vpop.f32.mrf.mxu0 }
 0x4f5   : > { %v4755_v42 = vmul.f32 %v7426_v7, %v4722_v62 }
 0x4f6   : > { %v4580_v33 = vpop.f32.mrf.mxu1 }
 0x4f7   : > { %v4788_v53 = vadd.f32 %v7431_v41, %v4755_v42  ;;  %v4657_v25 = vadd.f32 %v4580_v33, %v7318_v13 }
 0x4f9   : > { %4820 = vst.msk [vmem:[%s7438_s10 + $0x8] sm:$0xff] %vm2412_vm3, %v4788_v53  ;;  %v4691_v51 = vadd.f32 %v7421_v36, %v4657_v25  ;;  %5433 = vmatmul.msk.bf16.gmra.mxu1 %vm2412_vm3, %v4478_v31  ;;  %v7484_v25 = vpop.f32.mrf.mxu3 }
 0x4fb   : > { %v4723_v40 = vmax.f32 %v4691_v51, 0.0  ;;  %v7489_v51 = vpop.f32.mrf.mxu0 }
 0x4fd   : > { %v4756_v0 = vmul.f32 %v7426_v7, %v4723_v40 }
 0x4fe   : > { %v4582_v32 = vpop.f32.mrf.mxu1 }
 0x4ff   : > { %v4789_v18 = vadd.f32 %v7431_v41, %v4756_v0  ;;  %v4658_v13 = vadd.f32 %v4582_v32, %v7327_v30  ;;  %v4479_v30 = vpack.c.bf16 %v4458_v10, %v4457_v44  ;;  %v7491_v0 = vpop.f32.mrf.mxu2  ;;  %v4459_v32 = vld [vmem:[#allocation3 + $0x13a] sm:$0xff] }
 0x501   : > { %4821 = vst.msk [vmem:[%s7438_s10 + $0x10] sm:$0xff] %vm2412_vm3, %v4789_v18  ;;  %v4692_v46 = vadd.f32 %v7421_v36, %v4658_v13  ;;  %v4460_v18 = vld [vmem:[#allocation3 + $0x142] sm:$0xff] }
 0x502   : > { %v4480_v44 = vpack.c.bf16 %v4460_v18, %v4459_v32 }
 0x503   : > { %v4724_v20 = vmax.f32 %v4692_v46, 0.0 }
 0x505   : > { %v4757_v60 = vmul.f32 %v7426_v7, %v4724_v20 }
 0x506   : > { %v4585_v5 = vpop.f32.mrf.mxu1 }
 0x507   : > { %v4790_v2 = vadd.f32 %v7431_v41, %v4757_v60  ;;  %v4659_v37 = vadd.f32 %v4585_v5, %v7337_v63  ;;  %v7500_v60 = vpop.f32.mrf.mxu3 }
 0x509   : > { %4822 = vst.msk [vmem:[%s7438_s10 + $0x18] sm:$0xff] %vm2412_vm3, %v4790_v2  ;;  %v4693_v62 = vadd.f32 %v7421_v36, %v4659_v37  ;;  %5434 = vmatmul.msk.bf16.gmra.mxu1 %vm2412_vm3, %v4479_v30  ;;  %v3912_v2 = vadd.f32 %v7433_v1, %v7231_v59  ;;  %v7504_v37 = vpop.f32.mrf.mxu0  ;;  %v4461_v1 = vld [vmem:[#allocation3 + $0x152] sm:$0xff] }
 0x50b   : > { %v4725_v49 = vmax.f32 %v4693_v62, 0.0  ;;  %v7507_v62 = vpop.f32.mrf.mxu2 }
 0x50d   : > { %v4758_v42 = vmul.f32 %v7426_v7, %v4725_v49 }
 0x50e   : > { %v4587_v33 = vpop.f32.mrf.mxu1 }
 0x50f   : > { %v4791_v53 = vadd.f32 %v7431_v41, %v4758_v42  ;;  %v4660_v63 = vadd.f32 %v4587_v33, %v7346_v12  ;;  %v4163_v33 = vadd.f32 %v7443_v6, %v3912_v2  ;;  %v7515_v59 = vpop.f32.mrf.mxu3 }
 0x511   : > { %4823 = vst.msk [vmem:[%s7438_s10 + $0x20] sm:$0xff] %vm2412_vm3, %v4791_v53  ;;  %v4694_v31 = vadd.f32 %v7421_v36, %v4660_v63  ;;  %v4413_v18 = vadd.f32 %v7445_v11, %v4163_v33  ;;  %v3914_v11 = vadd.f32 %v7463_v26, %v7252_v50  ;;  %v4463_v26 = vld [vmem:[#allocation3 + $0x16a] sm:$0xff] }
 0x513   : > { %v4726_v40 = vmax.f32 %v4694_v31, 0.0  ;;  %v4462_v31 = vld [vmem:[#allocation3 + $0x15a] sm:$0xff] }
 0x515   : > { %v4759_v13 = vmul.f32 %v7426_v7, %v4726_v40  ;;  %v3913_v40 = vadd.f32 %v7448_v17, %v7243_v9 }
 0x516   : > { %v4590_v46 = vpop.f32.mrf.mxu1 }
 0x517   : > { %v4792_v20 = vadd.f32 %v7431_v41, %v4759_v13  ;;  %v4661_v12 = vadd.f32 %v4590_v46, %v7355_v19  ;;  %v7521_v13 = vpop.f32.mrf.mxu0  ;;  %v4110_v2 = vpop.f32.mrf.mxu3 }
 0x519   : > { %4824 = vst.msk [vmem:[%s7438_s10 + $0x28] sm:$0xff] %vm2412_vm3, %v4792_v20  ;;  %v4695_v10 = vadd.f32 %v7421_v36, %v4661_v12  ;;  %5435 = vmatmul.msk.bf16.gmra.mxu1 %vm2412_vm3, %v4480_v44  ;;  %v4481_v20 = vpack.c.bf16 %v4462_v31, %v4461_v1  ;;  %v3859_v12 = vpop.f32.mrf.mxu2  ;;  %v4164_v44 = vadd.f32 %v7456_v56, %v3913_v40 }
 0x51a   : > { %v4165_v56 = vadd.f32 %v7469_v22, %v3914_v11 }
 0x51b   : > { %v4727_v5 = vmax.f32 %v4695_v10, 0.0 }
 0x51c   : > { %v4415_v31 = vadd.f32 %v7473_v15, %v4165_v56  ;;  %v3916_v15 = vadd.f32 %v7491_v0, %v7271_v54  ;;  %v3917_v54 = vadd.f32 %v7507_v62, %v7281_v43 }
 0x51d   : > { %v4760_v30 = vmul.f32 %v7426_v7, %v4727_v5  ;;  %v4414_v5 = vadd.f32 %v7459_v4, %v4164_v44  ;;  %v3915_v4 = vadd.f32 %v7479_v35, %v7262_v57 }
 0x51e   : > { %v4592_v19 = vpop.f32.mrf.mxu1 }
 0x51f   : > { %v4793_v49 = vadd.f32 %v7431_v41, %v4760_v30  ;;  %v4662_v42 = vadd.f32 %v4592_v19, %v7364_v47 }
 0x521   : > { %4825 = vst.msk [vmem:[%s7438_s10 + $0x30] sm:$0xff] %vm2412_vm3, %v4793_v49  ;;  %v4696_v53 = vadd.f32 %v7421_v36, %v4662_v42  ;;  %v7535_v42 = vpop.f32.mrf.mxu0 }
 0x523   : > { %v4728_v63 = vmax.f32 %v4696_v53, 0.0  ;;  %v3861_v53 = vpop.f32.mrf.mxu2 }
 0x525   : > { %v4761_v32 = vmul.f32 %v7426_v7, %v4728_v63  ;;  %v4464_v63 = vld [vmem:[#allocation3 + $0x172] sm:$0xff] }
 0x526   : > { %v4595_v47 = vpop.f32.mrf.mxu1 }
 0x527   : > { %v4794_v6 = vadd.f32 %v7431_v41, %v4761_v32  ;;  %v4663_v46 = vadd.f32 %v4595_v47, %v4413_v18  ;;  %v4482_v18 = vpack.c.bf16 %v4464_v63, %v4463_v26  ;;  %v4112_v47 = vpop.f32.mrf.mxu3 }
 0x529   : > { %4826 = vst.msk [vmem:[%s7438_s10 + $0x38] sm:$0xff] %vm2412_vm3, %v4794_v6  ;;  %v4697_v10 = vadd.f32 %v7421_v36, %v4663_v46  ;;  %5436 = vmatmul.msk.bf16.gmra.mxu1 %vm2412_vm3, %v4481_v20  ;;  %v4166_v6 = vadd.f32 %v7484_v25, %v3915_v4  ;;  %v4362_v57 = vpop.f32.mrf.mxu0  ;;  %v3918_v4 = vadd.f32 %v3859_v12, %v7290_v61 }
 0x52a   : > { %v3919_v61 = vadd.f32 %v3861_v53, %v7302_v21 }
 0x52b   : > { %v4729_v9 = vmax.f32 %v4697_v10, 0.0  ;;  %v3864_v20 = vpop.f32.mrf.mxu2  ;;  %v4416_v10 = vadd.f32 %v7489_v51, %v4166_v6  ;;  %v4467_v6 = vld [vmem:[#allocation3 + $0x19a] sm:$0xff] }
 0x52d   : > { %v4762_v17 = vmul.f32 %v7426_v7, %v4729_v9 }
 0x52e   : > { %v4597_v30 = vpop.f32.mrf.mxu1 }
 0x52f   : > { %v4795_v19 = vadd.f32 %v7431_v41, %v4762_v17  ;;  %v4664_v49 = vadd.f32 %v4597_v30, %v4414_v5  ;;  %v4167_v17 = vadd.f32 %v7500_v60, %v3916_v15  ;;  %v4115_v30 = vpop.f32.mrf.mxu3  ;;  %v4168_v60 = vadd.f32 %v7515_v59, %v3917_v54 }
 0x531   : > { %4827 = vst.msk [vmem:[%s7438_s10 + $0x40] sm:$0xff] %vm2412_vm3, %v4795_v19  ;;  %v4698_v33 = vadd.f32 %v7421_v36, %v4664_v49  ;;  %v4365_v0 = vpop.f32.mrf.mxu0  ;;  %v4417_v51 = vadd.f32 %v7504_v37, %v4167_v17 }
 0x533   : > { %v4730_v50 = vmax.f32 %v4698_v33, 0.0  ;;  %v3866_v56 = vpop.f32.mrf.mxu2 }
 0x535   : > { %v4763_v1 = vmul.f32 %v7426_v7, %v4730_v50 }
 0x536   : > { %v4600_v40 = vpop.f32.mrf.mxu1 }
 0x537   : > { %v4796_v22 = vadd.f32 %v7431_v41, %v4763_v1  ;;  %v4665_v32 = vadd.f32 %v4600_v40, %v4415_v31  ;;  %v4117_v62 = vpop.f32.mrf.mxu3  ;;  %v4418_v1 = vadd.f32 %v7521_v13, %v4168_v60 }
 0x539   : > { %4828 = vst.msk [vmem:[%s7438_s10 + $0x48] sm:$0xff] %vm2412_vm3, %v4796_v22  ;;  %v4699_v46 = vadd.f32 %v7421_v36, %v4665_v32  ;;  %5437 = vmatmul.msk.bf16.gmra.mxu1 %vm2412_vm3, %v4482_v18  ;;  %v4367_v40 = vpop.f32.mrf.mxu0  ;;  %v4169_v18 = vadd.f32 %v4110_v2, %v3918_v4 }
 0x53b   : > { %v4731_v35 = vmax.f32 %v4699_v46, 0.0  ;;  %v3869_v32 = vpop.f32.mrf.mxu2  ;;  %v4468_v46 = vld [vmem:[#allocation3 + $0x1a2] sm:$0xff]  ;;  %v4419_v13 = vadd.f32 %v7535_v42, %v4169_v18 }
 0x53c   : > { %v4484_v15 = vpack.c.bf16 %v4468_v46, %v4467_v6 }
 0x53d   : > { %v4764_v44 = vmul.f32 %v7426_v7, %v4731_v35 }
 0x53e   : > { %v4602_v9 = vpop.f32.mrf.mxu1 }
 0x53f   : > { %v4797_v11 = vadd.f32 %v7431_v41, %v4764_v44  ;;  %v4666_v25 = vadd.f32 %v4602_v9, %v4416_v10  ;;  %v4120_v44 = vpop.f32.mrf.mxu3 }
 0x541   : > { %4829 = vst.msk [vmem:[%s7438_s10 + $0x50] sm:$0xff] %vm2412_vm3, %v4797_v11  ;;  %v4700_v5 = vadd.f32 %v7421_v36, %v4666_v25  ;;  %v4170_v11 = vadd.f32 %v4112_v47, %v3919_v61  ;;  %v4370_v25 = vpop.f32.mrf.mxu0 }
 0x543   : > { %v4732_v19 = vmax.f32 %v4700_v5, 0.0  ;;  %v3871_v21 = vpop.f32.mrf.mxu2  ;;  %v3920_v5 = vadd.f32 %v3864_v20, %v7311_v29 }
 0x545   : > { %v4765_v49 = vmul.f32 %v7426_v7, %v4732_v19  ;;  %v4420_v19 = vadd.f32 %v4362_v57, %v4170_v11 }
 0x546   : > { %v4605_v33 = vpop.f32.mrf.mxu1 }
 0x547   : > { %v4798_v50 = vadd.f32 %v7431_v41, %v4765_v49  ;;  %v4667_v26 = vadd.f32 %v4605_v33, %v4417_v51  ;;  %v4122_v47 = vpop.f32.mrf.mxu3  ;;  %v4171_v33 = vadd.f32 %v4115_v30, %v3920_v5 }
 0x549   : > { %4830 = vst.msk [vmem:[%s7438_s10 + $0x58] sm:$0xff] %vm2412_vm3, %v4798_v50  ;;  %v4701_v63 = vadd.f32 %v7421_v36, %v4667_v26  ;;  %5438 = vmatmul.msk.bf16.gmra.mxu1 %vm2412_vm3, %v7399_v48  ;;  %v4372_v26 = vpop.f32.mrf.mxu0  ;;  %v4421_v20 = vadd.f32 %v4365_v0, %v4171_v33 }
 0x54b   : > { %v4733_v43 = vmax.f32 %v4701_v63, 0.0  ;;  %v3874_v63 = vpop.f32.mrf.mxu2 }
 0x54d   : > { %v4766_v37 = vmul.f32 %v7426_v7, %v4733_v43  ;;  %v3921_v43 = vadd.f32 %v3866_v56, %v7321_v38 }
 0x54e   : > { %v4607_v31 = vpop.f32.mrf.mxu1 }
 0x54f   : > { %v4799_v22 = vadd.f32 %v7431_v41, %v4766_v37  ;;  %v4668_v59 = vadd.f32 %v4607_v31, %v4418_v1  ;;  %v4172_v1 = vadd.f32 %v4117_v62, %v3921_v43  ;;  %v4125_v31 = vpop.f32.mrf.mxu3 }
 0x551   : > { %4831 = vst.msk [vmem:[%s7438_s10 + $0x60] sm:$0xff] %vm2412_vm3, %v4799_v22  ;;  %v4702_v48 = vadd.f32 %v7421_v36, %v4668_v59  ;;  %v3922_v59 = vadd.f32 %v3869_v32, %v7330_v34  ;;  %v4375_v18 = vpop.f32.mrf.mxu0  ;;  %v4422_v56 = vadd.f32 %v4367_v40, %v4172_v1 }
 0x553   : > { %v4734_v35 = vmax.f32 %v4702_v48, 0.0  ;;  %v3876_v48 = vpop.f32.mrf.mxu2 }
 0x555   : > { %v4767_v12 = vmul.f32 %v7426_v7, %v4734_v35  ;;  %v4173_v35 = vadd.f32 %v4120_v44, %v3922_v59 }
 0x556   : > { %v4610_v10 = vpop.f32.mrf.mxu1 }
 0x557   : > { %v4800_v9 = vadd.f32 %v7431_v41, %v4767_v12  ;;  %v4669_v2 = vadd.f32 %v4610_v10, %v4419_v13  ;;  %v4127_v12 = vpop.f32.mrf.mxu3  ;;  %v3923_v13 = vadd.f32 %v3871_v21, %v7340_v3  ;;  %v4423_v32 = vadd.f32 %v4370_v25, %v4173_v35 }
 0x559   : > { %4832 = vst.msk [vmem:[%s7438_s10 + $0x68] sm:$0xff] %vm2412_vm3, %v4800_v9  ;;  %v4703_v17 = vadd.f32 %v7421_v36, %v4669_v2  ;;  %5439 = vmatmul.msk.bf16.gmra.mxu1 %vm2412_vm3, %v4484_v15  ;;  %v4377_v40 = vpop.f32.mrf.mxu0  ;;  %v4174_v11 = vadd.f32 %v4122_v47, %v3923_v13 }
 0x55b   : > { %v4735_v53 = vmax.f32 %v4703_v17, 0.0  ;;  %v3879_v2 = vpop.f32.mrf.mxu2  ;;  %v4424_v21 = vadd.f32 %v4372_v26, %v4174_v11 }
 0x55d   : > { %v4768_v42 = vmul.f32 %v7426_v7, %v4735_v53  ;;  %v3924_v53 = vadd.f32 %v3874_v63, %v7349_v27 }
 0x55e   : > { %v4612_v54 = vpop.f32.mrf.mxu1 }
 0x55f   : > { %v4801_v49 = vadd.f32 %v7431_v41, %v4768_v42  ;;  %v4670_v51 = vadd.f32 %v4612_v54, %v4420_v19  ;;  %v4130_v5 = vpop.f32.mrf.mxu3  ;;  %v4175_v54 = vadd.f32 %v4125_v31, %v3924_v53 }
 0x561   : > { %4833 = vst.msk [vmem:[%s7438_s10 + $0x70] sm:$0xff] %vm2412_vm3, %v4801_v49  ;;  %v4704_v50 = vadd.f32 %v7421_v36, %v4670_v51  ;;  %v4380_v49 = vpop.f32.mrf.mxu0 }
 0x563   : > { %v4736_v60 = vmax.f32 %v4704_v50, 0.0  ;;  %v3881_v47 = vpop.f32.mrf.mxu2  ;;  %v3925_v50 = vadd.f32 %v3876_v48, %v7358_v16 }
 0x565   : > { %v4769_v29 = vmul.f32 %v7426_v7, %v4736_v60  ;;  %v4425_v60 = vadd.f32 %v4375_v18, %v4175_v54 }
 0x566   : > { %v4615_v57 = vpop.f32.mrf.mxu1 }
 0x567   : > { %v4802_v4 = vadd.f32 %v7431_v41, %v4769_v29  ;;  %v4671_v37 = vadd.f32 %v4615_v57, %v4421_v20  ;;  %v4132_v29 = vpop.f32.mrf.mxu3  ;;  %v4176_v20 = vadd.f32 %v4127_v12, %v3925_v50 }
 0x569   : > { %4834 = vst.msk [vmem:[%s7438_s10 + $0x78] sm:$0xff] %vm2412_vm3, %v4802_v4  ;;  %v4705_v30 = vadd.f32 %v7421_v36, %v4671_v37  ;;  %v4382_v4 = vpop.f32.mrf.mxu0  ;;  %v4426_v31 = vadd.f32 %v4377_v40, %v4176_v20 }
 0x56b   : > { %v4737_v22 = vmax.f32 %v4705_v30, 0.0  ;;  %v3884_v1 = vpop.f32.mrf.mxu2  ;;  %v3926_v30 = vadd.f32 %v3879_v2, %v7367_v55 }
 0x56d   : > { %v4770_v38 = vmul.f32 %v7426_v7, %v4737_v22 }
 0x56e   : > { %v4617_v0 = vpop.f32.mrf.mxu1 }
 0x56f   : > { %v4803_v6 = vadd.f32 %v7431_v41, %v4770_v38  ;;  %v4672_v46 = vadd.f32 %v4617_v0, %v4422_v56  ;;  %v4177_v38 = vadd.f32 %v4130_v5, %v3926_v30  ;;  %v4135_v48 = vpop.f32.mrf.mxu3 }
 0x571   : > { %4835 = vst.msk [vmem:[%s7438_s10 + $0x80] sm:$0xff] %vm2412_vm3, %v4803_v6  ;;  %v4706_v62 = vadd.f32 %v7421_v36, %v4672_v46  ;;  %v4385_v6 = vpop.f32.mrf.mxu0  ;;  %v3927_v46 = vadd.f32 %v3881_v47, %v7373_v23  ;;  %v4427_v35 = vadd.f32 %v4380_v49, %v4177_v38 }
 0x573   : > { %v4738_v61 = vmax.f32 %v4706_v62, 0.0  ;;  %v3886_v62 = vpop.f32.mrf.mxu2 }
 0x575   : > { %v4771_v34 = vmul.f32 %v7426_v7, %v4738_v61 }
 0x576   : > { %v4620_v15 = vpop.f32.mrf.mxu1 }
 0x577   : > { %v4804_v10 = vadd.f32 %v7431_v41, %v4771_v34  ;;  %v4673_v9 = vadd.f32 %v4620_v15, %v4423_v32  ;;  %v4178_v34 = vadd.f32 %v4132_v29, %v3927_v46  ;;  %v4137_v40 = vpop.f32.mrf.mxu3 }
 0x579   : > { %4836 = vst.msk [vmem:[%s7438_s10 + $0x88] sm:$0xff] %vm2412_vm3, %v4804_v10  ;;  %v4707_v44 = vadd.f32 %v7421_v36, %v4673_v9  ;;  %v3928_v10 = vadd.f32 %v3884_v1, %v7379_v14  ;;  %v4428_v9 = vadd.f32 %v4382_v4, %v4178_v34  ;;  %v4387_v11 = vpop.f32.mrf.mxu0 }
 0x57b   : > { %v4739_v17 = vmax.f32 %v4707_v44, 0.0  ;;  %v3889_v53 = vpop.f32.mrf.mxu2 }
 0x57d   : > { %v4772_v3 = vmul.f32 %v7426_v7, %v4739_v17 }
 0x57e   : > { %v4622_v25 = vpop.f32.mrf.mxu1 }
 0x57f   : > { %v4805_v42 = vadd.f32 %v7431_v41, %v4772_v3  ;;  %v4674_v19 = vadd.f32 %v4622_v25, %v4424_v21  ;;  %v4179_v3 = vadd.f32 %v4135_v48, %v3928_v10  ;;  %v3929_v25 = vadd.f32 %v3886_v62, %v7386_v39 }
 0x581   : > { %4837 = vst.msk [vmem:[%s7438_s10 + $0x90] sm:$0xff] %vm2412_vm3, %v4805_v42  ;;  %v4708_v51 = vadd.f32 %v7421_v36, %v4674_v19  ;;  %v4429_v42 = vadd.f32 %v4385_v6, %v4179_v3  ;;  %v4140_v19 = vpop.f32.mrf.mxu3  ;;  %v4390_v47 = vpop.f32.mrf.mxu0 }
 0x583   : > { %v4740_v33 = vmax.f32 %v4708_v51, 0.0 }
 0x585   : > { %v4773_v27 = vmul.f32 %v7426_v7, %v4740_v33  ;;  %v4180_v33 = vadd.f32 %v4137_v40, %v3929_v25 }
 0x586   : > { %v4625_v26 = vpop.f32.mrf.mxu1 }
 0x587   : > { %v4806_v63 = vadd.f32 %v7431_v41, %v4773_v27  ;;  %v4675_v43 = vadd.f32 %v4625_v26, %v4425_v60  ;;  %v3891_v27 = vpop.f32.mrf.mxu2  ;;  %v3930_v26 = vadd.f32 %v3889_v53, %v7392_v58 }
 0x589   : > { %4838 = vst.msk [vmem:[%s7438_s10 + $0x98] sm:$0xff] %vm2412_vm3, %v4806_v63  ;;  %v4709_v57 = vadd.f32 %v7421_v36, %v4675_v43  ;;  %v4430_v63 = vadd.f32 %v4387_v11, %v4180_v33  ;;  %v4181_v4 = vadd.f32 %v4140_v19, %v3930_v26  ;;  %v4392_v1 = vpop.f32.mrf.mxu0 }
 0x58b   : > { %v4741_v37 = vmax.f32 %v4709_v57, 0.0  ;;  %v4142_v57 = vpop.f32.mrf.mxu3 }
 0x58d   : > { %v4774_v16 = vmul.f32 %v7426_v7, %v4741_v37 }
 0x58e   : > { %v4627_v22 = vpop.f32.mrf.mxu1 }
 0x58f   : > { %v4807_v59 = vadd.f32 %v7431_v41, %v4774_v16  ;;  %v4676_v18 = vadd.f32 %v4627_v22, %v4426_v31  ;;  %v3894_v16 = vpop.f32.mrf.mxu2  ;;  %v3931_v31 = vadd.f32 %v3891_v27, %v7397_v28  ;;  %v4431_v22 = vadd.f32 %v4390_v47, %v4181_v4 }
 0x591   : > { %4839 = vst.msk [vmem:[%s7438_s10 + $0xa0] sm:$0xff] %vm2412_vm3, %v4807_v59  ;;  %v4710_v56 = vadd.f32 %v7421_v36, %v4676_v18  ;;  %v4395_v46 = vpop.f32.mrf.mxu0 }
 0x593   : > { %v4742_v0 = vmax.f32 %v4710_v56, 0.0  ;;  %v4182_v56 = vadd.f32 %v4142_v57, %v3931_v31 }
 0x595   : > { %v4775_v55 = vmul.f32 %v7426_v7, %v4742_v0  ;;  %v4145_v0 = vpop.f32.mrf.mxu3 }
 0x596   : > { %v4630_v61 = vpop.f32.mrf.mxu1 }
 0x597   : > { %v4808_v12 = vadd.f32 %v7431_v41, %v4775_v55  ;;  %v4677_v13 = vadd.f32 %v4630_v61, %v4427_v35  ;;  %v3932_v55 = vadd.f32 %v3894_v16, %v7405_v52  ;;  %v4432_v35 = vadd.f32 %v4392_v1, %v4182_v56  ;;  %v3896_v62 = vpop.f32.mrf.mxu2 }
 0x598   : > { %v3933_v10 = vadd.f32 %v3896_v62, %v7409_v45 }
 0x599   : > { %4840 = vst.msk [vmem:[%s7438_s10 + $0xa8] sm:$0xff] %vm2412_vm3, %v4808_v12  ;;  %v4711_v32 = vadd.f32 %v7421_v36, %v4677_v13  ;;  %v4183_v34 = vadd.f32 %v4145_v0, %v3932_v55 }
 0x59b   : > { %v4743_v15 = vmax.f32 %v4711_v32, 0.0 }
 0x59d   : > { %v4776_v23 = vmul.f32 %v7426_v7, %v4743_v15  ;;  %v4147_v40 = vpop.f32.mrf.mxu3 }
 0x59e   : > { %v4632_v2 = vpop.f32.mrf.mxu1  ;;  %v4184_v53 = vadd.f32 %v4147_v40, %v3933_v10 }
 0x59f   : > { %v4809_v44 = vadd.f32 %v7431_v41, %v4776_v23  ;;  %v4678_v17 = vadd.f32 %v4632_v2, %v4428_v9  ;;  %v4433_v23 = vadd.f32 %v4395_v46, %v4183_v34 }
 0x5a1   : > { %4841 = vst.msk [vmem:[%s7438_s10 + $0xb0] sm:$0xff] %vm2412_vm3, %v4809_v44  ;;  %v4712_v21 = vadd.f32 %v7421_v36, %v4678_v17  ;;  %v4397_v44 = vpop.f32.mrf.mxu0  ;;  %v3899_v17 = vpop.f32.mrf.mxu2 }
 0x5a2   : > { %v3934_v25 = vadd.f32 %v3899_v17, %v7412_v8 }
 0x5a3   : > { %v4744_v5 = vmax.f32 %v4712_v21, 0.0 }
 0x5a5   : > { %v4777_v14 = vmul.f32 %v7426_v7, %v4744_v5  ;;  %v4150_v5 = vpop.f32.mrf.mxu3 }
 0x5a6   : > { %v4635_v54 = vpop.f32.mrf.mxu1 }
 0x5a7   : > { %v4810_v49 = vadd.f32 %v7431_v41, %v4777_v14  ;;  %v4679_v51 = vadd.f32 %v4635_v54, %v4429_v42  ;;  %v4434_v14 = vadd.f32 %v4397_v44, %v4184_v53 }
 0x5a9   : > { %4842 = vst.msk [vmem:[%s7438_s10 + $0xb8] sm:$0xff] %vm2412_vm3, %v4810_v49  ;;  %v4713_v50 = vadd.f32 %v7421_v36, %v4679_v51  ;;  %v4400_v49 = vpop.f32.mrf.mxu0  ;;  %v4185_v51 = vadd.f32 %v4150_v5, %v3934_v25  ;;  %v3901_v33 = vpop.f32.mrf.mxu2 }
 0x5aa   : > { %v3935_v8 = vadd.f32 %v3901_v33, %v7416_v24 }
 0x5ab   : > { %v4745_v60 = vmax.f32 %v4713_v50, 0.0  ;;  %v4435_v27 = vadd.f32 %v4400_v49, %v4185_v51 }
 0x5ad   : > { %v4778_v39 = vmul.f32 %v7426_v7, %v4745_v60  ;;  %v4152_v26 = vpop.f32.mrf.mxu3 }
 0x5ae   : > { %v4637_v43 = vpop.f32.mrf.mxu1 }
 0x5af   : > { %v4811_v29 = vadd.f32 %v7431_v41, %v4778_v39  ;;  %v4680_v20 = vadd.f32 %v4637_v43, %v4430_v63 }
 0x5b1   : > { %4843 = vst.msk [vmem:[%s7438_s10 + $0xc0] sm:$0xff] %vm2412_vm3, %v4811_v29  ;;  %v4714_v37 = vadd.f32 %v7421_v36, %v4680_v20  ;;  %v4186_v29 = vadd.f32 %v4152_v26, %v3935_v8  ;;  %v4402_v57 = vpop.f32.mrf.mxu0 }
 0x5b3   : > { %v4746_v30 = vmax.f32 %v4714_v37, 0.0  ;;  %v4436_v37 = vadd.f32 %v4402_v57, %v4186_v29 }
 0x5b5   : > { %v4779_v58 = vmul.f32 %v7426_v7, %v4746_v30 }
 0x5b6   : > { %v4640_v59 = vpop.f32.mrf.mxu1 }
 0x5b7   : > { %v4812_v18 = vadd.f32 %v7431_v41, %v4779_v58  ;;  %v4681_v38 = vadd.f32 %v4640_v59, %v4431_v22 }
 0x5b9   : > { %4844 = vst.msk [vmem:[%s7438_s10 + $0xc8] sm:$0xff] %vm2412_vm3, %v4812_v18  ;;  %v4715_v48 = vadd.f32 %v7421_v36, %v4681_v38 }
 0x5bb   : > { %v4747_v6 = vmax.f32 %v4715_v48, 0.0 }
 0x5bd   : > { %v4780_v28 = vmul.f32 %v7426_v7, %v4747_v6 }
 0x5be   : > { %v4642_v61 = vpop.f32.mrf.mxu1 }
 0x5bf   : > { %v4813_v12 = vadd.f32 %v7431_v41, %v4780_v28  ;;  %v4682_v13 = vadd.f32 %v4642_v61, %v4432_v35 }
 0x5c1   : > { %4845 = vst.msk [vmem:[%s7438_s10 + $0xd0] sm:$0xff] %vm2412_vm3, %v4813_v12  ;;  %v4716_v32 = vadd.f32 %v7421_v36, %v4682_v13 }
 0x5c3   : > { %v4748_v15 = vmax.f32 %v4716_v32, 0.0 }
 0x5c5   : > { %v4781_v52 = vmul.f32 %v7426_v7, %v4748_v15 }
 0x5c6   : > { %v4645_v9 = vpop.f32.mrf.mxu1 }
 0x5c7   : > { %v4814_v2 = vadd.f32 %v7431_v41, %v4781_v52  ;;  %v4683_v11 = vadd.f32 %v4645_v9, %v4433_v23 }
 0x5c9   : > { %4846 = vst.msk [vmem:[%s7438_s10 + $0xd8] sm:$0xff] %vm2412_vm3, %v4814_v2  ;;  %v4717_v3 = vadd.f32 %v7421_v36, %v4683_v11 }
 0x5cb   : > { %v4749_v21 = vmax.f32 %v4717_v3, 0.0 }
 0x5cd   : > { %v4782_v45 = vmul.f32 %v7426_v7, %v4749_v21 }
 0x5ce   : > { %v4647_v42 = vpop.f32.mrf.mxu1 }
 0x5cf   : > { %v4815_v19 = vadd.f32 %v7431_v41, %v4782_v45  ;;  %v4684_v54 = vadd.f32 %v4647_v42, %v4434_v14 }
 0x5d1   : > { %4847 = vst.msk [vmem:[%s7438_s10 + $0xe0] sm:$0xff] %vm2412_vm3, %v4815_v19  ;;  %v4718_v47 = vadd.f32 %v7421_v36, %v4684_v54 }
 0x5d3   : > { %v4750_v50 = vmax.f32 %v4718_v47, 0.0 }
 0x5d5   : > { %v4783_v60 = vmul.f32 %v7426_v7, %v4750_v50 }
 0x5d6   : > { %v4650_v39 = vpop.f32.mrf.mxu1 }
 0x5d7   : > { %v4816_v63 = vadd.f32 %v7431_v41, %v4783_v60  ;;  %v4685_v43 = vadd.f32 %v4650_v39, %v4435_v27 }
 0x5d9   : > { %4848 = vst.msk [vmem:[%s7438_s10 + $0xe8] sm:$0xff] %vm2412_vm3, %v4816_v63  ;;  %v4719_v20 = vadd.f32 %v7421_v36, %v4685_v43 }
 0x5db   : > { %v4751_v4 = vmax.f32 %v4719_v20, 0.0 }
 0x5dd   : > { %v4784_v24 = vmul.f32 %v7426_v7, %v4751_v4 }
 0x5de   : > { %v4652_v1 = vpop.f32.mrf.mxu1 }
 0x5df   : > { %v4817_v30 = vadd.f32 %v7431_v41, %v4784_v24  ;;  %v4686_v16 = vadd.f32 %v4652_v1, %v4436_v37 }
 0x5e1   : > { %4849 = vst.msk [vmem:[%s7438_s10 + $0xf0] sm:$0xff] %vm2412_vm3, %v4817_v30  ;;  %v4720_v31 = vadd.f32 %v7421_v36, %v4686_v16 }
 0x5e3   : > { %v4752_v58 = vmax.f32 %v4720_v31, 0.0 }
 0x5e5   : > { %v4785_v22 = vmul.f32 %v7426_v7, %v4752_v58 }
 0x5e7   : > { %v4818_v59 = vadd.f32 %v7431_v41, %v4785_v22 }
 0x5e9   : > { %4850 = vst.msk [vmem:[%s7438_s10 + $0xf8] sm:$0xff] %vm2412_vm3, %v4818_v59 }
 0x5ea   : > { %5554 = shalt.err (!%p5551_p3)
}
 0x5eb   : > { %s5592_s8 = smov 128   ;;  %s5593_s9 = smov 8  }
 0x5ec   : > { %5485 = dma.vmem_to_hbm [thread:$0]  (%p5662_p5), %s4865_s15, 4096, %s4867_s16, %s4852_s22, %s5592_s8, %s5592_s8, %s5593_s9  }
 0x5ed PF: > { %p5491_p4 = scmp.ge.s32.totalorder %s5589_s21, 2  ;;  %s4881_s10 = sand.u32 1, %s5577_s18  }
 0x5ee   : > { %s4882_s11 = scalar_lea.sflag [#allocation5], %s4881_s10 }
 0x5ef   : > { %p5488_p7 = pnand %p5491_p4, %p5666_p6 }
 0x5f1   : > { %p5489_p8 = pneg %p5488_p7 }
 0x5f3   : > { %5572 = dma.done.wait (%p5489_p8), %s4882_s11, 4096  }
 0x5f4   : > { %5574 = vsyncadd (%p5489_p8), %s4882_s11, 4294963200  ;;  %p15_p9 = scmp.ge.s32.totalorder %s5649_s24, 4   ;;  %s7788_s18 = smov %s5581_s19 }
 0x5f5   : > { %s7789_s19 = smov %s5585_s20  ;;  %s7790_s20 = smov %s5660_s27 }
 0x5f6   : > { %s7791_s21 = smov %s5649_s24  ;;  %17 = sbr.rel (!%p15_p9) target bundleno = 3 (0x3), region = 95 }
 0x5fb   :  { %4888 = vsyncpa [#allocation5], 1 }
 0x5fc   :  { %4890 = vsyncpa [#allocation5 + $0x1], 1 }

</bundles_post_ra>
